<compile_context>
chip_gen: v7x
topology: tpu7x:2x2x1
jax: 0.10.0
libtpu: 0.0.40
codegen_flags: <defaults>
</compile_context>

<pallas_src>
import functools

import jax
import jax.numpy as jnp
from jax.experimental import pallas as pl
from jax.experimental.pallas import tpu as pltpu


# Row tile (matches the 256-wide MXU on v6e/v7x, still fine on v5e) and the
# contraction chunk over the node dimension.  KB must be a multiple of TM so a
# single round-up of N covers both.
TM = 256
KB = 512

_SEMANTICS = pltpu.CompilerParams(
    dimension_semantics=("parallel", "arbitrary"))


def _round_up(v, m):
    return ((v + m - 1) // m) * m


def _pad2(a, shape):
    out = jnp.zeros(shape, jnp.float32)
    return out.at[: a.shape[0], : a.shape[1]].set(a.astype(jnp.float32))


# ----------------------------------------------------------------------------
# Kernel 1: fused MLP front-end (delta pre-folded into weights), K-tiled over
# the node dim of adj@w4.
#   y = fc2( relu( fc3( relu( x@w1' + adj@w4' + b14 ) ) ) )
# ----------------------------------------------------------------------------
def mlp_kernel(x_ref, w1_ref, b14_ref, adj_ref, w4_ref, w3_ref, b3_ref,
               w2_ref, b2_ref, y_ref, acc_ref):
    k = pl.program_id(1)

    @pl.when(k == 0)
    def _():
        acc_ref[...] = (jnp.dot(x_ref[...], w1_ref[...],
                                preferred_element_type=jnp.float32)
                        + b14_ref[...])

    # bf16 x bf16 -> f32 accumulate (native MXU path, half the adj HBM bytes).
    acc_ref[...] += jnp.dot(adj_ref[...], w4_ref[...],
                            preferred_element_type=jnp.float32)

    @pl.when(k == pl.num_programs(1) - 1)
    def _():
        h = jnp.maximum(acc_ref[...], 0.0)
        # TODO(synk): dropout omitted (eval mode, training=False -> identity).
        h = jnp.maximum(
            jnp.dot(h, w3_ref[...], preferred_element_type=jnp.float32)
            + b3_ref[...], 0.0)
        y_ref[...] = (jnp.dot(h, w2_ref[...],
                              preferred_element_type=jnp.float32)
                      + b2_ref[...])


def run_mlp(x, adj_bf, w1, b14, w4_bf, w3, b3, w2, b2, *, tm, kb):
    Np, F = x.shape
    H = w1.shape[1]
    Cp = w2.shape[1]
    grid = (Np // tm, Np // kb)

    def resident(shape):
        return pl.BlockSpec(shape, lambda i, k: (0, 0))

    return pl.pallas_call(
        mlp_kernel,
        out_shape=jax.ShapeDtypeStruct((Np, Cp), jnp.float32),
        grid=grid,
        in_specs=[
            pl.BlockSpec((tm, F), lambda i, k: (i, 0)),   # x row tile (1 DMA/i)
            resident((F, H)),                              # w1'
            resident((1, H)),                              # b14
            pl.BlockSpec((tm, kb), lambda i, k: (i, k)),   # adj tile (bf16)
            pl.BlockSpec((kb, H), lambda i, k: (k, 0)),    # w4' chunk (bf16)
            resident((H, H)), resident((1, H)),            # w3, b3
            resident((H, Cp)), resident((1, Cp)),          # w2, b2
        ],
        out_specs=pl.BlockSpec((tm, Cp), lambda i, k: (i, 0)),
        scratch_shapes=[pltpu.VMEM((tm, H), jnp.float32)],
        compiler_params=_SEMANTICS,
    )(x, w1, b14, adj_bf, w4_bf, w3, b3, w2, b2)


# ----------------------------------------------------------------------------
# Kernel 2: one adjacency power with fused running sum.
#   t_new = adj @ t_prev ; s_new = s_prev + t_new
# Grid (row_tiles, k_tiles); adj streamed bf16, carry t kept f32 in HBM and
# only rounded to bf16 as the dot operand; accumulation stays f32.
# ----------------------------------------------------------------------------
def power_kernel(adj_ref, t_ref, s_ref, t_out_ref, s_out_ref, acc_ref):
    k = pl.program_id(1)

    @pl.when(k == 0)
    def _():
        acc_ref[...] = jnp.zeros_like(acc_ref)

    acc_ref[...] += jnp.dot(adj_ref[...], t_ref[...].astype(jnp.bfloat16),
                            preferred_element_type=jnp.float32)

    @pl.when(k == pl.num_programs(1) - 1)
    def _():
        t_new = acc_ref[...]
        t_out_ref[...] = t_new
        s_out_ref[...] = s_ref[...] + t_new


def run_power_step(adj_bf, t, s, *, tm, kb):
    Np, Cp = t.shape
    grid = (Np // tm, Np // kb)
    return pl.pallas_call(
        power_kernel,
        out_shape=(jax.ShapeDtypeStruct((Np, Cp), jnp.float32),
                   jax.ShapeDtypeStruct((Np, Cp), jnp.float32)),
        grid=grid,
        in_specs=[
            pl.BlockSpec((tm, kb), lambda i, k: (i, k)),   # adj tile (bf16)
            pl.BlockSpec((kb, Cp), lambda i, k: (k, 0)),   # t_prev chunk (f32)
            pl.BlockSpec((tm, Cp), lambda i, k: (i, 0)),   # s_prev row tile
        ],
        out_specs=(pl.BlockSpec((tm, Cp), lambda i, k: (i, 0)),
                   pl.BlockSpec((tm, Cp), lambda i, k: (i, 0))),
        scratch_shapes=[pltpu.VMEM((tm, Cp), jnp.float32)],
        compiler_params=_SEMANTICS,
    )(adj_bf, t, s)


# ----------------------------------------------------------------------------
# Kernel 3: last adjacency power with the fused norm-layer epilogue.
#   s_new = s_prev + adj @ t_prev
#   out   = (coe1*y - gamma*coe1*h0) @ tmp + beta*s_new + gamma*h0
# (one matmul against tmp instead of two; no t writeback on the last order).
# ----------------------------------------------------------------------------
def power_last_kernel(adj_ref, t_ref, s_ref, y_ref, h0_ref, tmp_ref, out_ref,
                      acc_ref, *, coe1, beta, gamma):
    k = pl.program_id(1)

    @pl.when(k == 0)
    def _():
        acc_ref[...] = jnp.zeros_like(acc_ref)

    acc_ref[...] += jnp.dot(adj_ref[...], t_ref[...].astype(jnp.bfloat16),
                            preferred_element_type=jnp.float32)

    @pl.when(k == pl.num_programs(1) - 1)
    def _():
        s_new = s_ref[...] + acc_ref[...]
        lhs = coe1 * y_ref[...] - (gamma * coe1) * h0_ref[...]
        out_ref[...] = (jnp.dot(lhs, tmp_ref[...],
                                preferred_element_type=jnp.float32)
                        + beta * s_new + gamma * h0_ref[...])


def run_power_last(adj_bf, t, s, y, h0, tmp_pad, *, coe1, beta, gamma, tm, kb):
    Np, Cp = t.shape
    grid = (Np // tm, Np // kb)
    kern = functools.partial(power_last_kernel, coe1=float(coe1),
                             beta=float(beta), gamma=float(gamma))
    return pl.pallas_call(
        kern,
        out_shape=jax.ShapeDtypeStruct((Np, Cp), jnp.float32),
        grid=grid,
        in_specs=[
            pl.BlockSpec((tm, kb), lambda i, k: (i, k)),   # adj tile (bf16)
            pl.BlockSpec((kb, Cp), lambda i, k: (k, 0)),   # t_prev chunk
            pl.BlockSpec((tm, Cp), lambda i, k: (i, 0)),   # s_prev row tile
            pl.BlockSpec((tm, Cp), lambda i, k: (i, 0)),   # y row tile
            pl.BlockSpec((tm, Cp), lambda i, k: (i, 0)),   # h0 row tile
            pl.BlockSpec((Cp, Cp), lambda i, k: (0, 0)),   # tmp (resident)
        ],
        out_specs=pl.BlockSpec((tm, Cp), lambda i, k: (i, 0)),
        scratch_shapes=[pltpu.VMEM((tm, Cp), jnp.float32)],
        compiler_params=_SEMANTICS,
    )(adj_bf, t, s, y, h0, tmp_pad)


# ----------------------------------------------------------------------------
# C x C glue (tiny next to the N^2 adj streams)
# ----------------------------------------------------------------------------
def _small_mats(gram_pad, nclass, coe, coe1, coe2):
    """inv -> M (res = y@M) and tmp (= y^T res = gram@M), zero-padded to Cp."""
    Cp = gram_pad.shape[0]
    g = gram_pad[:nclass, :nclass]
    eye = jnp.eye(nclass, dtype=jnp.float32)
    inv = jnp.linalg.inv(coe2 * coe2 * eye + coe * g)   # torch.inverse
    m = (coe1 * coe) * eye - (coe1 * coe * coe) * (inv @ g)
    t = g @ m
    m_pad = jnp.zeros((Cp, Cp), jnp.float32).at[:nclass, :nclass].set(m)
    t_pad = jnp.zeros((Cp, Cp), jnp.float32).at[:nclass, :nclass].set(t)
    return m_pad, t_pad


# ----------------------------------------------------------------------------
# Forward
# ----------------------------------------------------------------------------
@functools.partial(jax.jit, static_argnames=(
    "alpha", "beta", "gamma", "delta", "norm_layers", "orders"))
def mlpnorm_forward(x, adj, params, *, alpha, beta, gamma, delta,
                    norm_layers, orders):
    N, F = x.shape
    nhid = params["w1"].shape[1]
    nclass = params["w2"].shape[1]
    H = _round_up(nhid, 128)       # lane-dense hidden
    Cp = _round_up(nclass, 128)    # lane-dense class dim
    Np = _round_up(N, KB)          # KB is a multiple of TM -> covers both
    tm, kb = TM, KB

    coe = 1.0 / (alpha + beta)
    coe1 = 1.0 - gamma
    coe2 = 1.0 / coe1

    # Fold delta into fc1/fc4, zero-pad all weights once; adj/w4 go to bf16.
    w1 = _pad2(delta * params["w1"], (F, H))
    b14 = _pad2(delta * params["b1"] + (1.0 - delta) * params["b4"], (1, H))
    w4_bf = _pad2((1.0 - delta) * params["w4"], (Np, H)).astype(jnp.bfloat16)
    w3 = _pad2(params["w3"], (H, H))
    b3 = _pad2(params["b3"], (1, H))
    w2 = _pad2(params["w2"], (H, Cp))
    b2 = _pad2(params["b2"], (1, Cp))

    x_p = _pad2(x, (Np, F))
    adj_bf = _pad2(adj, (Np, Np)).astype(jnp.bfloat16)

    y = run_mlp(x_p, adj_bf, w1, b14, w4_bf, w3, b3, w2, b2, tm=tm, kb=kb)
    if Np > N:
        # Padded rows carry relu(bias)-propagated values; zero them so gram
        # and the adjacency powers stay exact (adj padded rows/cols are zero).
        y = jnp.where(jnp.arange(Np)[:, None] < N, y, 0.0)
    h0 = y

    for _ in range(norm_layers):
        # gram / inverse / M / tmp / res are O(N*Cp^2) or smaller -> XLA glue.
        gram = y.T @ y
        m_pad, tmp_pad = _small_mats(gram, nclass, coe, coe1, coe2)
        res = y @ m_pad
        t, s = res, res
        if orders == 0:
            lhs = coe1 * y - (gamma * coe1) * h0
            y = lhs @ tmp_pad + beta * s + gamma * h0
            continue
        for _ in range(orders - 1):
            t, s = run_power_step(adj_bf, t, s, tm=tm, kb=kb)
        y = run_power_last(adj_bf, t, s, y, h0, tmp_pad,
                           coe1=coe1, beta=beta, gamma=gamma, tm=tm, kb=kb)
    return y[:N, :nclass]


# ----------------------------------------------------------------------------
# Pure-JAX reference (mirrors the torch module exactly, all f32)
# ----------------------------------------------------------------------------
def mlpnorm_forward_ref(x, adj, params, *, alpha, beta, gamma, delta,
                        norm_layers, orders):
    nclass = params["w2"].shape[1]
    coe = 1.0 / (alpha + beta)
    coe1 = 1.0 - gamma
    coe2 = 1.0 / coe1
    eye = jnp.eye(nclass, dtype=jnp.float32)

    xX = x @ params["w1"] + params["b1"]
    xA = adj @ params["w4"] + params["b4"]
    h = jax.nn.relu(delta * xX + (1.0 - delta) * xA)
    h = jax.nn.relu(h @ params["w3"] + params["b3"])
    y = h @ params["w2"] + params["b2"]
    h0 = y
    for _ in range(norm_layers):
        gram = y.T @ y
        inv = jnp.linalg.inv(coe2 * coe2 * eye + coe * gram)
        res_small = inv @ gram
        res = coe1 * coe * y - coe1 * coe * coe * (y @ res_small)
        tmp = y.T @ res
        t = res
        s = res
        for _ in range(orders):
            t = adj @ t
            s = s + t
        y = coe1 * (y @ tmp) + beta * s - gamma * coe1 * (h0 @ tmp) + gamma * h0
    return y


# ----------------------------------------------------------------------------
# main
# ----------------------------------------------------------------------------
if __name__ == "__main__":
    # Small shapes consistent with the module (padded to 2 row tiles internally).
    nnodes, nfeat, nhid, nclass = 256, 64, 32, 8
    alpha, beta, gamma, delta = 0.5, 0.5, 0.6, 0.5
    norm_layers, orders = 2, 3

    key = jax.random.PRNGKey(0)
    keys = jax.random.split(key, 10)

    x = jax.random.normal(keys[0], (nnodes, nfeat), dtype=jnp.float32)
    a_raw = (jax.random.uniform(keys[1], (nnodes, nnodes)) < 0.05).astype(jnp.float32)
    a_raw = a_raw + jnp.eye(nnodes, dtype=jnp.float32)
    adj = a_raw / jnp.sum(a_raw, axis=1, keepdims=True)

    def lin_init(kw, kb_, fan_in, fan_out):
        bound = 1.0 / jnp.sqrt(fan_in)
        w = jax.random.uniform(kw, (fan_in, fan_out), minval=-bound, maxval=bound)
        b = jax.random.uniform(kb_, (1, fan_out), minval=-bound, maxval=bound)
        return w.astype(jnp.float32), b.astype(jnp.float32)

    w1, b1 = lin_init(keys[2], keys[3], nfeat, nhid)     # fc1: nfeat  -> nhid
    w2, b2 = lin_init(keys[4], keys[5], nhid, nclass)    # fc2: nhid   -> nclass
    w3, b3 = lin_init(keys[6], keys[7], nhid, nhid)      # fc3: nhid   -> nhid
    w4, b4 = lin_init(keys[8], keys[9], nnodes, nhid)    # fc4: nnodes -> nhid

    params = dict(w1=w1, b1=b1, w2=w2, b2=b2, w3=w3, b3=b3, w4=w4, b4=b4)

    out = mlpnorm_forward(x, adj, params, alpha=alpha, beta=beta, gamma=gamma,
                          delta=delta, norm_layers=norm_layers, orders=orders)
    out = jax.block_until_ready(out)

    ref = mlpnorm_forward_ref(x, adj, params, alpha=alpha, beta=beta,
                              gamma=gamma, delta=delta,
                              norm_layers=norm_layers, orders=orders)
    assert out.shape == (nnodes, nclass)
    # Tolerance relaxed vs. the all-f32 reference because adj (and the per-dot
    # power-iteration operand) are bf16 on the MXU; accumulation stays f32.
    assert jnp.allclose(out, ref, atol=1e-2, rtol=1e-2), (
        "mismatch vs reference, max abs diff = "
        f"{float(jnp.max(jnp.abs(out - ref)))}")

    print("KERNEL_OK")
</pallas_src>

<mosaic_0001>
module attributes {stable_mosaic.version = 11 : i64} {
  func.func @mlp_kernel(%arg0: i32, %arg1: i32, %arg2: memref<256x64xf32, #tpu.memory_space<vmem>>, %arg3: memref<64x128xf32, #tpu.memory_space<vmem>>, %arg4: memref<1x128xf32, #tpu.memory_space<vmem>>, %arg5: memref<256x512xbf16, #tpu.memory_space<vmem>>, %arg6: memref<512x128xbf16, #tpu.memory_space<vmem>>, %arg7: memref<128x128xf32, #tpu.memory_space<vmem>>, %arg8: memref<1x128xf32, #tpu.memory_space<vmem>>, %arg9: memref<128x128xf32, #tpu.memory_space<vmem>>, %arg10: memref<1x128xf32, #tpu.memory_space<vmem>>, %arg11: memref<256x128xf32, #tpu.memory_space<vmem>>, %arg12: memref<256x128xf32, #tpu.memory_space<vmem>>) attributes {dimension_semantics = [#tpu.dimension_semantics<parallel>, #tpu.dimension_semantics<arbitrary>], iteration_bounds = array<i64: 2, 1>, scalar_prefetch = 0 : i64, scratch_operands = 1 : i64, tpu.core_type = #tpu.core_type<tc>, window_params = [{transform_indices = @transform_0, window_bounds = array<i64: 256, 64>}, {pipeline_mode = #tpu.pipeline_mode<synchronous>, transform_indices = @transform_1, window_bounds = array<i64: 64, 128>}, {pipeline_mode = #tpu.pipeline_mode<synchronous>, transform_indices = @transform_2, window_bounds = array<i64: 1, 128>}, {transform_indices = @transform_3, window_bounds = array<i64: 256, 512>}, {transform_indices = @transform_4, window_bounds = array<i64: 512, 128>}, {pipeline_mode = #tpu.pipeline_mode<synchronous>, transform_indices = @transform_5, window_bounds = array<i64: 128, 128>}, {pipeline_mode = #tpu.pipeline_mode<synchronous>, transform_indices = @transform_6, window_bounds = array<i64: 1, 128>}, {pipeline_mode = #tpu.pipeline_mode<synchronous>, transform_indices = @transform_7, window_bounds = array<i64: 128, 128>}, {pipeline_mode = #tpu.pipeline_mode<synchronous>, transform_indices = @transform_8, window_bounds = array<i64: 1, 128>}, {transform_indices = @transform_9, window_bounds = array<i64: 256, 128>}]} {
    %c0_i32 = arith.constant 0 : i32
    %0 = arith.cmpi eq, %arg1, %c0_i32 : i32
    %1 = arith.extui %0 : i1 to i32
    %c0_i32_0 = arith.constant 0 : i32
    %2 = arith.cmpi ne, %1, %c0_i32_0 : i32
    scf.if %2 {
      %c0_10 = arith.constant 0 : index
      %c0_11 = arith.constant 0 : index
      %12 = vector.load %arg2[%c0_10, %c0_11] : memref<256x64xf32, #tpu.memory_space<vmem>>, vector<256x64xf32>
      %c0_12 = arith.constant 0 : index
      %c0_13 = arith.constant 0 : index
      %13 = vector.load %arg3[%c0_12, %c0_13] : memref<64x128xf32, #tpu.memory_space<vmem>>, vector<64x128xf32>
      %cst_14 = arith.constant dense<0.000000e+00> : vector<256x128xf32>
      %14 = tpu.matmul %12, %13, %cst_14 {dimension_numbers = #tpu.dot_dimension_numbers<[1], [0], [0], [1], [0, 0, 1, 1], [], []>} : vector<256x64xf32>, vector<64x128xf32>, vector<256x128xf32> -> vector<256x128xf32>
      %c0_15 = arith.constant 0 : index
      %c0_16 = arith.constant 0 : index
      %15 = vector.load %arg4[%c0_15, %c0_16] : memref<1x128xf32, #tpu.memory_space<vmem>>, vector<1x128xf32>
      %16 = vector.broadcast %15 : vector<1x128xf32> to vector<256x128xf32>
      %17 = arith.addf %14, %16 : vector<256x128xf32>
      %c0_17 = arith.constant 0 : index
      %c0_18 = arith.constant 0 : index
      %18 = vector.load %arg12[%c0_17, %c0_18] : memref<256x128xf32, #tpu.memory_space<vmem>>, vector<256x128xf32>
      tpu.vector_store %arg12[%c0_17, %c0_18], %17 {strides = array<i32>} : memref<256x128xf32, #tpu.memory_space<vmem>>, vector<256x128xf32>,
    } else {
    }
    %c0 = arith.constant 0 : index
    %c0_1 = arith.constant 0 : index
    %3 = vector.load %arg12[%c0, %c0_1] : memref<256x128xf32, #tpu.memory_space<vmem>>, vector<256x128xf32>
    %c0_2 = arith.constant 0 : index
    %c0_3 = arith.constant 0 : index
    %4 = vector.load %arg5[%c0_2, %c0_3] : memref<256x512xbf16, #tpu.memory_space<vmem>>, vector<256x512xbf16>
    %c0_4 = arith.constant 0 : index
    %c0_5 = arith.constant 0 : index
    %5 = vector.load %arg6[%c0_4, %c0_5] : memref<512x128xbf16, #tpu.memory_space<vmem>>, vector<512x128xbf16>
    %cst = arith.constant dense<0.000000e+00> : vector<256x128xf32>
    %6 = tpu.matmul %4, %5, %cst {dimension_numbers = #tpu.dot_dimension_numbers<[1], [0], [0], [1], [0, 0, 1, 1], [], []>} : vector<256x512xbf16>, vector<512x128xbf16>, vector<256x128xf32> -> vector<256x128xf32>
    %7 = arith.addf %3, %6 : vector<256x128xf32>
    %c0_6 = arith.constant 0 : index
    %c0_7 = arith.constant 0 : index
    %8 = vector.load %arg12[%c0_6, %c0_7] : memref<256x128xf32, #tpu.memory_space<vmem>>, vector<256x128xf32>
    tpu.vector_store %arg12[%c0_6, %c0_7], %7 {strides = array<i32>} : memref<256x128xf32, #tpu.memory_space<vmem>>, vector<256x128xf32>,
    %c0_i32_8 = arith.constant 0 : i32
    %9 = arith.cmpi eq, %arg1, %c0_i32_8 : i32
    %10 = arith.extui %9 : i1 to i32
    %c0_i32_9 = arith.constant 0 : i32
    %11 = arith.cmpi ne, %10, %c0_i32_9 : i32
    scf.if %11 {
      %c0_10 = arith.constant 0 : index
      %c0_11 = arith.constant 0 : index
      %12 = vector.load %arg12[%c0_10, %c0_11] : memref<256x128xf32, #tpu.memory_space<vmem>>, vector<256x128xf32>
      %cst_12 = arith.constant 0.000000e+00 : f32
      %13 = vector.broadcast %cst_12 : f32 to vector<256x128xf32>
      %14 = arith.maximumf %12, %13 : vector<256x128xf32>
      %c0_13 = arith.constant 0 : index
      %c0_14 = arith.constant 0 : index
      %15 = vector.load %arg7[%c0_13, %c0_14] : memref<128x128xf32, #tpu.memory_space<vmem>>, vector<128x128xf32>
      %cst_15 = arith.constant dense<0.000000e+00> : vector<256x128xf32>
      %16 = tpu.matmul %14, %15, %cst_15 {dimension_numbers = #tpu.dot_dimension_numbers<[1], [0], [0], [1], [0, 0, 1, 1], [], []>} : vector<256x128xf32>, vector<128x128xf32>, vector<256x128xf32> -> vector<256x128xf32>
      %c0_16 = arith.constant 0 : index
      %c0_17 = arith.constant 0 : index
      %17 = vector.load %arg8[%c0_16, %c0_17] : memref<1x128xf32, #tpu.memory_space<vmem>>, vector<1x128xf32>
      %18 = vector.broadcast %17 : vector<1x128xf32> to vector<256x128xf32>
      %19 = arith.addf %16, %18 : vector<256x128xf32>
      %cst_18 = arith.constant 0.000000e+00 : f32
      %20 = vector.broadcast %cst_18 : f32 to vector<256x128xf32>
      %21 = arith.maximumf %19, %20 : vector<256x128xf32>
      %c0_19 = arith.constant 0 : index
      %c0_20 = arith.constant 0 : index
      %22 = vector.load %arg9[%c0_19, %c0_20] : memref<128x128xf32, #tpu.memory_space<vmem>>, vector<128x128xf32>
      %cst_21 = arith.constant dense<0.000000e+00> : vector<256x128xf32>
      %23 = tpu.matmul %21, %22, %cst_21 {dimension_numbers = #tpu.dot_dimension_numbers<[1], [0], [0], [1], [0, 0, 1, 1], [], []>} : vector<256x128xf32>, vector<128x128xf32>, vector<256x128xf32> -> vector<256x128xf32>
      %c0_22 = arith.constant 0 : index
      %c0_23 = arith.constant 0 : index
      %24 = vector.load %arg10[%c0_22, %c0_23] : memref<1x128xf32, #tpu.memory_space<vmem>>, vector<1x128xf32>
      %25 = vector.broadcast %24 : vector<1x128xf32> to vector<256x128xf32>
      %26 = arith.addf %23, %25 : vector<256x128xf32>
      %c0_24 = arith.constant 0 : index
      %c0_25 = arith.constant 0 : index
      %27 = vector.load %arg11[%c0_24, %c0_25] : memref<256x128xf32, #tpu.memory_space<vmem>>, vector<256x128xf32>
      tpu.vector_store %arg11[%c0_24, %c0_25], %26 {strides = array<i32>} : memref<256x128xf32, #tpu.memory_space<vmem>>, vector<256x128xf32>,
    } else {
    }
    return
  }
  func.func @transform_0(%arg0: i32, %arg1: i32) -> (i32, i32) {
    %c0_i32 = arith.constant 0 : i32
    %c0_i32_0 = arith.constant 0 : i32
    return %arg0, %c0_i32 : i32, i32
  }
  func.func @transform_1(%arg0: i32, %arg1: i32) -> (i32, i32) {
    %c0_i32 = arith.constant 0 : i32
    %c0_i32_0 = arith.constant 0 : i32
    %c0_i32_1 = arith.constant 0 : i32
    return %c0_i32, %c0_i32_0 : i32, i32
  }
  func.func @transform_2(%arg0: i32, %arg1: i32) -> (i32, i32) {
    %c0_i32 = arith.constant 0 : i32
    %c0_i32_0 = arith.constant 0 : i32
    %c0_i32_1 = arith.constant 0 : i32
    return %c0_i32, %c0_i32_0 : i32, i32
  }
  func.func @transform_3(%arg0: i32, %arg1: i32) -> (i32, i32) {
    %c0_i32 = arith.constant 0 : i32
    return %arg0, %arg1 : i32, i32
  }
  func.func @transform_4(%arg0: i32, %arg1: i32) -> (i32, i32) {
    %c0_i32 = arith.constant 0 : i32
    %c0_i32_0 = arith.constant 0 : i32
    return %arg1, %c0_i32 : i32, i32
  }
  func.func @transform_5(%arg0: i32, %arg1: i32) -> (i32, i32) {
    %c0_i32 = arith.constant 0 : i32
    %c0_i32_0 = arith.constant 0 : i32
    %c0_i32_1 = arith.constant 0 : i32
    return %c0_i32, %c0_i32_0 : i32, i32
  }
  func.func @transform_6(%arg0: i32, %arg1: i32) -> (i32, i32) {
    %c0_i32 = arith.constant 0 : i32
    %c0_i32_0 = arith.constant 0 : i32
    %c0_i32_1 = arith.constant 0 : i32
    return %c0_i32, %c0_i32_0 : i32, i32
  }
  func.func @transform_7(%arg0: i32, %arg1: i32) -> (i32, i32) {
    %c0_i32 = arith.constant 0 : i32
    %c0_i32_0 = arith.constant 0 : i32
    %c0_i32_1 = arith.constant 0 : i32
    return %c0_i32, %c0_i32_0 : i32, i32
  }
  func.func @transform_8(%arg0: i32, %arg1: i32) -> (i32, i32) {
    %c0_i32 = arith.constant 0 : i32
    %c0_i32_0 = arith.constant 0 : i32
    %c0_i32_1 = arith.constant 0 : i32
    return %c0_i32, %c0_i32_0 : i32, i32
  }
  func.func @transform_9(%arg0: i32, %arg1: i32) -> (i32, i32) {
    %c0_i32 = arith.constant 0 : i32
    %c0_i32_0 = arith.constant 0 : i32
    return %arg0, %c0_i32 : i32, i32
  }
}

module attributes {stable_mosaic.version = 11 : i64} {
  func.func @power_kernel(%arg0: i32, %arg1: i32, %arg2: memref<256x512xbf16, #tpu.memory_space<vmem>>, %arg3: memref<512x128xf32, #tpu.memory_space<vmem>>, %arg4: memref<256x128xf32, #tpu.memory_space<vmem>>, %arg5: memref<256x128xf32, #tpu.memory_space<vmem>>, %arg6: memref<256x128xf32, #tpu.memory_space<vmem>>, %arg7: memref<256x128xf32, #tpu.memory_space<vmem>>) attributes {dimension_semantics = [#tpu.dimension_semantics<parallel>, #tpu.dimension_semantics<arbitrary>], iteration_bounds = array<i64: 2, 1>, scalar_prefetch = 0 : i64, scratch_operands = 1 : i64, tpu.core_type = #tpu.core_type<tc>, window_params = [{transform_indices = @transform_0, window_bounds = array<i64: 256, 512>}, {transform_indices = @transform_1, window_bounds = array<i64: 512, 128>}, {transform_indices = @transform_2, window_bounds = array<i64: 256, 128>}, {transform_indices = @transform_3, window_bounds = array<i64: 256, 128>}, {transform_indices = @transform_4, window_bounds = array<i64: 256, 128>}]} {
    %c0_i32 = arith.constant 0 : i32
    %0 = arith.cmpi eq, %arg1, %c0_i32 : i32
    %1 = arith.extui %0 : i1 to i32
    %c0_i32_0 = arith.constant 0 : i32
    %2 = arith.cmpi ne, %1, %c0_i32_0 : i32
    scf.if %2 {
      %cst_10 = arith.constant 0.000000e+00 : f32
      %13 = vector.broadcast %cst_10 : f32 to vector<256x128xf32>
      %c0_11 = arith.constant 0 : index
      %c0_12 = arith.constant 0 : index
      %14 = vector.load %arg7[%c0_11, %c0_12] : memref<256x128xf32, #tpu.memory_space<vmem>>, vector<256x128xf32>
      tpu.vector_store %arg7[%c0_11, %c0_12], %13 {strides = array<i32>} : memref<256x128xf32, #tpu.memory_space<vmem>>, vector<256x128xf32>,
    } else {
    }
    %c0 = arith.constant 0 : index
    %c0_1 = arith.constant 0 : index
    %3 = vector.load %arg7[%c0, %c0_1] : memref<256x128xf32, #tpu.memory_space<vmem>>, vector<256x128xf32>
    %c0_2 = arith.constant 0 : index
    %c0_3 = arith.constant 0 : index
    %4 = vector.load %arg2[%c0_2, %c0_3] : memref<256x512xbf16, #tpu.memory_space<vmem>>, vector<256x512xbf16>
    %c0_4 = arith.constant 0 : index
    %c0_5 = arith.constant 0 : index
    %5 = vector.load %arg3[%c0_4, %c0_5] : memref<512x128xf32, #tpu.memory_space<vmem>>, vector<512x128xf32>
    %6 = arith.truncf %5 : vector<512x128xf32> to vector<512x128xbf16>
    %cst = arith.constant dense<0.000000e+00> : vector<256x128xf32>
    %7 = tpu.matmul %4, %6, %cst {dimension_numbers = #tpu.dot_dimension_numbers<[1], [0], [0], [1], [0, 0, 1, 1], [], []>} : vector<256x512xbf16>, vector<512x128xbf16>, vector<256x128xf32> -> vector<256x128xf32>
    %8 = arith.addf %3, %7 : vector<256x128xf32>
    %c0_6 = arith.constant 0 : index
    %c0_7 = arith.constant 0 : index
    %9 = vector.load %arg7[%c0_6, %c0_7] : memref<256x128xf32, #tpu.memory_space<vmem>>, vector<256x128xf32>
    tpu.vector_store %arg7[%c0_6, %c0_7], %8 {strides = array<i32>} : memref<256x128xf32, #tpu.memory_space<vmem>>, vector<256x128xf32>,
    %c0_i32_8 = arith.constant 0 : i32
    %10 = arith.cmpi eq, %arg1, %c0_i32_8 : i32
    %11 = arith.extui %10 : i1 to i32
    %c0_i32_9 = arith.constant 0 : i32
    %12 = arith.cmpi ne, %11, %c0_i32_9 : i32
    scf.if %12 {
      %c0_10 = arith.constant 0 : index
      %c0_11 = arith.constant 0 : index
      %13 = vector.load %arg7[%c0_10, %c0_11] : memref<256x128xf32, #tpu.memory_space<vmem>>, vector<256x128xf32>
      %c0_12 = arith.constant 0 : index
      %c0_13 = arith.constant 0 : index
      %14 = vector.load %arg5[%c0_12, %c0_13] : memref<256x128xf32, #tpu.memory_space<vmem>>, vector<256x128xf32>
      tpu.vector_store %arg5[%c0_12, %c0_13], %13 {strides = array<i32>} : memref<256x128xf32, #tpu.memory_space<vmem>>, vector<256x128xf32>,
      %c0_14 = arith.constant 0 : index
      %c0_15 = arith.constant 0 : index
      %15 = vector.load %arg4[%c0_14, %c0_15] : memref<256x128xf32, #tpu.memory_space<vmem>>, vector<256x128xf32>
      %16 = arith.addf %15, %13 : vector<256x128xf32>
      %c0_16 = arith.constant 0 : index
      %c0_17 = arith.constant 0 : index
      %17 = vector.load %arg6[%c0_16, %c0_17] : memref<256x128xf32, #tpu.memory_space<vmem>>, vector<256x128xf32>
      tpu.vector_store %arg6[%c0_16, %c0_17], %16 {strides = array<i32>} : memref<256x128xf32, #tpu.memory_space<vmem>>, vector<256x128xf32>,
    } else {
    }
    return
  }
  func.func @transform_0(%arg0: i32, %arg1: i32) -> (i32, i32) {
    %c0_i32 = arith.constant 0 : i32
    return %arg0, %arg1 : i32, i32
  }
  func.func @transform_1(%arg0: i32, %arg1: i32) -> (i32, i32) {
    %c0_i32 = arith.constant 0 : i32
    %c0_i32_0 = arith.constant 0 : i32
    return %arg1, %c0_i32 : i32, i32
  }
  func.func @transform_2(%arg0: i32, %arg1: i32) -> (i32, i32) {
    %c0_i32 = arith.constant 0 : i32
    %c0_i32_0 = arith.constant 0 : i32
    return %arg0, %c0_i32 : i32, i32
  }
  func.func @transform_3(%arg0: i32, %arg1: i32) -> (i32, i32) {
    %c0_i32 = arith.constant 0 : i32
    %c0_i32_0 = arith.constant 0 : i32
    return %arg0, %c0_i32 : i32, i32
  }
  func.func @transform_4(%arg0: i32, %arg1: i32) -> (i32, i32) {
    %c0_i32 = arith.constant 0 : i32
    %c0_i32_0 = arith.constant 0 : i32
    return %arg0, %c0_i32 : i32, i32
  }
}

module attributes {stable_mosaic.version = 11 : i64} {
  func.func @power_last_kernel(%arg0: i32, %arg1: i32, %arg2: memref<256x512xbf16, #tpu.memory_space<vmem>>, %arg3: memref<512x128xf32, #tpu.memory_space<vmem>>, %arg4: memref<256x128xf32, #tpu.memory_space<vmem>>, %arg5: memref<256x128xf32, #tpu.memory_space<vmem>>, %arg6: memref<256x128xf32, #tpu.memory_space<vmem>>, %arg7: memref<128x128xf32, #tpu.memory_space<vmem>>, %arg8: memref<256x128xf32, #tpu.memory_space<vmem>>, %arg9: memref<256x128xf32, #tpu.memory_space<vmem>>) attributes {dimension_semantics = [#tpu.dimension_semantics<parallel>, #tpu.dimension_semantics<arbitrary>], iteration_bounds = array<i64: 2, 1>, scalar_prefetch = 0 : i64, scratch_operands = 1 : i64, tpu.core_type = #tpu.core_type<tc>, window_params = [{transform_indices = @transform_0, window_bounds = array<i64: 256, 512>}, {transform_indices = @transform_1, window_bounds = array<i64: 512, 128>}, {transform_indices = @transform_2, window_bounds = array<i64: 256, 128>}, {transform_indices = @transform_3, window_bounds = array<i64: 256, 128>}, {transform_indices = @transform_4, window_bounds = array<i64: 256, 128>}, {pipeline_mode = #tpu.pipeline_mode<synchronous>, transform_indices = @transform_5, window_bounds = array<i64: 128, 128>}, {transform_indices = @transform_6, window_bounds = array<i64: 256, 128>}]} {
    %c0_i32 = arith.constant 0 : i32
    %0 = arith.cmpi eq, %arg1, %c0_i32 : i32
    %1 = arith.extui %0 : i1 to i32
    %c0_i32_0 = arith.constant 0 : i32
    %2 = arith.cmpi ne, %1, %c0_i32_0 : i32
    scf.if %2 {
      %cst_10 = arith.constant 0.000000e+00 : f32
      %13 = vector.broadcast %cst_10 : f32 to vector<256x128xf32>
      %c0_11 = arith.constant 0 : index
      %c0_12 = arith.constant 0 : index
      %14 = vector.load %arg9[%c0_11, %c0_12] : memref<256x128xf32, #tpu.memory_space<vmem>>, vector<256x128xf32>
      tpu.vector_store %arg9[%c0_11, %c0_12], %13 {strides = array<i32>} : memref<256x128xf32, #tpu.memory_space<vmem>>, vector<256x128xf32>,
    } else {
    }
    %c0 = arith.constant 0 : index
    %c0_1 = arith.constant 0 : index
    %3 = vector.load %arg9[%c0, %c0_1] : memref<256x128xf32, #tpu.memory_space<vmem>>, vector<256x128xf32>
    %c0_2 = arith.constant 0 : index
    %c0_3 = arith.constant 0 : index
    %4 = vector.load %arg2[%c0_2, %c0_3] : memref<256x512xbf16, #tpu.memory_space<vmem>>, vector<256x512xbf16>
    %c0_4 = arith.constant 0 : index
    %c0_5 = arith.constant 0 : index
    %5 = vector.load %arg3[%c0_4, %c0_5] : memref<512x128xf32, #tpu.memory_space<vmem>>, vector<512x128xf32>
    %6 = arith.truncf %5 : vector<512x128xf32> to vector<512x128xbf16>
    %cst = arith.constant dense<0.000000e+00> : vector<256x128xf32>
    %7 = tpu.matmul %4, %6, %cst {dimension_numbers = #tpu.dot_dimension_numbers<[1], [0], [0], [1], [0, 0, 1, 1], [], []>} : vector<256x512xbf16>, vector<512x128xbf16>, vector<256x128xf32> -> vector<256x128xf32>
    %8 = arith.addf %3, %7 : vector<256x128xf32>
    %c0_6 = arith.constant 0 : index
    %c0_7 = arith.constant 0 : index
    %9 = vector.load %arg9[%c0_6, %c0_7] : memref<256x128xf32, #tpu.memory_space<vmem>>, vector<256x128xf32>
    tpu.vector_store %arg9[%c0_6, %c0_7], %8 {strides = array<i32>} : memref<256x128xf32, #tpu.memory_space<vmem>>, vector<256x128xf32>,
    %c0_i32_8 = arith.constant 0 : i32
    %10 = arith.cmpi eq, %arg1, %c0_i32_8 : i32
    %11 = arith.extui %10 : i1 to i32
    %c0_i32_9 = arith.constant 0 : i32
    %12 = arith.cmpi ne, %11, %c0_i32_9 : i32
    scf.if %12 {
      %c0_10 = arith.constant 0 : index
      %c0_11 = arith.constant 0 : index
      %13 = vector.load %arg4[%c0_10, %c0_11] : memref<256x128xf32, #tpu.memory_space<vmem>>, vector<256x128xf32>
      %c0_12 = arith.constant 0 : index
      %c0_13 = arith.constant 0 : index
      %14 = vector.load %arg9[%c0_12, %c0_13] : memref<256x128xf32, #tpu.memory_space<vmem>>, vector<256x128xf32>
      %15 = arith.addf %13, %14 : vector<256x128xf32>
      %c0_14 = arith.constant 0 : index
      %c0_15 = arith.constant 0 : index
      %16 = vector.load %arg5[%c0_14, %c0_15] : memref<256x128xf32, #tpu.memory_space<vmem>>, vector<256x128xf32>
      %cst_16 = arith.constant 4.000000e-01 : f32
      %17 = vector.broadcast %cst_16 : f32 to vector<256x128xf32>
      %18 = arith.mulf %17, %16 : vector<256x128xf32>
      %c0_17 = arith.constant 0 : index
      %c0_18 = arith.constant 0 : index
      %19 = vector.load %arg6[%c0_17, %c0_18] : memref<256x128xf32, #tpu.memory_space<vmem>>, vector<256x128xf32>
      %cst_19 = arith.constant 2.400000e-01 : f32
      %20 = vector.broadcast %cst_19 : f32 to vector<256x128xf32>
      %21 = arith.mulf %20, %19 : vector<256x128xf32>
      %22 = arith.subf %18, %21 : vector<256x128xf32>
      %c0_20 = arith.constant 0 : index
      %c0_21 = arith.constant 0 : index
      %23 = vector.load %arg7[%c0_20, %c0_21] : memref<128x128xf32, #tpu.memory_space<vmem>>, vector<128x128xf32>
      %cst_22 = arith.constant dense<0.000000e+00> : vector<256x128xf32>
      %24 = tpu.matmul %22, %23, %cst_22 {dimension_numbers = #tpu.dot_dimension_numbers<[1], [0], [0], [1], [0, 0, 1, 1], [], []>} : vector<256x128xf32>, vector<128x128xf32>, vector<256x128xf32> -> vector<256x128xf32>
      %cst_23 = arith.constant 5.000000e-01 : f32
      %25 = vector.broadcast %cst_23 : f32 to vector<256x128xf32>
      %26 = arith.mulf %25, %15 : vector<256x128xf32>
      %27 = arith.addf %24, %26 : vector<256x128xf32>
      %c0_24 = arith.constant 0 : index
      %c0_25 = arith.constant 0 : index
      %28 = vector.load %arg6[%c0_24, %c0_25] : memref<256x128xf32, #tpu.memory_space<vmem>>, vector<256x128xf32>
      %cst_26 = arith.constant 6.000000e-01 : f32
      %29 = vector.broadcast %cst_26 : f32 to vector<256x128xf32>
      %30 = arith.mulf %29, %28 : vector<256x128xf32>
      %31 = arith.addf %27, %30 : vector<256x128xf32>
      %c0_27 = arith.constant 0 : index
      %c0_28 = arith.constant 0 : index
      %32 = vector.load %arg8[%c0_27, %c0_28] : memref<256x128xf32, #tpu.memory_space<vmem>>, vector<256x128xf32>
      tpu.vector_store %arg8[%c0_27, %c0_28], %31 {strides = array<i32>} : memref<256x128xf32, #tpu.memory_space<vmem>>, vector<256x128xf32>,
    } else {
    }
    return
  }
  func.func @transform_0(%arg0: i32, %arg1: i32) -> (i32, i32) {
    %c0_i32 = arith.constant 0 : i32
    return %arg0, %arg1 : i32, i32
  }
  func.func @transform_1(%arg0: i32, %arg1: i32) -> (i32, i32) {
    %c0_i32 = arith.constant 0 : i32
    %c0_i32_0 = arith.constant 0 : i32
    return %arg1, %c0_i32 : i32, i32
  }
  func.func @transform_2(%arg0: i32, %arg1: i32) -> (i32, i32) {
    %c0_i32 = arith.constant 0 : i32
    %c0_i32_0 = arith.constant 0 : i32
    return %arg0, %c0_i32 : i32, i32
  }
  func.func @transform_3(%arg0: i32, %arg1: i32) -> (i32, i32) {
    %c0_i32 = arith.constant 0 : i32
    %c0_i32_0 = arith.constant 0 : i32
    return %arg0, %c0_i32 : i32, i32
  }
  func.func @transform_4(%arg0: i32, %arg1: i32) -> (i32, i32) {
    %c0_i32 = arith.constant 0 : i32
    %c0_i32_0 = arith.constant 0 : i32
    return %arg0, %c0_i32 : i32, i32
  }
  func.func @transform_5(%arg0: i32, %arg1: i32) -> (i32, i32) {
    %c0_i32 = arith.constant 0 : i32
    %c0_i32_0 = arith.constant 0 : i32
    %c0_i32_1 = arith.constant 0 : i32
    return %c0_i32, %c0_i32_0 : i32, i32
  }
  func.func @transform_6(%arg0: i32, %arg1: i32) -> (i32, i32) {
    %c0_i32 = arith.constant 0 : i32
    %c0_i32_0 = arith.constant 0 : i32
    return %arg0, %c0_i32 : i32, i32
  }
}

</mosaic_0001>

<bundles_post_ra>
// kernel: custom-call.14
= control target key start
LH: loop header
LB: loop body
LE: loop exit
PB: predicated region body
PF: predicated region fallthrough
CT: control target
= control target key end

     0   :  { %5 = vsyncpa [#allocation4], 0  ;;  %s682_s12 = smov [#allocation0]   ;;  %s783_s0 = inlined_call_operand.vmem [shape: f32[8,8], index: 0, kind: input, shape index: {}]   ;;  %s784_s1 = inlined_call_operand.vmem [shape: f32[8,8], index: 1, kind: output, shape index: {0}]   ;;  %s785_s2 = inlined_call_operand.hbm [shape: s32[8], index: 2, kind: output, shape index: {1}]   ;;  %s786_s3 = inlined_call_operand.vmem [shape: s32[8], index: 3, kind: output, shape index: {2}]  }
   0x1   :  { %s686_s15 = smov %s783_s0  }
   0x2 LB: > { %v53_v0 = vld [vmem:[%s688_s15] sm:$0xff]  ;;  %s55_s15 = scalar_lea.vmem %s688_s15, 8   ;;  %s688_s15 = sphi %s686_s15, %s55_s15   ;;  %s684_s12 = sphi %s682_s12, %s56_s12  }
   0x3   : > { %54 = vst [vmem:[%s684_s12] sm:$0xff] %v53_v0  ;;  %s56_s12 = scalar_lea.vmem %s684_s12, 8   ;;  %p50_p0 = scmp.gt.s32.totalorder %s55_s15, %s783_s0 }
   0x4   :  { %v71_v2 = vlaneseq (%p50_p0)  ;;  %v702_v3 = vmov (%p50_p0), 0   ;;  %s734_s18 = smov (%p50_p0), 0  }
   0x5   :  { %52 = sbr.rel (!%p50_p0) target bundleno = 2 (0x2), region = 152  ;;  %70 = vst [vmem:[#allocation2] sm:$0x1] (%p50_p0), %v702_v3 }
   0x6   :  { %v731_v4 = vshrl.u32 (%p50_p0), %v71_v2, 7 }
   0x8   :  { %75 = vst [vmem:[#allocation7] sm:$0xff] (%p50_p0), %v731_v4 }
   0xa   :  { %v68_v1 = vld [vmem:[#allocation0] sm:$0xff] (%p50_p0) }
   0xb   :  { %69 = vst [vmem:[#allocation1] sm:$0xff] (%p50_p0), %v68_v1 }
   0xc LB: > { %v740_v7 = vstv %s692_s18  ;;  %s132_s0 = ssub.s32 128, %s692_s18  ;;  %v138_v37 = vand.u32 127, %v71_v2  ;;  %v141_v39 = vld [vmem:[#allocation2] ss:$0 sm:$0xff]  ;;  %s144_s19 = scalar_lea.vmem [#allocation1], %s692_s18  ;;  %s692_s18 = sphi %s734_s18, %s81_s18  }
   0xd   : > { %vm90_vm0 = vcmp.ge.s32.totalorder %v731_v4, %v740_v7  ;;  %s150_s21 = scalar_lea.vmem [#allocation7], %s692_s18  ;;  %vm170_vm13 = vcmp.gt.s32.totalorder %v731_v4, %v740_v7  ;;  %s81_s18 = sadd.s32 1, %s692_s18  }
   0xe   : > { %vm162_vm10 = vcmp.gt.s32.totalorder %v138_v37, %v740_v7  ;;  %vm139_vm11 = vcmp.eq.s32.totalorder %v138_v37, %v740_v7  ;;  %p78_p1 = scmp.ge.s32.totalorder %s81_s18, 8  }
   0xf   : > { %v152_v41 = vld [vmem:[%s150_s21] ss:$0 sm:$0xff]  ;;  %vm174_vm15 = vmand %vm170_vm13, %vm139_vm11  ;;  %s694_s26 = smov (%p78_p1), %s784_s1   ;;  %s698_s27 = smov (%p78_p1), [#allocation1]  }
  0x12   : > { %v86_v5 = vld [vmem:[#allocation1] sm:$0xff]  ;;  %v146_v40 = vld [vmem:[%s144_s19] ss:$0 sm:$0xff] }
  0x13   : > { %v87_v6 = vand.u32 2147483647, %v86_v5 }
  0x15   : > { %vm463_vm1 = vcmp.gt.f32.partialorder %v87_v6, -inf }
  0x16   : > { %vm94_vm2 = vmand %vm90_vm0, %vm463_vm1 }
  0x17   : > { %v95_v8 = vsel %vm94_vm2, %v731_v4, %v740_v7  ;;  %v96_v9 = vsel %vm94_vm2, %v87_v6, -inf }
  0x18   : > { %v97_v10 = vrot.slane %v96_v9, 1  ;;  %v98_v11 = vrot.slane %v95_v8, 1 }
  0x1a   : > { %vm99_vm3 = vcmp.ge.f32.partialorder %v97_v10, %v96_v9  ;;  %v102_v12 = vrot.slane %v97_v10, 1  ;;  %v103_v13 = vrot.slane %v98_v11, 1 }
  0x1b   : > { %v100_v14 = vsel %vm99_vm3, %v97_v10, %v96_v9  ;;  %v101_v15 = vsel %vm99_vm3, %v98_v11, %v95_v8 }
  0x1c   : > { %vm104_vm4 = vcmp.ge.f32.partialorder %v102_v12, %v100_v14  ;;  %v107_v16 = vrot.slane %v102_v12, 1  ;;  %v108_v17 = vrot.slane %v103_v13, 1 }
  0x1d   : > { %v105_v18 = vsel %vm104_vm4, %v102_v12, %v100_v14  ;;  %v106_v19 = vsel %vm104_vm4, %v103_v13, %v101_v15 }
  0x1e   : > { %vm109_vm5 = vcmp.ge.f32.partialorder %v107_v16, %v105_v18  ;;  %v112_v20 = vrot.slane %v107_v16, 1  ;;  %v113_v21 = vrot.slane %v108_v17, 1 }
  0x1f   : > { %v110_v22 = vsel %vm109_vm5, %v107_v16, %v105_v18  ;;  %v111_v23 = vsel %vm109_vm5, %v108_v17, %v106_v19 }
  0x20   : > { %vm114_vm6 = vcmp.ge.f32.partialorder %v112_v20, %v110_v22  ;;  %v117_v24 = vrot.slane %v112_v20, 1  ;;  %v118_v25 = vrot.slane %v113_v21, 1 }
  0x21   : > { %v115_v26 = vsel %vm114_vm6, %v112_v20, %v110_v22  ;;  %v116_v27 = vsel %vm114_vm6, %v113_v21, %v111_v23 }
  0x22   : > { %vm119_vm7 = vcmp.ge.f32.partialorder %v117_v24, %v115_v26  ;;  %v122_v28 = vrot.slane %v117_v24, 1  ;;  %v123_v29 = vrot.slane %v118_v25, 1 }
  0x23   : > { %v120_v30 = vsel %vm119_vm7, %v117_v24, %v115_v26  ;;  %v121_v31 = vsel %vm119_vm7, %v118_v25, %v116_v27 }
  0x24   : > { %vm124_vm8 = vcmp.ge.f32.partialorder %v122_v28, %v120_v30  ;;  %v127_v32 = vrot.slane %v122_v28, 1  ;;  %v128_v33 = vrot.slane %v123_v29, 1 }
  0x25   : > { %v125_v34 = vsel %vm124_vm8, %v122_v28, %v120_v30  ;;  %v126_v35 = vsel %vm124_vm8, %v123_v29, %v121_v31 }
  0x26   : > { %vm129_vm9 = vcmp.ge.f32.partialorder %v127_v32, %v125_v34 }
  0x27   : > { %v131_v36 = vsel %vm129_vm9, %v128_v33, %v126_v35 }
  0x28   : > { %133 = vrot.lane.b32.xlu0 %v131_v36, %s132_s0 }
  0x9a   : > { %v134_v38 = vpop.permute.xlu0 %133 }
  0x9b   : > { %471 = vpush %v134_v38 }
  0xcc   : > { %s472_s20 = spop %471 }
  0xcd   : > { %v140_v42 = vstv %s472_s20  ;;  %s145_s22 = scalar_lea.vmem [#allocation1], %s472_s20  ;;  %s151_s23 = scalar_lea.vmem [#allocation7], %s472_s20 }
  0xce   : > { %v147_v43 = vld [vmem:[%s145_s22] ss:$0 sm:$0xff]  ;;  %v142_v45 = vsel %vm139_vm11, %v140_v42, %v141_v39 }
  0xcf   : > { %v153_v44 = vld [vmem:[%s151_s23] ss:$0 sm:$0xff]  ;;  %148 = vst [vmem:[%s145_s22] sm:$0x1] %v146_v40  ;;  %vm156_vm12 = vcmp.ne.f32.partialorder %v147_v43, 0.0  ;;  %143 = vst [vmem:[#allocation2] sm:$0x1] %v142_v45 }
  0xd0   : > { %154 = vst [vmem:[%s151_s23] sm:$0x1] %v152_v41  ;;  %149 = vst [vmem:[%s144_s19] sm:$0x1] %v147_v43  ;;  %v163_v52 = vsel %vm162_vm10, %v147_v43, 0.0 }
  0xd1   : > { %155 = vst [vmem:[%s150_s21] sm:$0x1] %v153_v44  ;;  %vm157_vm14 = vmand %vm139_vm11, %vm156_vm12 }
  0xd2   : > { %v158_v46 = vsel %vm157_vm14, %v147_v43, 1.0 }
  0xd3   : > { %v171_v47 = vsel %vm170_vm13, %v158_v46, 1.0 }
  0xd4   : > { %596 = vrcp.f32 %v171_v47 }
  0xd6   :  { %v233_v57 = vld [vmem:[#allocation2] sm:$0x1] (%p78_p1) }
  0xd7   : > { %v167_v49 = vld [vmem:[#allocation1] sm:$0xff]  ;;  %235 = vst [vmem:[#allocation3] sm:$0x1] (%p78_p1), %v233_v57 }
  0xd8   :  { %v181_v56 = vld [vmem:[#allocation7] sm:$0xff] (%p78_p1) }
  0xde   : > { %v597_v48 = vpop.eup %596 }
  0xdf   : > { %v173_v50 = vmul.f32 %v597_v48, %v167_v49 }
  0xe1   : > { %v175_v51 = vsel %vm174_vm15, %v173_v50, 0.0 }
  0xe2   : > { %176 = vadd.xlane.f32.xlu0 %v175_v51 }
 0x10f   :  { %197 = vxpose.xlu0.b32.start.end [1/1] (short) (narrow) (%p78_p1), %v181_v56, 8 }
 0x16e   :  { %80 = sbr.rel (!%p78_p1) target bundleno = 12 (0xc), region = 163 }
 0x16f   : > { %v177_v53 = vpop.xlane.xlu0 %176 }
 0x170   : > { %v178_v54 = vmul.f32 %v177_v53, %v163_v52 }
 0x172   : > { %v179_v55 = vsub.f32 %v173_v50, %v178_v54 }
 0x174   : > { %180 = vst [vmem:[#allocation1] sm:$0xff] %v179_v55 }
 0x18f   :  { %v213_v58 = vpop.trf.xlu0 }
 0x190   :  { %229 = vst [vmem:[#allocation5] sm:$0x1] %v213_v58 }
 0x197   :  { %v239_v59 = vld [vmem:[#allocation5] sm:$0x1] }
 0x198   :  { %241 = vst [vmem:[#allocation6] sm:$0x1] %v239_v59 }
 0x199 LB: > { %v289_v60 = vld [vmem:[%s700_s27] sm:$0xff]  ;;  %s291_s27 = scalar_lea.vmem %s700_s27, 8   ;;  %s700_s27 = sphi %s698_s27, %s291_s27   ;;  %s696_s26 = sphi %s694_s26, %s292_s26  }
 0x19a   : > { %290 = vst [vmem:[%s696_s26] sm:$0xff] %v289_v60  ;;  %s292_s26 = scalar_lea.vmem %s696_s26, 8   ;;  %p286_p2 = scmp.gt.s32.totalorder %s291_s27, [#allocation1] }
 0x19b   :  { %s703_s28 = smov (%p286_p2), [#allocation3]  }
 0x19c   :  { %288 = sbr.rel (!%p286_p2) target bundleno = 409 (0x199), region = 185  ;;  %s309_s29 = sshll.u32 (%p286_p2), %s703_s28, 4  ;;  %s310_s29 = int_to_ptr.vmem [resolvable:$true] %s309_s29 }
 0x19d   :  { %s598_s1 = scalar_lea.vmem (%p286_p2), %s310_s29, 16  ;;  %s602_s5 = scalar_lea.vmem (%p286_p2), %s310_s29, 32 }
 0x19e   :  { %p599_p3 = scmp.ne.s32.totalorder (%p286_p2), %s310_s29, %s598_s1  ;;  %p603_p4 = scmp.lt.s32.totalorder (%p286_p2), %s310_s29, %s310_s29 }
 0x19f   :  { %v375_v61 = vld [vmem:[#allocation6] sm:$0x1] (%p286_p2)  ;;  %p604_p5 = scmp.lt.s32.totalorder (%p286_p2), %s602_s5, %s598_s1 }
 0x1a0   :  { %376 = vst [vmem:[%s786_s3] sm:$0x1] (%p286_p2), %v375_v61 }
 0x1a1   :  { %p605_p6 = por (%p286_p2), %p604_p5, %p603_p4 }
 0x1a3   :  { %p606_p7 = pnand %p605_p6, %p599_p3 }
 0x1a5   :  { %609 = shalt.err (!%p606_p7)
}
 0x1a6   :  { %s610_s8 = scalar_lea.hbm %s785_s2, 16 }
 0x1a7   :  { %p611_p8 = scmp.ne.s32.totalorder %s785_s2, %s610_s8  ;;  %p614_p9 = scmp.lt.u32.totalorder %s610_s8, %s785_s2 }
 0x1a9   :  { %p616_p10 = pnand %p614_p9, %p611_p8 }
 0x1ab   :  { %619 = shalt.err (!%p616_p10)
}
 0x1ac   :  { %312 = dma.vmem_to_hbm [thread:$0]  %s310_s29, 16, %s785_s2, [#allocation4]  }
 0x1ad   :  { %680 = dma.done.wait [#allocation4], 16  }
 0x1ae   :  { %681 = vsyncadd [#allocation4], 4294967280 }
 0x1af   :  { %382 = vsyncpa [#allocation4], 1 }

// kernel: custom-call.16
= control target key start
LH: loop header
LB: loop body
LE: loop exit
PB: predicated region body
PF: predicated region fallthrough
CT: control target
= control target key end

     0   :  { %v34_v0 = vlaneseq  ;;  %v180_v9 = vmov -1.0   ;;  %s215_s0 = inlined_call_operand.vmem [shape: f32[1,8,8], index: 0, kind: input, shape index: {}]   ;;  %s216_s1 = inlined_call_operand.vmem [shape: f32[1,8,8], index: 1, kind: output, shape index: {}]  }
   0x1   :  { %v29_v1 = vld [vmem:[%s215_s0] sm:$0xff] }
   0x2   :  { %v194_v2 = vand.u32 127, %v34_v0  ;;  %v38_v3 = vshrl.u32 %v34_v0, 7 }
   0x4   :  { %vm36_vm0 = vcmp.lt.s32.totalorder %v194_v2, 8  ;;  %vm40_vm1 = vcmp.eq.s32.totalorder %v38_v3, %v194_v2  ;;  %vm45_vm2 = vcmp.ge.s32.totalorder %v38_v3, %v194_v2  ;;  %vm59_vm4 = vcmp.eq.s32.totalorder %v194_v2, 0 }
   0x5   :  { %v42_v4 = vsel %vm40_vm1, %v29_v1, 0.0  ;;  %vm46_vm3 = vmand %vm45_vm2, %vm36_vm0  ;;  %vm56_vm5 = vcmp.eq.s32.totalorder %v194_v2, %v38_v3  ;;  %v60_v10 = vsel %vm59_vm4, 1.0, %v180_v9  ;;  %vm67_vm6 = vcmp.eq.s32.totalorder %v194_v2, 1 }
   0x6   :  { %v47_v5 = vsel %vm46_vm3, %v29_v1, 0.0  ;;  %43 = vadd.xlane.f32.xlu0 %v42_v4  ;;  %v61_v11 = vsel %vm56_vm5, %v60_v10, 0.0  ;;  %vm77_vm7 = vcmp.eq.s32.totalorder %v194_v2, 2  ;;  %vm87_vm8 = vcmp.eq.s32.totalorder %v194_v2, 3 }
   0x7   :  { %vm97_vm9 = vcmp.eq.s32.totalorder %v194_v2, 4  ;;  %vm107_vm10 = vcmp.eq.s32.totalorder %v194_v2, 5  ;;  %vm117_vm11 = vcmp.eq.s32.totalorder %v194_v2, 6  ;;  %vm127_vm12 = vcmp.eq.s32.totalorder %v194_v2, 7 }
  0x93   :  { %v199_v6 = vpop.xlane.xlu0 %43 }
  0x94   :  { %178 = vrcp.f32 %v199_v6  ;;  %vm134_vm13 = vweird.f32 %v199_v6 }
  0x9e   :  { %v179_v7 = vpop.eup %178 }
  0x9f   :  { %v49_v8 = vmul.f32 %v179_v7, %v47_v5 }
  0xa1   :  { %50 = vst [vmem:[#allocation2] sm:$0xff] %v49_v8 }
  0xa8   :  { %v63_v12 = vld [vmem:[#allocation2 + $0x1] ss:$0 sm:$0xff]  ;;  %v73_v15 = vld [vmem:[#allocation2 + $0x2] ss:$0 sm:$0xff]  ;;  %v83_v20 = vld [vmem:[#allocation2 + $0x3] ss:$0 sm:$0xff] }
  0xa9   :  { %v64_v13 = vxor.u32 2147483648, %v63_v12  ;;  %v74_v17 = vxor.u32 2147483648, %v73_v15  ;;  %v84_v22 = vxor.u32 2147483648, %v83_v20  ;;  %v93_v25 = vld [vmem:[#allocation2 + $0x4] ss:$0 sm:$0xff] }
  0xaa   :  { %v94_v27 = vxor.u32 2147483648, %v93_v25  ;;  %v103_v30 = vld [vmem:[#allocation2 + $0x5] ss:$0 sm:$0xff]  ;;  %v113_v35 = vld [vmem:[#allocation2 + $0x6] ss:$0 sm:$0xff] }
  0xab   :  { %v68_v14 = vmul.f32 %v64_v13, %v61_v11  ;;  %v104_v32 = vxor.u32 2147483648, %v103_v30  ;;  %v114_v37 = vxor.u32 2147483648, %v113_v35  ;;  %v123_v40 = vld [vmem:[#allocation2 + $0x7] ss:$0 sm:$0xff] }
  0xac   :  { %v124_v42 = vxor.u32 2147483648, %v123_v40 }
  0xad   :  { %69 = vadd.xlane.f32.xlu0 %v68_v14 }
 0x13a   :  { %v70_v16 = vpop.xlane.xlu0 %69 }
 0x13b   :  { %v71_v18 = vsel %vm67_vm6, %v70_v16, %v61_v11 }
 0x13c   :  { %v78_v19 = vmul.f32 %v74_v17, %v71_v18 }
 0x13e   :  { %79 = vadd.xlane.f32.xlu1 %v78_v19 }
 0x1cb   :  { %v80_v21 = vpop.xlane.xlu1 %79 }
 0x1cc   :  { %v81_v23 = vsel %vm77_vm7, %v80_v21, %v71_v18 }
 0x1cd   :  { %v88_v24 = vmul.f32 %v84_v22, %v81_v23 }
 0x1cf   :  { %89 = vadd.xlane.f32.xlu1 %v88_v24 }
 0x25c   :  { %v90_v26 = vpop.xlane.xlu1 %89 }
 0x25d   :  { %v91_v28 = vsel %vm87_vm8, %v90_v26, %v81_v23 }
 0x25e   :  { %v98_v29 = vmul.f32 %v94_v27, %v91_v28 }
 0x260   :  { %99 = vadd.xlane.f32.xlu0 %v98_v29 }
 0x2ed   :  { %v100_v31 = vpop.xlane.xlu0 %99 }
 0x2ee   :  { %v101_v33 = vsel %vm97_vm9, %v100_v31, %v91_v28 }
 0x2ef   :  { %v108_v34 = vmul.f32 %v104_v32, %v101_v33 }
 0x2f1   :  { %109 = vadd.xlane.f32.xlu1 %v108_v34 }
 0x37e   :  { %v110_v36 = vpop.xlane.xlu1 %109 }
 0x37f   :  { %v111_v38 = vsel %vm107_vm10, %v110_v36, %v101_v33 }
 0x380   :  { %v118_v39 = vmul.f32 %v114_v37, %v111_v38 }
 0x382   :  { %119 = vadd.xlane.f32.xlu0 %v118_v39 }
 0x40f   :  { %v120_v41 = vpop.xlane.xlu0 %119 }
 0x410   :  { %v121_v43 = vsel %vm117_vm11, %v120_v41, %v111_v38 }
 0x411   :  { %v128_v44 = vmul.f32 %v124_v42, %v121_v43 }
 0x413   :  { %129 = vadd.xlane.f32.xlu1 %v128_v44 }
 0x4a0   :  { %v130_v45 = vpop.xlane.xlu1 %129 }
 0x4a1   :  { %v131_v46 = vsel %vm127_vm12, %v130_v45, %v121_v43 }
 0x4a2   :  { %v133_v47 = vmul.f32 %v179_v7, %v131_v46 }
 0x4a4   :  { %v135_v48 = vsel %vm134_vm13, %v131_v46, %v133_v47 }
 0x4a5   :  { %165 = vst [vmem:[%s216_s1] sm:$0xff] %v135_v48 }

// kernel: custom-call.15
= control target key start
LH: loop header
LB: loop body
LE: loop exit
PB: predicated region body
PF: predicated region fallthrough
CT: control target
= control target key end

     0   :  { %v34_v0 = vlaneseq  ;;  %v179_v9 = vmov -1.0   ;;  %s214_s0 = inlined_call_operand.vmem [shape: f32[1,8,8], index: 0, kind: input, shape index: {}]   ;;  %s215_s1 = inlined_call_operand.vmem [shape: f32[1,8,8], index: 1, kind: output, shape index: {}]  }
   0x1   :  { %v29_v1 = vld [vmem:[%s214_s0] sm:$0xff] }
   0x2   :  { %v193_v2 = vand.u32 127, %v34_v0  ;;  %v38_v3 = vshrl.u32 %v34_v0, 7 }
   0x4   :  { %vm36_vm0 = vcmp.lt.s32.totalorder %v193_v2, 8  ;;  %vm40_vm1 = vcmp.eq.s32.totalorder %v38_v3, %v193_v2  ;;  %vm45_vm2 = vcmp.le.s32.totalorder %v38_v3, %v193_v2  ;;  %vm59_vm4 = vcmp.eq.s32.totalorder %v193_v2, 7 }
   0x5   :  { %v42_v4 = vsel %vm40_vm1, %v29_v1, 0.0  ;;  %vm46_vm3 = vmand %vm45_vm2, %vm36_vm0  ;;  %vm56_vm5 = vcmp.eq.s32.totalorder %v193_v2, %v38_v3  ;;  %v60_v10 = vsel %vm59_vm4, 1.0, %v179_v9  ;;  %vm67_vm6 = vcmp.eq.s32.totalorder %v193_v2, 6 }
   0x6   :  { %v47_v5 = vsel %vm46_vm3, %v29_v1, 0.0  ;;  %43 = vadd.xlane.f32.xlu0 %v42_v4  ;;  %v61_v11 = vsel %vm56_vm5, %v60_v10, 0.0  ;;  %vm77_vm7 = vcmp.eq.s32.totalorder %v193_v2, 5  ;;  %vm87_vm8 = vcmp.eq.s32.totalorder %v193_v2, 4 }
   0x7   :  { %vm97_vm9 = vcmp.eq.s32.totalorder %v193_v2, 3  ;;  %vm107_vm10 = vcmp.eq.s32.totalorder %v193_v2, 2  ;;  %vm117_vm11 = vcmp.eq.s32.totalorder %v193_v2, 1  ;;  %vm126_vm12 = vcmp.eq.s32.totalorder %v193_v2, 0 }
  0x93   :  { %v198_v6 = vpop.xlane.xlu0 %43 }
  0x94   :  { %177 = vrcp.f32 %v198_v6  ;;  %vm133_vm13 = vweird.f32 %v198_v6 }
  0x9e   :  { %v178_v7 = vpop.eup %177 }
  0x9f   :  { %v49_v8 = vmul.f32 %v178_v7, %v47_v5 }
  0xa1   :  { %50 = vst [vmem:[#allocation2] sm:$0xff] %v49_v8 }
  0xa8   :  { %v63_v12 = vld [vmem:[#allocation2 + $0x6] ss:$0 sm:$0xff]  ;;  %v73_v15 = vld [vmem:[#allocation2 + $0x5] ss:$0 sm:$0xff]  ;;  %v83_v20 = vld [vmem:[#allocation2 + $0x4] ss:$0 sm:$0xff] }
  0xa9   :  { %v64_v13 = vxor.u32 2147483648, %v63_v12  ;;  %v74_v17 = vxor.u32 2147483648, %v73_v15  ;;  %v84_v22 = vxor.u32 2147483648, %v83_v20  ;;  %v93_v25 = vld [vmem:[#allocation2 + $0x3] ss:$0 sm:$0xff] }
  0xaa   :  { %v94_v27 = vxor.u32 2147483648, %v93_v25  ;;  %v103_v30 = vld [vmem:[#allocation2 + $0x2] ss:$0 sm:$0xff]  ;;  %v113_v35 = vld [vmem:[#allocation2 + $0x1] ss:$0 sm:$0xff] }
  0xab   :  { %v68_v14 = vmul.f32 %v64_v13, %v61_v11  ;;  %v104_v32 = vxor.u32 2147483648, %v103_v30  ;;  %v114_v37 = vxor.u32 2147483648, %v113_v35  ;;  %v122_v40 = vld [vmem:[#allocation2] ss:$0 sm:$0xff] }
  0xac   :  { %v123_v42 = vxor.u32 2147483648, %v122_v40 }
  0xad   :  { %69 = vadd.xlane.f32.xlu0 %v68_v14 }
 0x13a   :  { %v70_v16 = vpop.xlane.xlu0 %69 }
 0x13b   :  { %v71_v18 = vsel %vm67_vm6, %v70_v16, %v61_v11 }
 0x13c   :  { %v78_v19 = vmul.f32 %v74_v17, %v71_v18 }
 0x13e   :  { %79 = vadd.xlane.f32.xlu1 %v78_v19 }
 0x1cb   :  { %v80_v21 = vpop.xlane.xlu1 %79 }
 0x1cc   :  { %v81_v23 = vsel %vm77_vm7, %v80_v21, %v71_v18 }
 0x1cd   :  { %v88_v24 = vmul.f32 %v84_v22, %v81_v23 }
 0x1cf   :  { %89 = vadd.xlane.f32.xlu1 %v88_v24 }
 0x25c   :  { %v90_v26 = vpop.xlane.xlu1 %89 }
 0x25d   :  { %v91_v28 = vsel %vm87_vm8, %v90_v26, %v81_v23 }
 0x25e   :  { %v98_v29 = vmul.f32 %v94_v27, %v91_v28 }
 0x260   :  { %99 = vadd.xlane.f32.xlu0 %v98_v29 }
 0x2ed   :  { %v100_v31 = vpop.xlane.xlu0 %99 }
 0x2ee   :  { %v101_v33 = vsel %vm97_vm9, %v100_v31, %v91_v28 }
 0x2ef   :  { %v108_v34 = vmul.f32 %v104_v32, %v101_v33 }
 0x2f1   :  { %109 = vadd.xlane.f32.xlu1 %v108_v34 }
 0x37e   :  { %v110_v36 = vpop.xlane.xlu1 %109 }
 0x37f   :  { %v111_v38 = vsel %vm107_vm10, %v110_v36, %v101_v33 }
 0x380   :  { %v118_v39 = vmul.f32 %v114_v37, %v111_v38 }
 0x382   :  { %119 = vadd.xlane.f32.xlu0 %v118_v39 }
 0x40f   :  { %v120_v41 = vpop.xlane.xlu0 %119 }
 0x410   :  { %v121_v43 = vsel %vm117_vm11, %v120_v41, %v111_v38 }
 0x411   :  { %v127_v44 = vmul.f32 %v123_v42, %v121_v43 }
 0x413   :  { %128 = vadd.xlane.f32.xlu1 %v127_v44 }
 0x4a0   :  { %v129_v45 = vpop.xlane.xlu1 %128 }
 0x4a1   :  { %v130_v46 = vsel %vm126_vm12, %v129_v45, %v121_v43 }
 0x4a2   :  { %v132_v47 = vmul.f32 %v178_v7, %v130_v46 }
 0x4a4   :  { %v134_v48 = vsel %vm133_vm13, %v130_v46, %v132_v47 }
 0x4a5   :  { %164 = vst [vmem:[%s215_s1] sm:$0xff] %v134_v48 }

// kernel: mlpnorm_forward.7
= control target key start
LH: loop header
LB: loop body
LE: loop exit
PB: predicated region body
PF: predicated region fallthrough
CT: control target
= control target key end

     0   :  { %s3645_s30 = smov 0   ;;  %s3647_s10 = smov 0   ;;  %s4275_s0 = inlined_call_operand.vmem [shape: f32[512,64], index: 0, kind: input, shape index: {}]   ;;  %s4276_s1 = inlined_call_operand.vmem [shape: f32[64,128], index: 1, kind: input, shape index: {}]   ;;  %s4277_s2 = inlined_call_operand.vmem [shape: f32[1,128], index: 2, kind: input, shape index: {}]   ;;  %s4278_s3 = inlined_call_operand.vmem [shape: bf16[512,512], index: 3, kind: input, shape index: {}]   ;;  %s4279_s4 = inlined_call_operand.vmem [shape: bf16[512,128], index: 4, kind: input, shape index: {}]   ;;  %s4280_s5 = inlined_call_operand.vmem [shape: f32[128,128], index: 5, kind: input, shape index: {}]   ;;  %s4281_s6 = inlined_call_operand.vmem [shape: f32[1,128], index: 6, kind: input, shape index: {}]   ;;  %s4282_s7 = inlined_call_operand.vmem [shape: f32[128,128], index: 7, kind: input, shape index: {}]   ;;  %s4283_s8 = inlined_call_operand.vmem [shape: f32[1,128], index: 8, kind: input, shape index: {}]   ;;  %s4284_s9 = inlined_call_operand.vmem [shape: f32[512,128], index: 9, kind: output, shape index: {}]  }
   0x1   :  { %s3649_s11 = smov 0  }
   0x2 LB: > { %s31_s12 = sadd.s32 1, %s3589_s10  ;;  %p2605_p0 = scmp.ge.s32.totalorder %s3593_s11, 1  ;;  %s3593_s11 = sphi %s3649_s11, %s19_s11   ;;  %s3589_s10 = sphi %s3647_s10, %s4286_s10   ;;  %s3585_s30 = sphi %s3645_s30, %s4285_s30  }
   0x3   : > { %p33_p1 = scmp.ge.s32.totalorder %s31_s12, 2  ;;  %p330_p2 = scmp.lt.s32.totalorder %s3593_s11, 3 }
   0x5   : > { %s4288_s12 = smov (%p33_p1, %s31_s12), 0  ;;  %p331_p3 = pnand %p2605_p0, %p330_p2 }
   0x6   : > { %v448_v0 = vld [vmem:[%s4276_s1] sm:$0xff] (!%p331_p3)  ;;  %v449_v1 = vld [vmem:[%s4276_s1 + $0x8] sm:$0xff] (!%p331_p3)  ;;  %v450_v2 = vld [vmem:[%s4276_s1 + $0x10] sm:$0xff] (!%p331_p3)  ;;  %s2606_s19 = sshll.u32 (!%p331_p3), %s3585_s30, 5  ;;  %vm463_vm0 = vcmask (!%p331_p3), 523264  }
   0x7   : > { %334 = sbr.rel (%p331_p3) target bundleno = 835 (0x343), region = 56  ;;  %v3331_v3 = vpack.c.bf16 (!%p331_p3), %v449_v1, %v448_v0  ;;  %v451_v4 = vld [vmem:[%s4276_s1 + $0x18] sm:$0xff] (!%p331_p3)  ;;  %p382_p4 = scmp.lt.s32.totalorder (!%p331_p3), %s2606_s19, 63  ;;  %v452_v6 = vld [vmem:[%s4276_s1 + $0x20] sm:$0xff] (!%p331_p3)  ;;  %v453_v7 = vld [vmem:[%s4276_s1 + $0x28] sm:$0xff] (!%p331_p3) }
   0x8   : > { %v3335_v5 = vpack.c.bf16 (!%p331_p3), %v451_v4, %v450_v2  ;;  %v3339_v8 = vpack.c.bf16 (!%p331_p3), %v453_v7, %v452_v6  ;;  %v454_v9 = vld [vmem:[%s4276_s1 + $0x30] sm:$0xff] (!%p331_p3)  ;;  %v455_v10 = vld [vmem:[%s4276_s1 + $0x38] sm:$0xff] (!%p331_p3)  ;;  %v3443_v14 = vld [vmem:[%s4279_s4 + $0x40] sm:$0xff] (!%p331_p3)  }
   0x9   : > { %3332 = vmatprep.subr.bf16.mxu0 (!%p331_p3), %v3331_v3  ;;  %3411 = vmatprep.subr.bf16.mxu1 (!%p331_p3), %v3331_v3  ;;  %v3343_v13 = vpack.c.bf16 (!%p331_p3), %v455_v10, %v454_v9  ;;  %v3444_v15 = vld [vmem:[%s4279_s4 + $0xc0] sm:$0xff] (!%p331_p3)   ;;  %v3447_v23 = vld [vmem:[%s4279_s4 + $0x48] sm:$0xff] (!%p331_p3)   ;;  %v3451_v30 = vld [vmem:[%s4279_s4 + $0x50] sm:$0xff] (!%p331_p3)  }
   0xa   : > { %3334 = vmatpush3.bf16.msra.mxu0 (!%p331_p3), %v3331_v3  ;;  %3415 = vmatpush3.bf16.msra.mxu1 (!%p331_p3), %v3331_v3  ;;  %v3445_v17 = vld [vmem:[%s4279_s4] sm:$0xff] (!%p331_p3)   ;;  %v3448_v24 = vld [vmem:[%s4279_s4 + $0xc8] sm:$0xff] (!%p331_p3)   ;;  %v3452_v33 = vld [vmem:[%s4279_s4 + $0xd0] sm:$0xff] (!%p331_p3)  }
   0xb   : > { %3336 = vmatprep.subr.bf16.mxu0 (!%p331_p3), %v3335_v5  ;;  %3412 = vmatprep.subr.bf16.mxu1 (!%p331_p3), %v3335_v5  ;;  %v3446_v18 = vld [vmem:[%s4279_s4 + $0x80] sm:$0xff] (!%p331_p3)   ;;  %v3449_v26 = vld [vmem:[%s4279_s4 + $0x8] sm:$0xff] (!%p331_p3)   ;;  %v3453_v34 = vld [vmem:[%s4279_s4 + $0x10] sm:$0xff] (!%p331_p3)  }
   0xc   : > { %v3450_v27 = vld [vmem:[%s4279_s4 + $0x88] sm:$0xff] (!%p331_p3)   ;;  %v3454_v35 = vld [vmem:[%s4279_s4 + $0x90] sm:$0xff] (!%p331_p3)   ;;  %v3455_v38 = vld [vmem:[%s4279_s4 + $0x58] sm:$0xff] (!%p331_p3)  }
   0xd   : > { %v3456_v41 = vld [vmem:[%s4279_s4 + $0xd8] sm:$0xff] (!%p331_p3)   ;;  %v3459_v46 = vld [vmem:[%s4279_s4 + $0x60] sm:$0xff] (!%p331_p3)   ;;  %v3463_v55 = vld [vmem:[%s4279_s4 + $0x68] sm:$0xff] (!%p331_p3)  }
   0xe   : > { %s4290_s19 = smov (!%p382_p4, %s2606_s19), 63  ;;  %3338 = vmatpush3.bf16.msra.mxu0 %v3335_v5  ;;  %3416 = vmatpush3.bf16.msra.mxu1 %v3335_v5  ;;  %v3457_v42 = vld [vmem:[%s4279_s4 + $0x18] sm:$0xff]   ;;  %v3460_v49 = vld [vmem:[%s4279_s4 + $0xe0] sm:$0xff]   ;;  %v3464_v56 = vld [vmem:[%s4279_s4 + $0xe8] sm:$0xff]  }
   0xf   : > { %s2607_s30 = sshll.u32 %s4290_s19, 3  ;;  %3340 = vmatprep.subr.bf16.mxu0 %v3339_v8  ;;  %3413 = vmatprep.subr.bf16.mxu1 %v3339_v8  ;;  %v3458_v43 = vld [vmem:[%s4279_s4 + $0x98] sm:$0xff]   ;;  %v3461_v50 = vld [vmem:[%s4279_s4 + $0x20] sm:$0xff]   ;;  %v3465_v58 = vld [vmem:[%s4279_s4 + $0x28] sm:$0xff]   ;;  %s2746_s24 = sshll.u32 %s4290_s19, 4 }
  0x10   : > { %s3695_s15 = scalar_lea.vmem %s4275_s0, %s2607_s30  ;;  %v3462_v51 = vld [vmem:[%s4279_s4 + $0xa0] sm:$0xff]   ;;  %v3466_v59 = vld [vmem:[%s4279_s4 + $0xa8] sm:$0xff]   ;;  %v3467_v62 = vld [vmem:[%s4279_s4 + $0x70] sm:$0xff]   ;;  %s3846_s17 = scalar_lea.vmem %s4278_s3, %s2746_s24 }
  0x11   : > { %v416_v11 = vld [vmem:[%s3695_s15] sm:$0xff]  ;;  %v417_v16 = vld [vmem:[%s3695_s15 + $0x8] sm:$0xff]  ;;  %v418_v20 = vld [vmem:[%s3695_s15 + $0x10] sm:$0xff]  ;;  %s4200_s18 = scalar_lea.vmem %s4284_s9, %s2607_s30 }
  0x12   : > { %v432_v12 = vld [vmem:[%s3695_s15 + $0x80] sm:$0xff]  ;;  %3123 = vmatprep.mubr.msk.f32.mxu0 %vm463_vm0, %v416_v11  ;;  %3342 = vmatpush3.bf16.msra.mxu0 %v3339_v8  ;;  %v433_v19 = vld [vmem:[%s3695_s15 + $0x88] sm:$0xff]  ;;  %v434_v21 = vld [vmem:[%s3695_s15 + $0x90] sm:$0xff] }
  0x13   : > { %3147 = vmatprep.mubr.msk.f32.mxu1 %vm463_vm0, %v432_v12  ;;  %3417 = vmatpush3.bf16.msra.mxu1 %v3339_v8  ;;  %v419_v22 = vld [vmem:[%s3695_s15 + $0x18] sm:$0xff]  ;;  %v420_v28 = vld [vmem:[%s3695_s15 + $0x20] sm:$0xff]  ;;  %v421_v31 = vld [vmem:[%s3695_s15 + $0x28] sm:$0xff] }
  0x14   : > { %3344 = vmatprep.subr.bf16.mxu0 %v3343_v13  ;;  %3414 = vmatprep.subr.bf16.mxu1 %v3343_v13  ;;  %v435_v25 = vld [vmem:[%s3695_s15 + $0x98] sm:$0xff]  ;;  %v436_v29 = vld [vmem:[%s3695_s15 + $0xa0] sm:$0xff]  ;;  %v437_v32 = vld [vmem:[%s3695_s15 + $0xa8] sm:$0xff] }
  0x15   : > { %v422_v36 = vld [vmem:[%s3695_s15 + $0x30] sm:$0xff]  ;;  %v423_v39 = vld [vmem:[%s3695_s15 + $0x38] sm:$0xff]  ;;  %v424_v44 = vld [vmem:[%s3695_s15 + $0x40] sm:$0xff] }
  0x16   : > { %3346 = vmatpush3.bf16.msra.mxu0 %v3343_v13  ;;  %v438_v37 = vld [vmem:[%s3695_s15 + $0xb0] sm:$0xff]  ;;  %v439_v40 = vld [vmem:[%s3695_s15 + $0xb8] sm:$0xff]  ;;  %v440_v45 = vld [vmem:[%s3695_s15 + $0xc0] sm:$0xff] }
  0x17   : > { %3418 = vmatpush3.bf16.msra.mxu1 %v3343_v13  ;;  %2899 = vmatprep.subr.bf16.mxu0 %v3444_v15  ;;  %v425_v47 = vld [vmem:[%s3695_s15 + $0x48] sm:$0xff]  ;;  %v426_v52 = vld [vmem:[%s3695_s15 + $0x50] sm:$0xff]  ;;  %v427_v54 = vld [vmem:[%s3695_s15 + $0x58] sm:$0xff] }
  0x18   : > { %2787 = vmatprep.subr.bf16.mxu1 %v3443_v14  ;;  %v441_v48 = vld [vmem:[%s3695_s15 + $0xc8] sm:$0xff]  ;;  %v442_v53 = vld [vmem:[%s3695_s15 + $0xd0] sm:$0xff]  ;;  %v443_v57 = vld [vmem:[%s3695_s15 + $0xd8] sm:$0xff] }
  0x19   : > { %3124 = vmatmul.mubr.msk.f32.vlgmr.msra.gmra.mrb[0].mxu0 %vm463_vm0, %v417_v16  ;;  %v428_v60 = vld [vmem:[%s3695_s15 + $0x60] sm:$0xff]  ;;  %v429_v63 = vld [vmem:[%s3695_s15 + $0x68] sm:$0xff]  ;;  %v3468_v0 = vld [vmem:[%s4279_s4 + $0xf0] sm:$0xff]  }
  0x1a   : > { %3148 = vmatmul.mubr.msk.f32.vlgmr.msra.gmra.mrb[0].mxu1 %vm463_vm0, %v433_v19  ;;  %2900 = vmatpush3.bf16.msra.mxu0 %v3446_v18  ;;  %v444_v61 = vld [vmem:[%s3695_s15 + $0xe0] sm:$0xff]  ;;  %v445_v1 = vld [vmem:[%s3695_s15 + $0xe8] sm:$0xff]  ;;  %v3469_v2 = vld [vmem:[%s4279_s4 + $0x30] sm:$0xff]  }
  0x1b   : > { %2788 = vmatpush3.bf16.msra.mxu1 %v3445_v17  ;;  %3126 = vmatprep.mubr.msk.f32.mxu0 %vm463_vm0, %v418_v20  ;;  %v3470_v3 = vld [vmem:[%s4279_s4 + $0xb0] sm:$0xff]   ;;  %v431_v6 = vld [vmem:[%s3695_s15 + $0x78] sm:$0xff] }
  0x1c   : > { %3150 = vmatprep.mubr.msk.f32.mxu1 %vm463_vm0, %v434_v21  ;;  %2789 = vmatprep.subr.bf16.mxu1 %v3447_v23  ;;  %v430_v4 = vld [vmem:[%s3695_s15 + $0x70] sm:$0xff]  ;;  %v447_v7 = vld [vmem:[%s3695_s15 + $0xf8] sm:$0xff] }
  0x1d   : > { %2901 = vmatprep.subr.bf16.mxu0 %v3448_v24  ;;  %3127 = vmatmul.mubr.msk.f32.gmra.mrb[2].mxu0 %vm463_vm0, %v419_v22  ;;  %v446_v5 = vld [vmem:[%s3695_s15 + $0xf0] sm:$0xff]  ;;  %v3471_v8 = vld [vmem:[%s4279_s4 + $0x78] sm:$0xff]  }
  0x1e   : > { %3151 = vmatmul.mubr.msk.f32.gmra.mrb[2].mxu1 %vm463_vm0, %v435_v25  ;;  %2902 = vmatpush3.bf16.msra.mxu0 %v3450_v27  ;;  %v3472_v9 = vld [vmem:[%s4279_s4 + $0xf8] sm:$0xff]   ;;  %v3475_v12 = vld [vmem:[%s3846_s17] ss:$16 sps:$4 sm:$0xff]   ;;  %v3477_v13 = vld [vmem:[%s3846_s17 + $0x4] ss:$16 sps:$4 sm:$0xff]  }
  0x1f   : > { %2790 = vmatpush3.bf16.msra.mxu1 %v3449_v26  ;;  %3129 = vmatprep.mubr.msk.f32.mxu0 %vm463_vm0, %v420_v28  ;;  %v3473_v10 = vld [vmem:[%s4279_s4 + $0x38] sm:$0xff]   ;;  %v3481_v16 = vld [vmem:[%s3846_s17 + $0x24] ss:$16 sps:$4 sm:$0xff]   ;;  %v3485_v18 = vld [vmem:[%s3846_s17 + $0x20] ss:$16 sps:$4 sm:$0xff]  }
  0x20   : > { %3153 = vmatprep.mubr.msk.f32.mxu1 %vm463_vm0, %v436_v29  ;;  %2791 = vmatprep.subr.bf16.mxu1 %v3451_v30  ;;  %v3474_v11 = vld [vmem:[%s4279_s4 + $0xb8] sm:$0xff]   ;;  %v3487_v20 = vld [vmem:[%s3846_s17 + $0x44] ss:$16 sps:$4 sm:$0xff]   ;;  %v3491_v22 = vld [vmem:[%s3846_s17 + $0x40] ss:$16 sps:$4 sm:$0xff]  }
  0x21   : > { %2903 = vmatprep.subr.bf16.mxu0 %v3452_v33  ;;  %3130 = vmatmul.mubr.msk.f32.gmra.mrb[4].mxu0 %vm463_vm0, %v421_v31  ;;  %v3478_v14 = vld [vmem:[%s3846_s17 + $0x8] ss:$16 sps:$4 sm:$0xff]   ;;  %v3480_v15 = vld [vmem:[%s3846_s17 + $0xc] ss:$16 sps:$4 sm:$0xff]   ;;  %v3493_v24 = vld [vmem:[%s3846_s17 + $0x64] ss:$16 sps:$4 sm:$0xff]  }
  0x22   : > { %3154 = vmatmul.mubr.msk.f32.gmra.mrb[4].mxu1 %vm463_vm0, %v437_v32  ;;  %2904 = vmatpush3.bf16.msra.mxu0 %v3454_v35  ;;  %v3483_v17 = vld [vmem:[%s3846_s17 + $0x2c] ss:$16 sps:$4 sm:$0xff]   ;;  %v3486_v19 = vld [vmem:[%s3846_s17 + $0x28] ss:$16 sps:$4 sm:$0xff]   ;;  %v3497_v26 = vld [vmem:[%s3846_s17 + $0x60] ss:$16 sps:$4 sm:$0xff]  }
  0x23   : > { %2792 = vmatpush3.bf16.msra.mxu1 %v3453_v34  ;;  %3132 = vmatprep.mubr.msk.f32.mxu0 %vm463_vm0, %v422_v36  ;;  %v3489_v21 = vld [vmem:[%s3846_s17 + $0x4c] ss:$16 sps:$4 sm:$0xff]   ;;  %v3492_v23 = vld [vmem:[%s3846_s17 + $0x48] ss:$16 sps:$4 sm:$0xff]   ;;  %v3499_v28 = vld [vmem:[%s3846_s17 + $0x84] ss:$16 sps:$4 sm:$0xff]  }
  0x24   : > { %3156 = vmatprep.mubr.msk.f32.mxu1 %vm463_vm0, %v438_v37  ;;  %2793 = vmatprep.subr.bf16.mxu1 %v3455_v38  ;;  %v3495_v25 = vld [vmem:[%s3846_s17 + $0x6c] ss:$16 sps:$4 sm:$0xff]   ;;  %v3498_v27 = vld [vmem:[%s3846_s17 + $0x68] ss:$16 sps:$4 sm:$0xff]   ;;  %v3503_v30 = vld [vmem:[%s3846_s17 + $0x80] ss:$16 sps:$4 sm:$0xff]  }
  0x25   : > { %2905 = vmatprep.subr.bf16.mxu0 %v3456_v41  ;;  %3133 = vmatmul.mubr.msk.f32.gmra.mrb[6].mxu0 %vm463_vm0, %v423_v39  ;;  %v3501_v29 = vld [vmem:[%s3846_s17 + $0x8c] ss:$16 sps:$4 sm:$0xff]   ;;  %v3504_v31 = vld [vmem:[%s3846_s17 + $0x88] ss:$16 sps:$4 sm:$0xff]   ;;  %v3505_v32 = vld [vmem:[%s3846_s17 + $0xa4] ss:$16 sps:$4 sm:$0xff]  }
  0x26   : > { %3157 = vmatmul.mubr.msk.f32.gmra.mrb[6].mxu1 %vm463_vm0, %v439_v40  ;;  %2906 = vmatpush3.bf16.msra.mxu0 %v3458_v43  ;;  %v3507_v33 = vld [vmem:[%s3846_s17 + $0xac] ss:$16 sps:$4 sm:$0xff]   ;;  %v3509_v34 = vld [vmem:[%s3846_s17 + $0xa0] ss:$16 sps:$4 sm:$0xff]   ;;  %v3510_v35 = vld [vmem:[%s3846_s17 + $0xa8] ss:$16 sps:$4 sm:$0xff]  }
  0x27   : > { %2794 = vmatpush3.bf16.msra.mxu1 %v3457_v42  ;;  %3135 = vmatprep.mubr.msk.f32.mxu0 %vm463_vm0, %v424_v44  ;;  %v3511_v36 = vld [vmem:[%s3846_s17 + $0xc4] ss:$16 sps:$4 sm:$0xff]   ;;  %v3513_v37 = vld [vmem:[%s3846_s17 + $0xcc] ss:$16 sps:$4 sm:$0xff]   ;;  %v3515_v44 = vld [vmem:[%s3846_s17 + $0xc0] ss:$16 sps:$4 sm:$0xff]  }
  0x28   : > { %3159 = vmatprep.mubr.msk.f32.mxu1 %vm463_vm0, %v440_v45  ;;  %2795 = vmatprep.subr.bf16.mxu1 %v3459_v46  ;;  %v1942_v38 = vld [vmem:[%s4280_s5] sm:$0xff]  ;;  %v1943_v39 = vld [vmem:[%s4280_s5 + $0x8] sm:$0xff]  ;;  %v1944_v40 = vld [vmem:[%s4280_s5 + $0x10] sm:$0xff] }
  0x29   : > { %2907 = vmatprep.subr.bf16.mxu0 %v3460_v49  ;;  %3136 = vmatmul.mubr.msk.f32.gmra.mrb[8].mxu0 %vm463_vm0, %v425_v47  ;;  %v3347_v41 = vpack.c.bf16 %v1943_v39, %v1942_v38  ;;  %v1945_v42 = vld [vmem:[%s4280_s5 + $0x18] sm:$0xff]  ;;  %v3517_v46 = vld [vmem:[%s3846_s17 + $0xe4] ss:$16 sps:$4 sm:$0xff]  }
  0x2a   : > { %3160 = vmatmul.mubr.msk.f32.gmra.mrb[8].mxu1 %vm463_vm0, %v441_v48  ;;  %2908 = vmatpush3.bf16.msra.mxu0 %v3462_v51  ;;  %v3351_v43 = vpack.c.bf16 %v1945_v42, %v1944_v40  ;;  %v3516_v45 = vld [vmem:[%s3846_s17 + $0xc8] ss:$16 sps:$4 sm:$0xff]   ;;  %v3519_v47 = vld [vmem:[%s3846_s17 + $0xec] ss:$16 sps:$4 sm:$0xff]   ;;  %v3521_v48 = vld [vmem:[%s3846_s17 + $0xe0] ss:$16 sps:$4 sm:$0xff]  }
  0x2b   : > { %2796 = vmatpush3.bf16.msra.mxu1 %v3461_v50  ;;  %3138 = vmatprep.mubr.msk.f32.mxu0 %vm463_vm0, %v426_v52  ;;  %v3522_v49 = vld [vmem:[%s3846_s17 + $0xe8] ss:$16 sps:$4 sm:$0xff]   ;;  %v3523_v50 = vld [vmem:[%s3846_s17 + $0x104] ss:$16 sps:$4 sm:$0xff]   ;;  %v3525_v51 = vld [vmem:[%s3846_s17 + $0x10c] ss:$16 sps:$4 sm:$0xff]  }
  0x2c   : > { %3162 = vmatprep.mubr.msk.f32.mxu1 %vm463_vm0, %v442_v53  ;;  %2797 = vmatprep.subr.bf16.mxu1 %v3463_v55  ;;  %v3527_v52 = vld [vmem:[%s3846_s17 + $0x100] ss:$16 sps:$4 sm:$0xff]   ;;  %v3528_v53 = vld [vmem:[%s3846_s17 + $0x108] ss:$16 sps:$4 sm:$0xff]  }
  0x2d   : > { %2909 = vmatprep.subr.bf16.mxu0 %v3464_v56  ;;  %3139 = vmatmul.mubr.msk.f32.gmra.mrb[10].mxu0 %vm463_vm0, %v427_v54  ;;  %v1946_v54 = vld [vmem:[%s4280_s5 + $0x20] sm:$0xff]  ;;  %v1947_v55 = vld [vmem:[%s4280_s5 + $0x28] sm:$0xff] }
  0x2e   : > { %3163 = vmatmul.mubr.msk.f32.gmra.mrb[10].mxu1 %vm463_vm0, %v443_v57  ;;  %2910 = vmatpush3.bf16.msra.mxu0 %v3466_v59  ;;  %v3529_v56 = vld [vmem:[%s3846_s17 + $0x124] ss:$16 sps:$4 sm:$0xff]   ;;  %v3531_v57 = vld [vmem:[%s3846_s17 + $0x12c] ss:$16 sps:$4 sm:$0xff]   ;;  %v3533_v59 = vld [vmem:[%s3846_s17 + $0x120] ss:$16 sps:$4 sm:$0xff]  }
  0x2f   : > { %2798 = vmatpush3.bf16.msra.mxu1 %v3465_v58  ;;  %3141 = vmatprep.mubr.msk.f32.mxu0 %vm463_vm0, %v428_v60  ;;  %v3355_v58 = vpack.c.bf16 %v1947_v55, %v1946_v54  ;;  %v3534_v60 = vld [vmem:[%s3846_s17 + $0x128] ss:$16 sps:$4 sm:$0xff]  }
  0x30   : > { %3165 = vmatprep.mubr.msk.f32.mxu1 %vm463_vm0, %v444_v61  ;;  %2799 = vmatprep.subr.bf16.mxu1 %v3467_v62  ;;  %v3535_v61 = vld [vmem:[%s3846_s17 + $0x144] ss:$16 sps:$4 sm:$0xff]   ;;  %v3537_v62 = vld [vmem:[%s3846_s17 + $0x14c] ss:$16 sps:$4 sm:$0xff]  }
  0x31   : > { %2911 = vmatprep.subr.bf16.mxu0 %v3468_v0  ;;  %3142 = vmatmul.mubr.msk.f32.gmra.mrb[12].mxu0 %vm463_vm0, %v429_v63  ;;  %v1948_v63 = vld [vmem:[%s4280_s5 + $0x30] sm:$0xff]  ;;  %v1949_v0 = vld [vmem:[%s4280_s5 + $0x38] sm:$0xff] }
  0x32   : > { %3166 = vmatmul.mubr.msk.f32.gmra.mrb[12].mxu1 %vm463_vm0, %v445_v1  ;;  %2912 = vmatpush3.bf16.msra.mxu0 %v3470_v3  ;;  %v3359_v1 = vpack.c.bf16 %v1949_v0, %v1948_v63  ;;  %v3540_v3 = vld [vmem:[%s3846_s17 + $0x148] ss:$16 sps:$4 sm:$0xff]  }
  0x33   : > { %2800 = vmatpush3.bf16.msra.mxu1 %v3469_v2  ;;  %3144 = vmatprep.mubr.msk.f32.mxu0 %vm463_vm0, %v430_v4  ;;  %v3539_v2 = vld [vmem:[%s3846_s17 + $0x140] ss:$16 sps:$4 sm:$0xff]  }
  0x34   : > { %3168 = vmatprep.mubr.msk.f32.mxu1 %vm463_vm0, %v446_v5  ;;  %2801 = vmatprep.subr.bf16.mxu1 %v3471_v8  ;;  %v1950_v4 = vld [vmem:[%s4280_s5 + $0x40] sm:$0xff]  ;;  %v1951_v5 = vld [vmem:[%s4280_s5 + $0x48] sm:$0xff] }
  0x35   : > { %2913 = vmatprep.subr.bf16.mxu0 %v3472_v9  ;;  %3145 = vmatmul.mubr.msk.f32.gmra.mrb[14].mxu0 %vm463_vm0, %v431_v6  ;;  %v3541_v6 = vld [vmem:[%s3846_s17 + $0x164] ss:$16 sps:$4 sm:$0xff]   ;;  %v3363_v8 = vpack.c.bf16 %v1951_v5, %v1950_v4 }
  0x36   : > { %3169 = vmatmul.mubr.msk.f32.gmra.mrb[14].mxu1 %vm463_vm0, %v447_v7  ;;  %2914 = vmatpush3.bf16.msra.mxu0 %v3474_v11  ;;  %v3543_v7 = vld [vmem:[%s3846_s17 + $0x16c] ss:$16 sps:$4 sm:$0xff]   ;;  %v1952_v9 = vld [vmem:[%s4280_s5 + $0x50] sm:$0xff] }
  0x37   : > { %2802 = vmatpush3.bf16.msra.mxu1 %v3473_v10  ;;  %1521 = vmatprep.mubr.bf16.mxu1 %v3477_v13  ;;  %v1953_v10 = vld [vmem:[%s4280_s5 + $0x58] sm:$0xff] }
  0x38   : > { %1682 = vmatprep.mubr.bf16.mxu0 %v3480_v15  ;;  %3348 = vmatprep.subr.bf16.mxu1 %v3347_v41  ;;  %v3367_v11 = vpack.c.bf16 %v1953_v10, %v1952_v9  ;;  %v3546_v13 = vld [vmem:[%s3846_s17 + $0x168] ss:$16 sps:$4 sm:$0xff]  }
  0x39   : > { %1683 = vmatmul.mubr.bf16.vlgmr.msra.gmra.mrb[16].mxu0 %v3478_v14  ;;  %v1954_v14 = vld [vmem:[%s4280_s5 + $0x60] sm:$0xff]  ;;  %v1955_v15 = vld [vmem:[%s4280_s5 + $0x68] sm:$0xff] }
  0x3a   : > { %1522 = vmatmul.mubr.bf16.vlgmr.msra.gmra.mrb[16].mxu1 %v3475_v12  ;;  %1690 = vmatprep.mubr.bf16.mxu0 %v3483_v17  ;;  %v3545_v12 = vld [vmem:[%s3846_s17 + $0x160] ss:$16 sps:$4 sm:$0xff]   ;;  %v3549_v17 = vld [vmem:[%s3846_s17 + $0x18c] ss:$16 sps:$4 sm:$0xff]  }
  0x3b   : > { %1529 = vmatprep.mubr.bf16.mxu1 %v3481_v16  ;;  %3350 = vmatpush3.bf16.msra.mxu1 %v3347_v41  ;;  %v3547_v16 = vld [vmem:[%s3846_s17 + $0x184] ss:$16 sps:$4 sm:$0xff]  }
  0x3c   : > { %3352 = vmatprep.subr.bf16.mxu1 %v3351_v43 }
  0x3f   : > { %3354 = vmatpush3.bf16.msra.mxu1 %v3351_v43 }
  0x40   : > { %3356 = vmatprep.subr.bf16.mxu1 %v3355_v58 }
  0x41   : > { %1691 = vmatmul.mubr.bf16.gmra.mrb[20].mxu0 %v3486_v19  ;;  %v1956_v19 = vld [vmem:[%s4280_s5 + $0x70] sm:$0xff] }
  0x42   : > { %1530 = vmatmul.mubr.bf16.gmra.mrb[20].mxu1 %v3485_v18  ;;  %1698 = vmatprep.mubr.bf16.mxu0 %v3489_v21  ;;  %v3371_v18 = vpack.c.bf16 %v1955_v15, %v1954_v14 }
  0x43   : > { %1537 = vmatprep.mubr.bf16.mxu1 %v3487_v20  ;;  %3358 = vmatpush3.bf16.msra.mxu1 %v3355_v58  ;;  %v1957_v20 = vld [vmem:[%s4280_s5 + $0x78] sm:$0xff] }
  0x44   : > { %3360 = vmatprep.subr.bf16.mxu1 %v3359_v1  ;;  %v3375_v21 = vpack.c.bf16 %v1957_v20, %v1956_v19 }
  0x47   : > { %3362 = vmatpush3.bf16.msra.mxu1 %v3359_v1 }
  0x48   : > { %3364 = vmatprep.subr.bf16.mxu1 %v3363_v8 }
  0x49   : > { %1699 = vmatmul.mubr.bf16.gmra.mrb[24].mxu0 %v3492_v23  ;;  %v3552_v23 = vld [vmem:[%s3846_s17 + $0x188] ss:$16 sps:$4 sm:$0xff]  }
  0x4a   : > { %1538 = vmatmul.mubr.bf16.gmra.mrb[24].mxu1 %v3491_v22  ;;  %1706 = vmatprep.mubr.bf16.mxu0 %v3495_v25  ;;  %v3551_v22 = vld [vmem:[%s3846_s17 + $0x180] ss:$16 sps:$4 sm:$0xff]   ;;  %v3555_v25 = vld [vmem:[%s3846_s17 + $0x1ac] ss:$16 sps:$4 sm:$0xff]  }
  0x4b   : > { %1545 = vmatprep.mubr.bf16.mxu1 %v3493_v24  ;;  %3366 = vmatpush3.bf16.msra.mxu1 %v3363_v8  ;;  %v3553_v24 = vld [vmem:[%s3846_s17 + $0x1a4] ss:$16 sps:$4 sm:$0xff]  }
  0x4c   : > { %3368 = vmatprep.subr.bf16.mxu1 %v3367_v11 }
  0x4f   : > { %3370 = vmatpush3.bf16.msra.mxu1 %v3367_v11 }
  0x50   : > { %3372 = vmatprep.subr.bf16.mxu1 %v3371_v18 }
  0x51   : > { %1707 = vmatmul.mubr.bf16.gmra.mrb[28].mxu0 %v3498_v27  ;;  %v3558_v27 = vld [vmem:[%s3846_s17 + $0x1a8] ss:$16 sps:$4 sm:$0xff]  }
  0x52   : > { %1546 = vmatmul.mubr.bf16.gmra.mrb[28].mxu1 %v3497_v26  ;;  %1714 = vmatprep.mubr.bf16.mxu0 %v3501_v29  ;;  %v3557_v26 = vld [vmem:[%s3846_s17 + $0x1a0] ss:$16 sps:$4 sm:$0xff]   ;;  %v3561_v29 = vld [vmem:[%s3846_s17 + $0x1cc] ss:$16 sps:$4 sm:$0xff]  }
  0x53   : > { %1553 = vmatprep.mubr.bf16.mxu1 %v3499_v28  ;;  %3374 = vmatpush3.bf16.msra.mxu1 %v3371_v18  ;;  %v3559_v28 = vld [vmem:[%s3846_s17 + $0x1c4] ss:$16 sps:$4 sm:$0xff]  }
  0x54   : > { %3376 = vmatprep.subr.bf16.mxu1 %v3375_v21 }
  0x57   : > { %3378 = vmatpush3.bf16.msra.mxu1 %v3375_v21 }
  0x59   : > { %1715 = vmatmul.mubr.bf16.gmra.mrb[32].mxu0 %v3504_v31  ;;  %v3564_v31 = vld [vmem:[%s3846_s17 + $0x1c8] ss:$16 sps:$4 sm:$0xff]  }
  0x5a   : > { %1554 = vmatmul.mubr.bf16.gmra.mrb[32].mxu1 %v3503_v30  ;;  %1722 = vmatprep.mubr.bf16.mxu0 %v3507_v33  ;;  %v3563_v30 = vld [vmem:[%s3846_s17 + $0x1c0] ss:$16 sps:$4 sm:$0xff]   ;;  %v3567_v33 = vld [vmem:[%s3846_s17 + $0x1ec] ss:$16 sps:$4 sm:$0xff]  }
  0x5b   : > { %1561 = vmatprep.mubr.bf16.mxu1 %v3505_v32  ;;  %v3565_v32 = vld [vmem:[%s3846_s17 + $0x1e4] ss:$16 sps:$4 sm:$0xff]  }
  0x61   : > { %1723 = vmatmul.mubr.bf16.gmra.mrb[36].mxu0 %v3510_v35  ;;  %v3570_v35 = vld [vmem:[%s3846_s17 + $0x1e8] ss:$16 sps:$4 sm:$0xff]  }
  0x62   : > { %1562 = vmatmul.mubr.bf16.gmra.mrb[36].mxu1 %v3509_v34  ;;  %1730 = vmatprep.mubr.bf16.mxu0 %v3513_v37  ;;  %v3569_v34 = vld [vmem:[%s3846_s17 + $0x1e0] ss:$16 sps:$4 sm:$0xff]  }
  0x63   : > { %1569 = vmatprep.mubr.bf16.mxu1 %v3511_v36  ;;  %v3978_v36 = vld [vmem:[%s4277_s2] ss:$0 sm:$0xff] }
  0x69   : > { %1731 = vmatmul.mubr.bf16.gmra.mrb[40].mxu0 %v3516_v45 }
  0x6a   : > { %1570 = vmatmul.mubr.bf16.gmra.mrb[40].mxu1 %v3515_v44  ;;  %1738 = vmatprep.mubr.bf16.mxu0 %v3519_v47 }
  0x6b   : > { %1577 = vmatprep.mubr.bf16.mxu1 %v3517_v46 }
  0x71   : > { %1739 = vmatmul.mubr.bf16.gmra.mrb[44].mxu0 %v3522_v49 }
  0x72   : > { %1578 = vmatmul.mubr.bf16.gmra.mrb[44].mxu1 %v3521_v48  ;;  %1746 = vmatprep.mubr.bf16.mxu0 %v3525_v51 }
  0x73   : > { %1585 = vmatprep.mubr.bf16.mxu1 %v3523_v50 }
  0x79   : > { %1747 = vmatmul.mubr.bf16.gmra.mrb[48].mxu0 %v3528_v53 }
  0x7a   : > { %1586 = vmatmul.mubr.bf16.gmra.mrb[48].mxu1 %v3527_v52  ;;  %1754 = vmatprep.mubr.bf16.mxu0 %v3531_v57 }
  0x7b   : > { %1593 = vmatprep.mubr.bf16.mxu1 %v3529_v56 }
  0x81   : > { %1755 = vmatmul.mubr.bf16.gmra.mrb[52].mxu0 %v3534_v60 }
  0x82   : > { %1594 = vmatmul.mubr.bf16.gmra.mrb[52].mxu1 %v3533_v59  ;;  %1762 = vmatprep.mubr.bf16.mxu0 %v3537_v62 }
  0x83   : > { %1601 = vmatprep.mubr.bf16.mxu1 %v3535_v61 }
  0x89   : > { %1763 = vmatmul.mubr.bf16.gmra.mrb[56].mxu0 %v3540_v3 }
  0x8a   : > { %1602 = vmatmul.mubr.bf16.gmra.mrb[56].mxu1 %v3539_v2  ;;  %1770 = vmatprep.mubr.bf16.mxu0 %v3543_v7 }
  0x8b   : > { %1609 = vmatprep.mubr.bf16.mxu1 %v3541_v6 }
  0x91   : > { %1771 = vmatmul.mubr.bf16.gmra.mrb[60].mxu0 %v3546_v13 }
  0x92   : > { %1610 = vmatmul.mubr.bf16.gmra.mrb[60].mxu1 %v3545_v12  ;;  %1778 = vmatprep.mubr.bf16.mxu0 %v3549_v17 }
  0x93   : > { %1617 = vmatprep.mubr.bf16.mxu1 %v3547_v16 }
  0x99   : > { %1779 = vmatmul.mubr.bf16.gmra.mrb[64].mxu0 %v3552_v23 }
  0x9a   : > { %1618 = vmatmul.mubr.bf16.gmra.mrb[64].mxu1 %v3551_v22  ;;  %1786 = vmatprep.mubr.bf16.mxu0 %v3555_v25 }
  0x9b   : > { %1625 = vmatprep.mubr.bf16.mxu1 %v3553_v24 }
  0xa1   : > { %1787 = vmatmul.mubr.bf16.gmra.mrb[68].mxu0 %v3558_v27 }
  0xa2   : > { %1626 = vmatmul.mubr.bf16.gmra.mrb[68].mxu1 %v3557_v26  ;;  %1794 = vmatprep.mubr.bf16.mxu0 %v3561_v29 }
  0xa3   : > { %1633 = vmatprep.mubr.bf16.mxu1 %v3559_v28 }
  0xa9   : > { %1795 = vmatmul.mubr.bf16.gmra.mrb[72].mxu0 %v3564_v31 }
  0xaa   : > { %1634 = vmatmul.mubr.bf16.gmra.mrb[72].mxu1 %v3563_v30  ;;  %1802 = vmatprep.mubr.bf16.mxu0 %v3567_v33 }
  0xab   : > { %1641 = vmatprep.mubr.bf16.mxu1 %v3565_v32 }
  0xb1   : > { %1803 = vmatmul.mubr.bf16.gmra.mrb[76].mxu0 %v3570_v35  ;;  %v2222_v35 = vld [vmem:[%s4282_s7] sm:$0xff] }
  0xb2   : > { %1642 = vmatmul.mubr.bf16.gmra.mrb[76].mxu1 %v3569_v34 }
  0xec   : > { %v3980_v37 = vpop.f32.mrb[0].mxu0 }
  0xed   : > { %v3149_v38 = vpop.f32.mrb[0].mxu1  ;;  %v626_v40 = vpop.f32.mrb[1].mxu0 }
  0xee   : > { %v3983_v39 = vadd.f32 %v3149_v38, %v3978_v36  ;;  %v706_v41 = vpop.f32.mrb[1].mxu1  ;;  %v627_v31 = vadd.f32 %v3978_v36, %v626_v40  ;;  %v2223_v38 = vld [vmem:[%s4282_s7 + $0x8] sm:$0xff]  ;;  %v2225_v40 = vld [vmem:[%s4282_s7 + $0x18] sm:$0xff] }
  0xef   : > { %v3986_v42 = vadd.f32 %v3978_v36, %v706_v41  ;;  %v2224_v41 = vld [vmem:[%s4282_s7 + $0x10] sm:$0xff] }
  0xf0   : > { %v3988_v43 = vpop.f32.mrb[2].mxu0 }
  0xf1   : > { %v3152_v44 = vpop.f32.mrb[2].mxu1  ;;  %v3993_v46 = vpop.f32.mrb[3].mxu0 }
  0xf2   : > { %v3991_v45 = vadd.f32 %v3152_v44, %v3978_v36  ;;  %v716_v47 = vpop.f32.mrb[3].mxu1  ;;  %v3379_v44 = vpack.c.bf16 %v2223_v38, %v2222_v35 }
  0xf3   : > { %v3996_v48 = vadd.f32 %v3978_v36, %v716_v47  ;;  %v632_v47 = vadd.f32 %v3980_v37, %v3978_v36 }
  0xf4   : > { %v3998_v49 = vpop.f32.mrb[4].mxu0  ;;  %3380 = vmatprep.subr.bf16.mxu0 %v3379_v44 }
  0xf5   : > { %v3155_v50 = vpop.f32.mrb[4].mxu1  ;;  %v4003_v52 = vpop.f32.mrb[5].mxu0  ;;  %3382 = vmatpush3.bf16.msra.mxu0 %v3379_v44 }
  0xf6   : > { %v4001_v51 = vadd.f32 %v3155_v50, %v3978_v36  ;;  %v726_v53 = vpop.f32.mrb[5].mxu1 }
  0xf7   : > { %v4006_v54 = vadd.f32 %v3978_v36, %v726_v53 }
  0xf8   : > { %v4008_v55 = vpop.f32.mrb[6].mxu0 }
  0xf9   : > { %v3158_v56 = vpop.f32.mrb[6].mxu1  ;;  %v4013_v58 = vpop.f32.mrb[7].mxu0 }
  0xfa   : > { %v4011_v57 = vadd.f32 %v3158_v56, %v3978_v36  ;;  %v736_v59 = vpop.f32.mrb[7].mxu1  ;;  %v3383_v56 = vpack.c.bf16 %v2225_v40, %v2224_v41  ;;  %v2230_v41 = vld [vmem:[%s4282_s7 + $0x40] sm:$0xff] }
  0xfb   : > { %v4016_v60 = vadd.f32 %v3978_v36, %v736_v59  ;;  %v2226_v59 = vld [vmem:[%s4282_s7 + $0x20] sm:$0xff] }
  0xfc   : > { %v4018_v61 = vpop.f32.mrb[8].mxu0  ;;  %3384 = vmatprep.subr.bf16.mxu0 %v3383_v56 }
  0xfd   : > { %v3161_v62 = vpop.f32.mrb[8].mxu1  ;;  %v4023_v0 = vpop.f32.mrb[9].mxu0  ;;  %3386 = vmatpush3.bf16.msra.mxu0 %v3383_v56 }
  0xfe   : > { %v4021_v63 = vadd.f32 %v3161_v62, %v3978_v36  ;;  %v746_v1 = vpop.f32.mrb[9].mxu1  ;;  %v2227_v62 = vld [vmem:[%s4282_s7 + $0x28] sm:$0xff] }
  0xff   : > { %v4026_v2 = vadd.f32 %v3978_v36, %v746_v1  ;;  %v3387_v37 = vpack.c.bf16 %v2227_v62, %v2226_v59 }
 0x100   : > { %v4028_v3 = vpop.f32.mrb[10].mxu0 }
 0x101   : > { %v3164_v4 = vpop.f32.mrb[10].mxu1  ;;  %v4033_v6 = vpop.f32.mrb[11].mxu0  ;;  %3388 = vmatprep.subr.bf16.mxu0 %v3387_v37 }
 0x102   : > { %v4031_v5 = vadd.f32 %v3164_v4, %v3978_v36  ;;  %v756_v7 = vpop.f32.mrb[11].mxu1  ;;  %3390 = vmatpush3.bf16.msra.mxu0 %v3387_v37 }
 0x103   : > { %v4036_v8 = vadd.f32 %v3978_v36, %v756_v7 }
 0x104   : > { %v4038_v9 = vpop.f32.mrb[12].mxu0 }
 0x105   : > { %v3167_v10 = vpop.f32.mrb[12].mxu1  ;;  %v4043_v12 = vpop.f32.mrb[13].mxu0 }
 0x106   : > { %v4041_v11 = vadd.f32 %v3167_v10, %v3978_v36  ;;  %v766_v13 = vpop.f32.mrb[13].mxu1 }
 0x107   : > { %v4046_v14 = vadd.f32 %v3978_v36, %v766_v13 }
 0x108   : > { %v4048_v15 = vpop.f32.mrb[14].mxu0 }
 0x109   : > { %v3170_v16 = vpop.f32.mrb[14].mxu1  ;;  %v4053_v18 = vpop.f32.mrb[15].mxu0 }
 0x10a   : > { %v4051_v17 = vadd.f32 %v3170_v16, %v3978_v36  ;;  %v776_v19 = vpop.f32.mrb[15].mxu1 }
 0x10b   : > { %v4056_v20 = vadd.f32 %v3978_v36, %v776_v19 }
 0x10c   : > { %v2915_v22 = vpop.f32.mrb[16].mxu0 }
 0x10d   : > { %v2803_v21 = vpop.f32.mrb[16].mxu1  ;;  %v2916_v24 = vpop.f32.mrb[17].mxu0 }
 0x10e   : > { %v2804_v23 = vpop.f32.mrb[17].mxu1  ;;  %v2917_v26 = vadd.f32 %v2916_v24, %v2915_v22  ;;  %v2918_v28 = vpop.f32.mrb[18].mxu0 }
 0x10f   : > { %v2805_v25 = vadd.f32 %v2804_v23, %v2803_v21  ;;  %v2806_v27 = vpop.f32.mrb[18].mxu1  ;;  %v2919_v30 = vpop.f32.mrb[19].mxu0 }
 0x110   : > { %v2807_v29 = vpop.f32.mrb[19].mxu1  ;;  %v2920_v34 = vadd.f32 %v2919_v30, %v2918_v28 }
 0x111   : > { %v1685_v32 = vadd.f32 %v2917_v26, %v2805_v25  ;;  %v2808_v33 = vadd.f32 %v2807_v29, %v2806_v27  ;;  %v2228_v25 = vld [vmem:[%s4282_s7 + $0x30] sm:$0xff]  ;;  %v2229_v26 = vld [vmem:[%s4282_s7 + $0x38] sm:$0xff]  ;;  %v637_v27 = vadd.f32 %v3978_v36, %v3993_v46  ;;  %v2231_v46 = vld [vmem:[%s4282_s7 + $0x48] sm:$0xff] }
 0x112   : > { %v3395_v59 = vpack.c.bf16 %v2231_v46, %v2230_v41 }
 0x113   : > { %v1688_v50 = vadd.f32 %v2920_v34, %v2808_v33  ;;  %v1811_v53 = vadd.f32 %v1685_v32, %v627_v31  ;;  %v3391_v33 = vpack.c.bf16 %v2229_v26, %v2228_v25  ;;  %v642_v34 = vadd.f32 %v3988_v43, %v3978_v36 }
 0x114   : > { %v2921_v7 = vpop.f32.mrb[20].mxu0  ;;  %v652_v25 = vadd.f32 %v3998_v49, %v3978_v36 }
 0x115   : > { %v1812_v1 = vadd.f32 %v1688_v50, %v632_v47  ;;  %v2809_v4 = vpop.f32.mrb[20].mxu1  ;;  %v1910_v10 = vmax.f32 %v1811_v53, 0.0  ;;  %v2922_v16 = vpop.f32.mrb[21].mxu0  ;;  %3392 = vmatprep.subr.bf16.mxu0 %v3391_v33 }
 0x116   : > { %v2810_v13 = vpop.f32.mrb[21].mxu1  ;;  %v2923_v22 = vadd.f32 %v2922_v16, %v2921_v7  ;;  %v2924_v24 = vpop.f32.mrb[22].mxu0  ;;  %v647_v16 = vadd.f32 %v3978_v36, %v4003_v52  ;;  %3394 = vmatpush3.bf16.msra.mxu0 %v3391_v33  ;;  %v2235_v52 = vld [vmem:[%s4282_s7 + $0x68] sm:$0xff] }
 0x117   : > { %v1911_v19 = vmax.f32 %v1812_v1, 0.0  ;;  %v2811_v21 = vadd.f32 %v2810_v13, %v2809_v4  ;;  %v2812_v23 = vpop.f32.mrb[22].mxu1  ;;  %3203 = vmatprep.mubr.f32.mxu1 %v1910_v10  ;;  %v2925_v29 = vpop.f32.mrb[23].mxu0  ;;  %v2232_v10 = vld [vmem:[%s4282_s7 + $0x50] sm:$0xff]  ;;  %v2233_v13 = vld [vmem:[%s4282_s7 + $0x58] sm:$0xff]  ;;  %3396 = vmatprep.subr.bf16.mxu0 %v3395_v59 }
 0x118   : > { %v2813_v28 = vpop.f32.mrb[23].mxu1  ;;  %v2926_v32 = vadd.f32 %v2925_v29, %v2924_v24  ;;  %v3399_v24 = vpack.c.bf16 %v2233_v13, %v2232_v10 }
 0x119   : > { %v1693_v30 = vadd.f32 %v2923_v22, %v2811_v21  ;;  %v2814_v31 = vadd.f32 %v2813_v28, %v2812_v23  ;;  %3204 = vmatmul.mubr.f32.vlgmr.msra.gmra.mrb[80].mxu1 %v1911_v19  ;;  %v2234_v28 = vld [vmem:[%s4282_s7 + $0x60] sm:$0xff] }
 0x11a   : > { %3398 = vmatpush3.bf16.msra.mxu0 %v3395_v59  ;;  %v662_v59 = vadd.f32 %v4008_v55, %v3978_v36  ;;  %v667_v55 = vadd.f32 %v3978_v36, %v4023_v0 }
 0x11b   : > { %v1696_v35 = vadd.f32 %v2926_v32, %v2814_v31  ;;  %v1813_v38 = vadd.f32 %v1693_v30, %v637_v27  ;;  %3400 = vmatprep.subr.bf16.mxu0 %v3399_v24 }
 0x11c   : > { %v2927_v40 = vpop.f32.mrb[24].mxu0 }
 0x11d   : > { %v2815_v44 = vpop.f32.mrb[24].mxu1  ;;  %v1912_v47 = vmax.f32 %v1813_v38, 0.0  ;;  %v1814_v50 = vadd.f32 %v1696_v35, %v642_v34  ;;  %v2928_v56 = vpop.f32.mrb[25].mxu0  ;;  %v3403_v35 = vpack.c.bf16 %v2235_v52, %v2234_v28  ;;  %v672_v52 = vadd.f32 %v4018_v61, %v3978_v36 }
 0x11e   : > { %v2816_v53 = vpop.f32.mrb[25].mxu1  ;;  %v2929_v62 = vadd.f32 %v2928_v56, %v2927_v40  ;;  %v2930_v4 = vpop.f32.mrb[26].mxu0  ;;  %v657_v40 = vadd.f32 %v3978_v36, %v4013_v58  ;;  %3402 = vmatpush3.bf16.msra.mxu0 %v3399_v24 }
 0x11f   : > { %v2817_v43 = vadd.f32 %v2816_v53, %v2815_v44  ;;  %v2818_v1 = vpop.f32.mrb[26].mxu1  ;;  %3206 = vmatprep.mubr.f32.mxu1 %v1912_v47  ;;  %v1913_v7 = vmax.f32 %v1814_v50, 0.0  ;;  %v2931_v19 = vpop.f32.mrb[27].mxu0  ;;  %3404 = vmatprep.subr.bf16.mxu0 %v3403_v35 }
 0x120   : > { %v2819_v37 = vpop.f32.mrb[27].mxu1  ;;  %v2932_v23 = vadd.f32 %v2931_v19, %v2930_v4 }
 0x121   : > { %v1701_v21 = vadd.f32 %v2929_v62, %v2817_v43  ;;  %v2820_v22 = vadd.f32 %v2819_v37, %v2818_v1  ;;  %3207 = vmatmul.mubr.f32.gmra.mrb[82].mxu1 %v1913_v7 }
 0x122   : > { %3406 = vmatpush3.bf16.msra.mxu0 %v3403_v35 }
 0x123   : > { %v1704_v26 = vadd.f32 %v2932_v23, %v2820_v22  ;;  %v1815_v27 = vadd.f32 %v1701_v21, %v647_v16 }
 0x124   : > { %v2933_v30 = vpop.f32.mrb[28].mxu0 }
 0x125   : > { %v2821_v29 = vpop.f32.mrb[28].mxu1  ;;  %v1914_v31 = vmax.f32 %v1815_v27, 0.0  ;;  %v1816_v32 = vadd.f32 %v1704_v26, %v652_v25  ;;  %v2934_v34 = vpop.f32.mrb[29].mxu0 }
 0x126   : > { %v2822_v33 = vpop.f32.mrb[29].mxu1  ;;  %v2935_v38 = vadd.f32 %v2934_v34, %v2933_v30  ;;  %v2936_v46 = vpop.f32.mrb[30].mxu0 }
 0x127   : > { %v2823_v49 = vadd.f32 %v2822_v33, %v2821_v29  ;;  %v2824_v41 = vpop.f32.mrb[30].mxu1  ;;  %3209 = vmatprep.mubr.f32.mxu1 %v1914_v31  ;;  %v1915_v44 = vmax.f32 %v1816_v32, 0.0  ;;  %v2937_v50 = vpop.f32.mrb[31].mxu0 }
 0x128   : > { %v2825_v47 = vpop.f32.mrb[31].mxu1  ;;  %v2938_v43 = vadd.f32 %v2937_v50, %v2936_v46  ;;  %v677_v50 = vadd.f32 %v3978_v36, %v4033_v6 }
 0x129   : > { %v1709_v53 = vadd.f32 %v2935_v38, %v2823_v49  ;;  %v2826_v56 = vadd.f32 %v2825_v47, %v2824_v41  ;;  %3210 = vmatmul.mubr.f32.gmra.mrb[84].mxu1 %v1915_v44 }
 0x12b   : > { %v1712_v62 = vadd.f32 %v2938_v43, %v2826_v56  ;;  %v1817_v1 = vadd.f32 %v1709_v53, %v657_v40  ;;  %v682_v43 = vadd.f32 %v4028_v3, %v3978_v36 }
 0x12c   : > { %v2939_v7 = vpop.f32.mrb[32].mxu0 }
 0x12d   : > { %v2827_v4 = vpop.f32.mrb[32].mxu1  ;;  %v1916_v10 = vmax.f32 %v1817_v1, 0.0  ;;  %v1818_v13 = vadd.f32 %v1712_v62, %v662_v59  ;;  %v2940_v58 = vpop.f32.mrb[33].mxu0 }
 0x12e   : > { %v2828_v16 = vpop.f32.mrb[33].mxu1  ;;  %v2941_v19 = vadd.f32 %v2940_v58, %v2939_v7  ;;  %v2942_v22 = vpop.f32.mrb[34].mxu0 }
 0x12f   : > { %v2829_v37 = vadd.f32 %v2828_v16, %v2827_v4  ;;  %v2830_v21 = vpop.f32.mrb[34].mxu1  ;;  %3212 = vmatprep.mubr.f32.mxu1 %v1916_v10  ;;  %v1917_v23 = vmax.f32 %v1818_v13, 0.0  ;;  %v2943_v25 = vpop.f32.mrb[35].mxu0 }
 0x130   : > { %v2831_v24 = vpop.f32.mrb[35].mxu1  ;;  %v2944_v28 = vadd.f32 %v2943_v25, %v2942_v22 }
 0x131   : > { %v1717_v26 = vadd.f32 %v2941_v19, %v2829_v37  ;;  %v2832_v27 = vadd.f32 %v2831_v24, %v2830_v21  ;;  %3213 = vmatmul.mubr.f32.gmra.mrb[86].mxu1 %v1917_v23  ;;  %v687_v24 = vadd.f32 %v3978_v36, %v4043_v12 }
 0x133   : > { %v1720_v29 = vadd.f32 %v2944_v28, %v2832_v27  ;;  %v1819_v30 = vadd.f32 %v1717_v26, %v667_v55  ;;  %v692_v26 = vadd.f32 %v4038_v9, %v3978_v36 }
 0x134   : > { %v2945_v32 = vpop.f32.mrb[36].mxu0 }
 0x135   : > { %v2833_v31 = vpop.f32.mrb[36].mxu1  ;;  %v1918_v33 = vmax.f32 %v1819_v30, 0.0  ;;  %v1820_v34 = vadd.f32 %v1720_v29, %v672_v52  ;;  %v2946_v49 = vpop.f32.mrb[37].mxu0 }
 0x136   : > { %v2834_v35 = vpop.f32.mrb[37].mxu1  ;;  %v2947_v41 = vadd.f32 %v2946_v49, %v2945_v32  ;;  %v2948_v44 = vpop.f32.mrb[38].mxu0 }
 0x137   : > { %v2835_v38 = vadd.f32 %v2834_v35, %v2833_v31  ;;  %v2836_v46 = vpop.f32.mrb[38].mxu1  ;;  %3215 = vmatprep.mubr.f32.mxu1 %v1918_v33  ;;  %v1919_v0 = vmax.f32 %v1820_v34, 0.0  ;;  %v2949_v47 = vpop.f32.mrb[39].mxu0 }
 0x138   : > { %v2837_v40 = vpop.f32.mrb[39].mxu1  ;;  %v2950_v56 = vadd.f32 %v2949_v47, %v2948_v44  ;;  %v697_v44 = vadd.f32 %v3978_v36, %v4053_v18  ;;  %v702_v47 = vadd.f32 %v4048_v15, %v3978_v36 }
 0x139   : > { %v1725_v61 = vadd.f32 %v2947_v41, %v2835_v38  ;;  %v2838_v53 = vadd.f32 %v2837_v40, %v2836_v46  ;;  %3216 = vmatmul.mubr.f32.gmra.mrb[88].mxu1 %v1919_v0 }
 0x13b   : > { %v1728_v59 = vadd.f32 %v2950_v56, %v2838_v53  ;;  %v1821_v62 = vadd.f32 %v1725_v61, %v677_v50 }
 0x13c   : > { %v2951_v4 = vpop.f32.mrb[40].mxu0 }
 0x13d   : > { %v2839_v1 = vpop.f32.mrb[40].mxu1  ;;  %v1920_v7 = vmax.f32 %v1821_v62, 0.0  ;;  %v1822_v10 = vadd.f32 %v1728_v59, %v682_v43  ;;  %v2952_v16 = vpop.f32.mrb[41].mxu0 }
 0x13e   : > { %v2840_v13 = vpop.f32.mrb[41].mxu1  ;;  %v2953_v37 = vadd.f32 %v2952_v16, %v2951_v4  ;;  %v2954_v21 = vpop.f32.mrb[42].mxu0 }
 0x13f   : > { %v2841_v58 = vadd.f32 %v2840_v13, %v2839_v1  ;;  %v2842_v19 = vpop.f32.mrb[42].mxu1  ;;  %3218 = vmatprep.mubr.f32.mxu1 %v1920_v7  ;;  %v1921_v6 = vmax.f32 %v1822_v10, 0.0  ;;  %v2955_v23 = vpop.f32.mrb[43].mxu0 }
 0x140   : > { %v2843_v22 = vpop.f32.mrb[43].mxu1  ;;  %v2956_v55 = vadd.f32 %v2955_v23, %v2954_v21 }
 0x141   : > { %v1733_v3 = vadd.f32 %v2953_v37, %v2841_v58  ;;  %v2844_v25 = vadd.f32 %v2843_v22, %v2842_v19  ;;  %3219 = vmatmul.mubr.f32.gmra.mrb[90].mxu1 %v1921_v6 }
 0x143   : > { %v1736_v27 = vadd.f32 %v2956_v55, %v2844_v25  ;;  %v1823_v28 = vadd.f32 %v1733_v3, %v687_v24 }
 0x144   : > { %v2957_v29 = vpop.f32.mrb[44].mxu0 }
 0x145   : > { %v2845_v52 = vpop.f32.mrb[44].mxu1  ;;  %v1922_v30 = vmax.f32 %v1823_v28, 0.0  ;;  %v1824_v31 = vadd.f32 %v1736_v27, %v692_v26  ;;  %v2958_v33 = vpop.f32.mrb[45].mxu0 }
 0x146   : > { %v2846_v32 = vpop.f32.mrb[45].mxu1  ;;  %v2959_v35 = vadd.f32 %v2958_v33, %v2957_v29  ;;  %v2960_v38 = vpop.f32.mrb[46].mxu0 }
 0x147   : > { %v2847_v34 = vadd.f32 %v2846_v32, %v2845_v52  ;;  %v2848_v49 = vpop.f32.mrb[46].mxu1  ;;  %3221 = vmatprep.mubr.f32.mxu1 %v1922_v30  ;;  %v1923_v12 = vmax.f32 %v1824_v31, 0.0  ;;  %v2961_v46 = vpop.f32.mrb[47].mxu0 }
 0x148   : > { %v2849_v41 = vpop.f32.mrb[47].mxu1  ;;  %v2962_v40 = vadd.f32 %v2961_v46, %v2960_v38 }
 0x149   : > { %v1741_v9 = vadd.f32 %v2959_v35, %v2847_v34  ;;  %v2850_v0 = vadd.f32 %v2849_v41, %v2848_v49  ;;  %3222 = vmatmul.mubr.f32.gmra.mrb[92].mxu1 %v1923_v12 }
 0x14b   : > { %v1744_v50 = vadd.f32 %v2962_v40, %v2850_v0  ;;  %v1825_v61 = vadd.f32 %v1741_v9, %v697_v44 }
 0x14c   : > { %v2963_v56 = vpop.f32.mrb[48].mxu0 }
 0x14d   : > { %v2851_v53 = vpop.f32.mrb[48].mxu1  ;;  %v1924_v43 = vmax.f32 %v1825_v61, 0.0  ;;  %v1826_v59 = vadd.f32 %v1744_v50, %v702_v47  ;;  %v2964_v1 = vpop.f32.mrb[49].mxu0 }
 0x14e   : > { %v2852_v62 = vpop.f32.mrb[49].mxu1  ;;  %v2965_v7 = vadd.f32 %v2964_v1, %v2963_v56  ;;  %v2966_v13 = vpop.f32.mrb[50].mxu0 }
 0x14f   : > { %v2853_v4 = vadd.f32 %v2852_v62, %v2851_v53  ;;  %v2854_v10 = vpop.f32.mrb[50].mxu1  ;;  %3224 = vmatprep.mubr.f32.mxu1 %v1924_v43  ;;  %v1925_v18 = vmax.f32 %v1826_v59, 0.0  ;;  %v2967_v58 = vpop.f32.mrb[51].mxu0 }
 0x150   : > { %v2855_v16 = vpop.f32.mrb[51].mxu1  ;;  %v2968_v21 = vadd.f32 %v2967_v58, %v2966_v13 }
 0x151   : > { %v1749_v37 = vadd.f32 %v2965_v7, %v2853_v4  ;;  %v2856_v19 = vadd.f32 %v2855_v16, %v2854_v10  ;;  %3225 = vmatmul.mubr.f32.gmra.mrb[94].mxu1 %v1925_v18 }
 0x153   : > { %v1752_v36 = vadd.f32 %v2968_v21, %v2856_v19  ;;  %v1827_v15 = vadd.f32 %v1749_v37, %v3986_v42 }
 0x154   : > { %v2969_v22 = vpop.f32.mrb[52].mxu0 }
 0x155   : > { %v2857_v6 = vpop.f32.mrb[52].mxu1  ;;  %v1926_v23 = vmax.f32 %v1827_v15, 0.0  ;;  %v1828_v24 = vadd.f32 %v1752_v36, %v3983_v39  ;;  %v2970_v25 = vpop.f32.mrb[53].mxu0 }
 0x156   : > { %v2858_v3 = vpop.f32.mrb[53].mxu1  ;;  %v2971_v26 = vadd.f32 %v2970_v25, %v2969_v22  ;;  %v2972_v28 = vpop.f32.mrb[54].mxu0  ;;  %v2237_v22 = vld [vmem:[%s4282_s7 + $0x78] sm:$0xff] }
 0x157   : > { %v2859_v55 = vadd.f32 %v2858_v3, %v2857_v6  ;;  %v2860_v27 = vpop.f32.mrb[54].mxu1  ;;  %3227 = vmatprep.mubr.f32.mxu1 %v1926_v23  ;;  %v1927_v52 = vmax.f32 %v1828_v24, 0.0  ;;  %v2973_v30 = vpop.f32.mrb[55].mxu0 }
 0x158   : > { %v2861_v29 = vpop.f32.mrb[55].mxu1  ;;  %v2974_v33 = vadd.f32 %v2973_v30, %v2972_v28 }
 0x159   : > { %v1757_v31 = vadd.f32 %v2971_v26, %v2859_v55  ;;  %v2862_v32 = vadd.f32 %v2861_v29, %v2860_v27  ;;  %3228 = vmatmul.mubr.f32.gmra.mrb[96].mxu1 %v1927_v52 }
 0x15b   : > { %v1760_v42 = vadd.f32 %v2974_v33, %v2862_v32  ;;  %v1829_v34 = vadd.f32 %v1757_v31, %v3996_v48 }
 0x15c   : > { %v2975_v49 = vpop.f32.mrb[56].mxu0 }
 0x15d   : > { %v2863_v35 = vpop.f32.mrb[56].mxu1  ;;  %v1928_v39 = vmax.f32 %v1829_v34, 0.0  ;;  %v1830_v38 = vadd.f32 %v1760_v42, %v3991_v45  ;;  %v2976_v41 = vpop.f32.mrb[57].mxu0 }
 0x15e   : > { %v2864_v12 = vpop.f32.mrb[57].mxu1  ;;  %v2977_v44 = vadd.f32 %v2976_v41, %v2975_v49  ;;  %v2978_v0 = vpop.f32.mrb[58].mxu0 }
 0x15f   : > { %v2865_v46 = vadd.f32 %v2864_v12, %v2863_v35  ;;  %v2866_v9 = vpop.f32.mrb[58].mxu1  ;;  %3230 = vmatprep.mubr.f32.mxu1 %v1928_v39  ;;  %v1929_v40 = vmax.f32 %v1830_v38, 0.0  ;;  %v2979_v50 = vpop.f32.mrb[59].mxu0 }
 0x160   : > { %v2867_v47 = vpop.f32.mrb[59].mxu1  ;;  %v2980_v56 = vadd.f32 %v2979_v50, %v2978_v0 }
 0x161   : > { %v1765_v61 = vadd.f32 %v2977_v44, %v2865_v46  ;;  %v2868_v53 = vadd.f32 %v2867_v47, %v2866_v9  ;;  %3231 = vmatmul.mubr.f32.gmra.mrb[98].mxu1 %v1929_v40 }
 0x163   : > { %v1768_v48 = vadd.f32 %v2980_v56, %v2868_v53  ;;  %v1831_v43 = vadd.f32 %v1765_v61, %v4006_v54 }
 0x164   : > { %v2981_v62 = vpop.f32.mrb[60].mxu0 }
 0x165   : > { %v2869_v59 = vpop.f32.mrb[60].mxu1  ;;  %v1930_v45 = vmax.f32 %v1831_v43, 0.0  ;;  %v1832_v1 = vadd.f32 %v1768_v48, %v4001_v51  ;;  %v2982_v7 = vpop.f32.mrb[61].mxu0  ;;  %v2236_v51 = vld [vmem:[%s4282_s7 + $0x70] sm:$0xff] }
 0x166   : > { %v2870_v4 = vpop.f32.mrb[61].mxu1  ;;  %v2983_v13 = vadd.f32 %v2982_v7, %v2981_v62  ;;  %v2984_v16 = vpop.f32.mrb[62].mxu0  ;;  %v3407_v55 = vpack.c.bf16 %v2237_v22, %v2236_v51 }
 0x167   : > { %v2871_v10 = vadd.f32 %v2870_v4, %v2869_v59  ;;  %v2872_v18 = vpop.f32.mrb[62].mxu1  ;;  %3233 = vmatprep.mubr.f32.mxu1 %v1930_v45  ;;  %v1931_v58 = vmax.f32 %v1832_v1, 0.0  ;;  %v2985_v19 = vpop.f32.mrb[63].mxu0 }
 0x168   : > { %v2873_v37 = vpop.f32.mrb[63].mxu1  ;;  %v2986_v15 = vadd.f32 %v2985_v19, %v2984_v16  ;;  %3408 = vmatprep.subr.bf16.mxu0 %v3407_v55 }
 0x169   : > { %v1773_v21 = vadd.f32 %v2983_v13, %v2871_v10  ;;  %v2874_v36 = vadd.f32 %v2873_v37, %v2872_v18  ;;  %3234 = vmatmul.mubr.f32.gmra.mrb[100].mxu1 %v1931_v58  ;;  %3410 = vmatpush3.bf16.msra.mxu0 %v3407_v55 }
 0x16b   : > { %v1776_v54 = vadd.f32 %v2986_v15, %v2874_v36  ;;  %v1833_v6 = vadd.f32 %v1773_v21, %v4016_v60 }
 0x16c   : > { %v2987_v24 = vpop.f32.mrb[64].mxu0 }
 0x16d   : > { %v2875_v23 = vpop.f32.mrb[64].mxu1  ;;  %v1932_v3 = vmax.f32 %v1833_v6, 0.0  ;;  %v1834_v25 = vadd.f32 %v1776_v54, %v4011_v57  ;;  %v2988_v27 = vpop.f32.mrb[65].mxu0 }
 0x16e   : > { %v2876_v26 = vpop.f32.mrb[65].mxu1  ;;  %v2989_v52 = vadd.f32 %v2988_v27, %v2987_v24  ;;  %v2990_v60 = vpop.f32.mrb[66].mxu0 }
 0x16f   : > { %v2877_v28 = vadd.f32 %v2876_v26, %v2875_v23  ;;  %v2878_v29 = vpop.f32.mrb[66].mxu1  ;;  %3236 = vmatprep.mubr.f32.mxu1 %v1932_v3  ;;  %v1933_v30 = vmax.f32 %v1834_v25, 0.0  ;;  %v2991_v32 = vpop.f32.mrb[67].mxu0 }
 0x170   : > { %v2879_v31 = vpop.f32.mrb[67].mxu1  ;;  %v2992_v34 = vadd.f32 %v2991_v32, %v2990_v60 }
 0x171   : > { %v1781_v33 = vadd.f32 %v2989_v52, %v2877_v28  ;;  %v2880_v42 = vadd.f32 %v2879_v31, %v2878_v29  ;;  %3237 = vmatmul.mubr.f32.gmra.mrb[102].mxu1 %v1933_v30 }
 0x173   : > { %v1784_v35 = vadd.f32 %v2992_v34, %v2880_v42  ;;  %v1835_v57 = vadd.f32 %v1781_v33, %v4026_v2  ;;  %v4156_v33 = vld [vmem:[%s4281_s6] ss:$0 sm:$0xff] }
 0x174   : > { %v2993_v39 = vpop.f32.mrb[68].mxu0 }
 0x175   : > { %v2881_v49 = vpop.f32.mrb[68].mxu1  ;;  %v1934_v38 = vmax.f32 %v1835_v57, 0.0  ;;  %v1836_v12 = vadd.f32 %v1784_v35, %v4021_v63  ;;  %v2994_v46 = vpop.f32.mrb[69].mxu0 }
 0x176   : > { %v2882_v41 = vpop.f32.mrb[69].mxu1  ;;  %v2995_v9 = vadd.f32 %v2994_v46, %v2993_v39  ;;  %v2996_v40 = vpop.f32.mrb[70].mxu0 }
 0x177   : > { %v2883_v44 = vadd.f32 %v2882_v41, %v2881_v49  ;;  %v2884_v0 = vpop.f32.mrb[70].mxu1  ;;  %3239 = vmatprep.mubr.f32.mxu1 %v1934_v38  ;;  %v1935_v47 = vmax.f32 %v1836_v12, 0.0  ;;  %v2997_v61 = vpop.f32.mrb[71].mxu0 }
 0x178   : > { %v2885_v50 = vpop.f32.mrb[71].mxu1  ;;  %v2998_v48 = vadd.f32 %v2997_v61, %v2996_v40 }
 0x179   : > { %v1789_v53 = vadd.f32 %v2995_v9, %v2883_v44  ;;  %v2886_v56 = vadd.f32 %v2885_v50, %v2884_v0  ;;  %3240 = vmatmul.mubr.f32.gmra.mrb[104].mxu1 %v1935_v47 }
 0x17b   : > { %v1792_v2 = vadd.f32 %v2998_v48, %v2886_v56  ;;  %v1837_v43 = vadd.f32 %v1789_v53, %v4036_v8 }
 0x17c   : > { %v2999_v62 = vpop.f32.mrb[72].mxu0 }
 0x17d   : > { %v2887_v59 = vpop.f32.mrb[72].mxu1  ;;  %v1936_v63 = vmax.f32 %v1837_v43, 0.0  ;;  %v1838_v45 = vadd.f32 %v1792_v2, %v4031_v5  ;;  %v3000_v4 = vpop.f32.mrb[73].mxu0 }
 0x17e   : > { %v2888_v1 = vpop.f32.mrb[73].mxu1  ;;  %v3001_v10 = vadd.f32 %v3000_v4, %v2999_v62  ;;  %v3002_v18 = vpop.f32.mrb[74].mxu0 }
 0x17f   : > { %v2889_v7 = vadd.f32 %v2888_v1, %v2887_v59  ;;  %v2890_v13 = vpop.f32.mrb[74].mxu1  ;;  %3242 = vmatprep.mubr.f32.mxu1 %v1936_v63  ;;  %v1937_v16 = vmax.f32 %v1838_v45, 0.0  ;;  %v3003_v37 = vpop.f32.mrb[75].mxu0 }
 0x180   : > { %v2891_v58 = vpop.f32.mrb[75].mxu1  ;;  %v3004_v36 = vadd.f32 %v3003_v37, %v3002_v18 }
 0x181   : > { %v1797_v19 = vadd.f32 %v3001_v10, %v2889_v7  ;;  %v2892_v21 = vadd.f32 %v2891_v58, %v2890_v13  ;;  %3243 = vmatmul.mubr.f32.gmra.mrb[106].mxu1 %v1937_v16 }
 0x183   : > { %v1800_v8 = vadd.f32 %v3004_v36, %v2892_v21  ;;  %v1839_v15 = vadd.f32 %v1797_v19, %v4046_v14 }
 0x184   : > { %v3005_v6 = vpop.f32.mrb[76].mxu0 }
 0x185   : > { %v2893_v54 = vpop.f32.mrb[76].mxu1  ;;  %v1938_v5 = vmax.f32 %v1839_v15, 0.0  ;;  %v1840_v51 = vadd.f32 %v1800_v8, %v4041_v11  ;;  %v3006_v23 = vpop.f32.mrb[77].mxu0 }
 0x186   : > { %v2894_v22 = vpop.f32.mrb[77].mxu1  ;;  %v3007_v3 = vadd.f32 %v3006_v23, %v3005_v6  ;;  %v3008_v55 = vpop.f32.mrb[78].mxu0 }
 0x187   : > { %v2895_v24 = vadd.f32 %v2894_v22, %v2893_v54  ;;  %v2896_v25 = vpop.f32.mrb[78].mxu1  ;;  %3245 = vmatprep.mubr.f32.mxu1 %v1938_v5  ;;  %v1939_v26 = vmax.f32 %v1840_v51, 0.0  ;;  %v3009_v28 = vpop.f32.mrb[79].mxu0 }
 0x188   : > { %v2897_v27 = vpop.f32.mrb[79].mxu1  ;;  %v3010_v60 = vadd.f32 %v3009_v28, %v3008_v55 }
 0x189   : > { %v1805_v52 = vadd.f32 %v3007_v3, %v2895_v24  ;;  %v2898_v29 = vadd.f32 %v2897_v27, %v2896_v25  ;;  %3246 = vmatmul.mubr.f32.gmra.mrb[108].mxu1 %v1939_v26 }
 0x18b   : > { %v1808_v14 = vadd.f32 %v3010_v60, %v2898_v29  ;;  %v1841_v30 = vadd.f32 %v1805_v52, %v4056_v20 }
 0x18d   : > { %v1940_v31 = vmax.f32 %v1841_v30, 0.0  ;;  %v1842_v11 = vadd.f32 %v1808_v14, %v4051_v17 }
 0x18f   : > { %3248 = vmatprep.mubr.f32.mxu1 %v1940_v31  ;;  %v1941_v32 = vmax.f32 %v1842_v11, 0.0 }
 0x191   : > { %3249 = vmatmul.mubr.f32.gmra.mrb[110].mxu1 %v1941_v32 }
 0x1ec   : > { %v3205_v42 = vpop.f32.mrb[80].mxu1 }
 0x1ed   : > { %v2037_v34 = vadd.f32 %v3205_v42, %v4156_v33  ;;  %v2031_v35 = vpop.f32.mrb[81].mxu1 }
 0x1ee   : > { %v2032_v57 = vadd.f32 %v4156_v33, %v2031_v35 }
 0x1ef   : > { %v2191_v39 = vmax.f32 %v2037_v34, 0.0 }
 0x1f0   : > { %v2190_v49 = vmax.f32 %v2032_v57, 0.0 }
 0x1f2   : > { %3283 = vmatprep.mubr.f32.mxu0 %v2190_v49 }
 0x1f3   : > { %3284 = vmatmul.mubr.f32.vlgmr.msra.gmra.mrb[80].mxu0 %v2191_v39 }
 0x1f4   : > { %v3208_v20 = vpop.f32.mrb[82].mxu1 }
 0x1f5   : > { %v2047_v17 = vadd.f32 %v3208_v20, %v4156_v33  ;;  %v2041_v38 = vpop.f32.mrb[83].mxu1 }
 0x1f6   : > { %v2042_v12 = vadd.f32 %v4156_v33, %v2041_v38 }
 0x1f7   : > { %v2193_v46 = vmax.f32 %v2047_v17, 0.0 }
 0x1f8   : > { %v2192_v41 = vmax.f32 %v2042_v12, 0.0 }
 0x1fa   : > { %3286 = vmatprep.mubr.f32.mxu0 %v2192_v41 }
 0x1fb   : > { %3287 = vmatmul.mubr.f32.gmra.mrb[82].mxu0 %v2193_v46 }
 0x1fc   : > { %v3211_v44 = vpop.f32.mrb[84].mxu1 }
 0x1fd   : > { %v2057_v9 = vadd.f32 %v3211_v44, %v4156_v33  ;;  %v2051_v0 = vpop.f32.mrb[85].mxu1 }
 0x1fe   : > { %v2052_v40 = vadd.f32 %v4156_v33, %v2051_v0 }
 0x1ff   : > { %v2195_v50 = vmax.f32 %v2057_v9, 0.0 }
 0x200   : > { %v2194_v47 = vmax.f32 %v2052_v40, 0.0 }
 0x202   : > { %3289 = vmatprep.mubr.f32.mxu0 %v2194_v47 }
 0x203   : > { %3290 = vmatmul.mubr.f32.gmra.mrb[84].mxu0 %v2195_v50 }
 0x204   : > { %v3214_v61 = vpop.f32.mrb[86].mxu1 }
 0x205   : > { %v2067_v53 = vadd.f32 %v3214_v61, %v4156_v33  ;;  %v2061_v56 = vpop.f32.mrb[87].mxu1 }
 0x206   : > { %v2062_v48 = vadd.f32 %v4156_v33, %v2061_v56 }
 0x207   : > { %v2197_v43 = vmax.f32 %v2067_v53, 0.0 }
 0x208   : > { %v2196_v2 = vmax.f32 %v2062_v48, 0.0 }
 0x20a   : > { %3292 = vmatprep.mubr.f32.mxu0 %v2196_v2 }
 0x20b   : > { %3293 = vmatmul.mubr.f32.gmra.mrb[86].mxu0 %v2197_v43 }
 0x20c   : > { %v3217_v59 = vpop.f32.mrb[88].mxu1 }
 0x20d   : > { %v2077_v62 = vadd.f32 %v3217_v59, %v4156_v33  ;;  %v2071_v63 = vpop.f32.mrb[89].mxu1 }
 0x20e   : > { %v2072_v45 = vadd.f32 %v4156_v33, %v2071_v63 }
 0x20f   : > { %v2199_v4 = vmax.f32 %v2077_v62, 0.0 }
 0x210   : > { %v2198_v1 = vmax.f32 %v2072_v45, 0.0 }
 0x212   : > { %3295 = vmatprep.mubr.f32.mxu0 %v2198_v1 }
 0x213   : > { %3296 = vmatmul.mubr.f32.gmra.mrb[88].mxu0 %v2199_v4 }
 0x214   : > { %v3220_v7 = vpop.f32.mrb[90].mxu1 }
 0x215   : > { %v2087_v10 = vadd.f32 %v3220_v7, %v4156_v33  ;;  %v2081_v13 = vpop.f32.mrb[91].mxu1 }
 0x216   : > { %v2082_v18 = vadd.f32 %v4156_v33, %v2081_v13 }
 0x217   : > { %v2201_v58 = vmax.f32 %v2087_v10, 0.0 }
 0x218   : > { %v2200_v16 = vmax.f32 %v2082_v18, 0.0  ;;  %v4193_v18 = vld [vmem:[%s4283_s8] ss:$0 sm:$0xff] }
 0x21a   : > { %3298 = vmatprep.mubr.f32.mxu0 %v2200_v16 }
 0x21b   : > { %3299 = vmatmul.mubr.f32.gmra.mrb[90].mxu0 %v2201_v58 }
 0x21c   : > { %v3223_v37 = vpop.f32.mrb[92].mxu1 }
 0x21d   : > { %v2097_v19 = vadd.f32 %v3223_v37, %v4156_v33  ;;  %v2091_v21 = vpop.f32.mrb[93].mxu1 }
 0x21e   : > { %v2092_v36 = vadd.f32 %v4156_v33, %v2091_v21 }
 0x21f   : > { %v2203_v15 = vmax.f32 %v2097_v19, 0.0 }
 0x220   : > { %v2202_v8 = vmax.f32 %v2092_v36, 0.0 }
 0x222   : > { %3301 = vmatprep.mubr.f32.mxu0 %v2202_v8 }
 0x223   : > { %3302 = vmatmul.mubr.f32.gmra.mrb[92].mxu0 %v2203_v15 }
 0x224   : > { %v3226_v54 = vpop.f32.mrb[94].mxu1 }
 0x225   : > { %v2107_v6 = vadd.f32 %v3226_v54, %v4156_v33  ;;  %v2101_v5 = vpop.f32.mrb[95].mxu1 }
 0x226   : > { %v2102_v51 = vadd.f32 %v4156_v33, %v2101_v5 }
 0x227   : > { %v2205_v23 = vmax.f32 %v2107_v6, 0.0 }
 0x228   : > { %v2204_v22 = vmax.f32 %v2102_v51, 0.0 }
 0x22a   : > { %3304 = vmatprep.mubr.f32.mxu0 %v2204_v22 }
 0x22b   : > { %3305 = vmatmul.mubr.f32.gmra.mrb[94].mxu0 %v2205_v23 }
 0x22c   : > { %v3229_v24 = vpop.f32.mrb[96].mxu1 }
 0x22d   : > { %v2117_v3 = vadd.f32 %v3229_v24, %v4156_v33  ;;  %v2111_v25 = vpop.f32.mrb[97].mxu1 }
 0x22e   : > { %v2112_v55 = vadd.f32 %v4156_v33, %v2111_v25 }
 0x22f   : > { %v2207_v27 = vmax.f32 %v2117_v3, 0.0 }
 0x230   : > { %v2206_v26 = vmax.f32 %v2112_v55, 0.0 }
 0x232   : > { %3307 = vmatprep.mubr.f32.mxu0 %v2206_v26 }
 0x233   : > { %3308 = vmatmul.mubr.f32.gmra.mrb[96].mxu0 %v2207_v27 }
 0x234   : > { %v3232_v28 = vpop.f32.mrb[98].mxu1 }
 0x235   : > { %v2127_v52 = vadd.f32 %v3232_v28, %v4156_v33  ;;  %v2121_v29 = vpop.f32.mrb[99].mxu1 }
 0x236   : > { %v2122_v60 = vadd.f32 %v4156_v33, %v2121_v29 }
 0x237   : > { %v2209_v30 = vmax.f32 %v2127_v52, 0.0 }
 0x238   : > { %v2208_v14 = vmax.f32 %v2122_v60, 0.0 }
 0x23a   : > { %3310 = vmatprep.mubr.f32.mxu0 %v2208_v14 }
 0x23b   : > { %3311 = vmatmul.mubr.f32.gmra.mrb[98].mxu0 %v2209_v30 }
 0x23c   : > { %v3235_v31 = vpop.f32.mrb[100].mxu1 }
 0x23d   : > { %v2137_v11 = vadd.f32 %v3235_v31, %v4156_v33  ;;  %v2131_v32 = vpop.f32.mrb[101].mxu1 }
 0x23e   : > { %v2132_v42 = vadd.f32 %v4156_v33, %v2131_v32 }
 0x23f   : > { %v2211_v35 = vmax.f32 %v2137_v11, 0.0 }
 0x240   : > { %v2210_v34 = vmax.f32 %v2132_v42, 0.0 }
 0x242   : > { %3313 = vmatprep.mubr.f32.mxu0 %v2210_v34 }
 0x243   : > { %3314 = vmatmul.mubr.f32.gmra.mrb[100].mxu0 %v2211_v35 }
 0x244   : > { %v3238_v57 = vpop.f32.mrb[102].mxu1 }
 0x245   : > { %v2147_v49 = vadd.f32 %v3238_v57, %v4156_v33  ;;  %v2141_v39 = vpop.f32.mrb[103].mxu1 }
 0x246   : > { %v2142_v20 = vadd.f32 %v4156_v33, %v2141_v39 }
 0x247   : > { %v2213_v38 = vmax.f32 %v2147_v49, 0.0 }
 0x248   : > { %v2212_v17 = vmax.f32 %v2142_v20, 0.0 }
 0x24a   : > { %3316 = vmatprep.mubr.f32.mxu0 %v2212_v17 }
 0x24b   : > { %3317 = vmatmul.mubr.f32.gmra.mrb[102].mxu0 %v2213_v38 }
 0x24c   : > { %v3241_v12 = vpop.f32.mrb[104].mxu1 }
 0x24d   : > { %v2157_v41 = vadd.f32 %v3241_v12, %v4156_v33  ;;  %v2151_v46 = vpop.f32.mrb[105].mxu1 }
 0x24e   : > { %v2152_v44 = vadd.f32 %v4156_v33, %v2151_v46 }
 0x24f   : > { %v2215_v0 = vmax.f32 %v2157_v41, 0.0 }
 0x250   : > { %v2214_v9 = vmax.f32 %v2152_v44, 0.0 }
 0x252   : > { %3319 = vmatprep.mubr.f32.mxu0 %v2214_v9 }
 0x253   : > { %3320 = vmatmul.mubr.f32.gmra.mrb[104].mxu0 %v2215_v0 }
 0x254   : > { %v3244_v40 = vpop.f32.mrb[106].mxu1 }
 0x255   : > { %v2167_v47 = vadd.f32 %v3244_v40, %v4156_v33  ;;  %v2161_v50 = vpop.f32.mrb[107].mxu1 }
 0x256   : > { %v2162_v61 = vadd.f32 %v4156_v33, %v2161_v50 }
 0x257   : > { %v2217_v56 = vmax.f32 %v2167_v47, 0.0 }
 0x258   : > { %v2216_v53 = vmax.f32 %v2162_v61, 0.0 }
 0x25a   : > { %3322 = vmatprep.mubr.f32.mxu0 %v2216_v53 }
 0x25b   : > { %3323 = vmatmul.mubr.f32.gmra.mrb[106].mxu0 %v2217_v56 }
 0x25c   : > { %v3247_v48 = vpop.f32.mrb[108].mxu1 }
 0x25d   : > { %v2177_v2 = vadd.f32 %v3247_v48, %v4156_v33  ;;  %v2171_v43 = vpop.f32.mrb[109].mxu1 }
 0x25e   : > { %v2172_v59 = vadd.f32 %v4156_v33, %v2171_v43 }
 0x25f   : > { %v2219_v63 = vmax.f32 %v2177_v2, 0.0 }
 0x260   : > { %v2218_v62 = vmax.f32 %v2172_v59, 0.0 }
 0x262   : > { %3325 = vmatprep.mubr.f32.mxu0 %v2218_v62 }
 0x263   : > { %3326 = vmatmul.mubr.f32.gmra.mrb[108].mxu0 %v2219_v63 }
 0x264   : > { %v3250_v45 = vpop.f32.mrb[110].mxu1 }
 0x265   : > { %v2187_v1 = vadd.f32 %v3250_v45, %v4156_v33  ;;  %v2181_v4 = vpop.f32.mrb[111].mxu1 }
 0x266   : > { %v2182_v7 = vadd.f32 %v4156_v33, %v2181_v4 }
 0x267   : > { %v2221_v13 = vmax.f32 %v2187_v1, 0.0 }
 0x268   : > { %v2220_v10 = vmax.f32 %v2182_v7, 0.0 }
 0x26a   : > { %3328 = vmatprep.mubr.f32.mxu0 %v2220_v10 }
 0x26b   : > { %3329 = vmatmul.mubr.f32.gmra.mrb[110].mxu0 %v2221_v13 }
 0x2c6   : > { %v3285_v33 = vpop.f32.mrb[80].mxu0 }
 0x2c7   : > { %v2317_v16 = vadd.f32 %v3285_v33, %v4193_v18  ;;  %v2311_v58 = vpop.f32.mrb[81].mxu0 }
 0x2c8   : > { %v2312_v37 = vadd.f32 %v4193_v18, %v2311_v58 }
 0x2c9   : > { %2471 = vst [vmem:[%s4200_s18 + $0x8] sm:$0xff] %v2317_v16 }
 0x2ca   : > { %2470 = vst [vmem:[%s4200_s18] sm:$0xff] %v2312_v37 }
 0x2ce   : > { %v3288_v19 = vpop.f32.mrb[82].mxu0 }
 0x2cf   : > { %v2327_v21 = vadd.f32 %v3288_v19, %v4193_v18  ;;  %v2321_v36 = vpop.f32.mrb[83].mxu0 }
 0x2d0   : > { %v2322_v8 = vadd.f32 %v4193_v18, %v2321_v36 }
 0x2d1   : > { %2473 = vst [vmem:[%s4200_s18 + $0x18] sm:$0xff] %v2327_v21 }
 0x2d2   : > { %2472 = vst [vmem:[%s4200_s18 + $0x10] sm:$0xff] %v2322_v8 }
 0x2d6   : > { %v3291_v15 = vpop.f32.mrb[84].mxu0 }
 0x2d7   : > { %v2337_v54 = vadd.f32 %v3291_v15, %v4193_v18  ;;  %v2331_v6 = vpop.f32.mrb[85].mxu0 }
 0x2d8   : > { %v2332_v5 = vadd.f32 %v4193_v18, %v2331_v6 }
 0x2d9   : > { %2475 = vst [vmem:[%s4200_s18 + $0x28] sm:$0xff] %v2337_v54 }
 0x2da   : > { %2474 = vst [vmem:[%s4200_s18 + $0x20] sm:$0xff] %v2332_v5 }
 0x2de   : > { %v3294_v51 = vpop.f32.mrb[86].mxu0 }
 0x2df   : > { %v2347_v22 = vadd.f32 %v3294_v51, %v4193_v18  ;;  %v2341_v23 = vpop.f32.mrb[87].mxu0 }
 0x2e0   : > { %v2342_v24 = vadd.f32 %v4193_v18, %v2341_v23 }
 0x2e1   : > { %2477 = vst [vmem:[%s4200_s18 + $0x38] sm:$0xff] %v2347_v22 }
 0x2e2   : > { %2476 = vst [vmem:[%s4200_s18 + $0x30] sm:$0xff] %v2342_v24 }
 0x2e6   : > { %v3297_v3 = vpop.f32.mrb[88].mxu0 }
 0x2e7   : > { %v2357_v25 = vadd.f32 %v3297_v3, %v4193_v18  ;;  %v2351_v55 = vpop.f32.mrb[89].mxu0 }
 0x2e8   : > { %v2352_v26 = vadd.f32 %v4193_v18, %v2351_v55 }
 0x2e9   : > { %2479 = vst [vmem:[%s4200_s18 + $0x48] sm:$0xff] %v2357_v25 }
 0x2ea   : > { %2478 = vst [vmem:[%s4200_s18 + $0x40] sm:$0xff] %v2352_v26 }
 0x2ee   : > { %v3300_v27 = vpop.f32.mrb[90].mxu0 }
 0x2ef   : > { %v2367_v28 = vadd.f32 %v3300_v27, %v4193_v18  ;;  %v2361_v52 = vpop.f32.mrb[91].mxu0 }
 0x2f0   : > { %v2362_v29 = vadd.f32 %v4193_v18, %v2361_v52 }
 0x2f1   : > { %2481 = vst [vmem:[%s4200_s18 + $0x58] sm:$0xff] %v2367_v28 }
 0x2f2   : > { %2480 = vst [vmem:[%s4200_s18 + $0x50] sm:$0xff] %v2362_v29 }
 0x2f6   : > { %v3303_v60 = vpop.f32.mrb[92].mxu0 }
 0x2f7   : > { %v2377_v14 = vadd.f32 %v3303_v60, %v4193_v18  ;;  %v2371_v30 = vpop.f32.mrb[93].mxu0 }
 0x2f8   : > { %v2372_v31 = vadd.f32 %v4193_v18, %v2371_v30 }
 0x2f9   : > { %2483 = vst [vmem:[%s4200_s18 + $0x68] sm:$0xff] %v2377_v14 }
 0x2fa   : > { %2482 = vst [vmem:[%s4200_s18 + $0x60] sm:$0xff] %v2372_v31 }
 0x2fe   : > { %v3306_v11 = vpop.f32.mrb[94].mxu0 }
 0x2ff   : > { %v2387_v32 = vadd.f32 %v3306_v11, %v4193_v18  ;;  %v2381_v42 = vpop.f32.mrb[95].mxu0 }
 0x300   : > { %v2382_v34 = vadd.f32 %v4193_v18, %v2381_v42 }
 0x301   : > { %2485 = vst [vmem:[%s4200_s18 + $0x78] sm:$0xff] %v2387_v32 }
 0x302   : > { %2484 = vst [vmem:[%s4200_s18 + $0x70] sm:$0xff] %v2382_v34 }
 0x306   : > { %v3309_v35 = vpop.f32.mrb[96].mxu0 }
 0x307   : > { %v2397_v57 = vadd.f32 %v3309_v35, %v4193_v18  ;;  %v2391_v49 = vpop.f32.mrb[97].mxu0 }
 0x308   : > { %v2392_v39 = vadd.f32 %v4193_v18, %v2391_v49 }
 0x309   : > { %2487 = vst [vmem:[%s4200_s18 + $0x88] sm:$0xff] %v2397_v57 }
 0x30a   : > { %2486 = vst [vmem:[%s4200_s18 + $0x80] sm:$0xff] %v2392_v39 }
 0x30e   : > { %v3312_v20 = vpop.f32.mrb[98].mxu0 }
 0x30f   : > { %v2407_v17 = vadd.f32 %v3312_v20, %v4193_v18  ;;  %v2401_v38 = vpop.f32.mrb[99].mxu0 }
 0x310   : > { %v2402_v12 = vadd.f32 %v4193_v18, %v2401_v38 }
 0x311   : > { %2489 = vst [vmem:[%s4200_s18 + $0x98] sm:$0xff] %v2407_v17 }
 0x312   : > { %2488 = vst [vmem:[%s4200_s18 + $0x90] sm:$0xff] %v2402_v12 }
 0x316   : > { %v3315_v41 = vpop.f32.mrb[100].mxu0 }
 0x317   : > { %v2417_v46 = vadd.f32 %v3315_v41, %v4193_v18  ;;  %v2411_v44 = vpop.f32.mrb[101].mxu0 }
 0x318   : > { %v2412_v9 = vadd.f32 %v4193_v18, %v2411_v44 }
 0x319   : > { %2491 = vst [vmem:[%s4200_s18 + $0xa8] sm:$0xff] %v2417_v46 }
 0x31a   : > { %2490 = vst [vmem:[%s4200_s18 + $0xa0] sm:$0xff] %v2412_v9 }
 0x31e   : > { %v3318_v0 = vpop.f32.mrb[102].mxu0 }
 0x31f   : > { %v2427_v40 = vadd.f32 %v3318_v0, %v4193_v18  ;;  %v2421_v47 = vpop.f32.mrb[103].mxu0 }
 0x320   : > { %v2422_v50 = vadd.f32 %v4193_v18, %v2421_v47 }
 0x321   : > { %2493 = vst [vmem:[%s4200_s18 + $0xb8] sm:$0xff] %v2427_v40 }
 0x322   : > { %2492 = vst [vmem:[%s4200_s18 + $0xb0] sm:$0xff] %v2422_v50 }
 0x326   : > { %v3321_v61 = vpop.f32.mrb[104].mxu0 }
 0x327   : > { %v2437_v53 = vadd.f32 %v3321_v61, %v4193_v18  ;;  %v2431_v56 = vpop.f32.mrb[105].mxu0 }
 0x328   : > { %v2432_v48 = vadd.f32 %v4193_v18, %v2431_v56 }
 0x329   : > { %2495 = vst [vmem:[%s4200_s18 + $0xc8] sm:$0xff] %v2437_v53 }
 0x32a   : > { %2494 = vst [vmem:[%s4200_s18 + $0xc0] sm:$0xff] %v2432_v48 }
 0x32e   : > { %v3324_v2 = vpop.f32.mrb[106].mxu0 }
 0x32f   : > { %v2447_v43 = vadd.f32 %v3324_v2, %v4193_v18  ;;  %v2441_v59 = vpop.f32.mrb[107].mxu0 }
 0x330   : > { %v2442_v62 = vadd.f32 %v4193_v18, %v2441_v59 }
 0x331   : > { %2497 = vst [vmem:[%s4200_s18 + $0xd8] sm:$0xff] %v2447_v43 }
 0x332   : > { %2496 = vst [vmem:[%s4200_s18 + $0xd0] sm:$0xff] %v2442_v62 }
 0x336   : > { %v3327_v63 = vpop.f32.mrb[108].mxu0 }
 0x337   : > { %v2457_v45 = vadd.f32 %v3327_v63, %v4193_v18  ;;  %v2451_v1 = vpop.f32.mrb[109].mxu0 }
 0x338   : > { %v2452_v4 = vadd.f32 %v4193_v18, %v2451_v1 }
 0x339   : > { %2499 = vst [vmem:[%s4200_s18 + $0xe8] sm:$0xff] %v2457_v45 }
 0x33a   : > { %2498 = vst [vmem:[%s4200_s18 + $0xe0] sm:$0xff] %v2452_v4 }
 0x33e   : > { %v3330_v7 = vpop.f32.mrb[110].mxu0 }
 0x33f   : > { %v2467_v10 = vadd.f32 %v3330_v7, %v4193_v18  ;;  %v2461_v13 = vpop.f32.mrb[111].mxu0 }
 0x340   : > { %v2462_v33 = vadd.f32 %v4193_v18, %v2461_v13 }
 0x341   : > { %2501 = vst [vmem:[%s4200_s18 + $0xf8] sm:$0xff] %v2467_v10 }
 0x342   : > { %2500 = vst [vmem:[%s4200_s18 + $0xf0] sm:$0xff] %v2462_v33 }
 0x343 PF: > { %s19_s11 = sadd.s32 1, %s3593_s11   ;;  %s4285_s30 = smov %s3589_s10 }
 0x344   : > { %p16_p5 = scmp.ge.s32.totalorder %s19_s11, 4   ;;  %s4286_s10 = smov %s4288_s12 }
 0x346   :  { %18 = sbr.rel (!%p16_p5) target bundleno = 2 (0x2), region = 100 }

// kernel: mlpnorm_forward.8
= control target key start
LH: loop header
LB: loop body
LE: loop exit
PB: predicated region body
PF: predicated region fallthrough
CT: control target
= control target key end

     0   :  { %s1995_s15 = smov 0   ;;  %s1997_s16 = smov 0   ;;  %s2411_s0 = inlined_call_operand.vmem [shape: bf16[512,512], index: 0, kind: input, shape index: {}]   ;;  %s2412_s1 = inlined_call_operand.vmem [shape: f32[512,128], index: 1, kind: input, shape index: {}, may-alias: {1,2}]   ;;  %s2413_s2 = inlined_call_operand.vmem [shape: f32[512,128], index: 2, kind: input, shape index: {}, may-alias: {1,2}]   ;;  %s2414_s3 = inlined_call_operand.vmem [shape: f32[512,128], index: 3, kind: output, shape index: {0}]   ;;  %s2415_s4 = inlined_call_operand.vmem [shape: f32[512,128], index: 4, kind: output, shape index: {1}]  }
   0x1   :  { %s1999_s17 = smov 0  }
   0x2 LB: > { %s27_s18 = sadd.s32 1, %s1964_s16  ;;  %p1525_p0 = scmp.ge.s32.totalorder %s1968_s17, 1  ;;  %s1968_s17 = sphi %s1999_s17, %s15_s17   ;;  %s1964_s16 = sphi %s1997_s16, %s2418_s16   ;;  %s1960_s15 = sphi %s1995_s15, %s2417_s15  }
   0x3   : > { %p29_p1 = scmp.ge.s32.totalorder %s27_s18, 2  ;;  %p208_p2 = scmp.lt.s32.totalorder %s1968_s17, 3 }
   0x5   : > { %s2420_s18 = smov (%p29_p1, %s27_s18), 0  ;;  %p209_p3 = pnand %p1525_p0, %p208_p2 }
   0x6   : > { %v439_v0 = vld [vmem:[%s2412_s1 + $0x80] sm:$0xff] (!%p209_p3)  ;;  %v440_v1 = vld [vmem:[%s2412_s1 + $0x88] sm:$0xff] (!%p209_p3)  ;;  %v441_v11 = vld [vmem:[%s2412_s1 + $0x90] sm:$0xff] (!%p209_p3)  ;;  %s1526_s7 = sshll.u32 (!%p209_p3), %s1960_s15, 5 }
   0x7   : > { %212 = sbr.rel (%p209_p3) target bundleno = 385 (0x181), region = 32  ;;  %v471_v2 = vld [vmem:[%s2412_s1 + $0x180] sm:$0xff] (!%p209_p3)  ;;  %v495_v3 = vpack.c.bf16 (!%p209_p3), %v440_v1, %v439_v0  ;;  %v472_v4 = vld [vmem:[%s2412_s1 + $0x188] sm:$0xff] (!%p209_p3)  ;;  %v442_v13 = vld [vmem:[%s2412_s1 + $0x98] sm:$0xff] (!%p209_p3)  ;;  %p2099_p4 = scmp.lt.s32.totalorder (!%p209_p3), %s1526_s7, 63 }
   0x8   : > { %v423_v5 = vld [vmem:[%s2412_s1] sm:$0xff] (!%p209_p3)  ;;  %v424_v6 = vld [vmem:[%s2412_s1 + $0x8] sm:$0xff] (!%p209_p3)  ;;  %v511_v7 = vpack.c.bf16 (!%p209_p3), %v472_v4, %v471_v2  ;;  %v473_v14 = vld [vmem:[%s2412_s1 + $0x190] sm:$0xff] (!%p209_p3)  ;;  %v496_v16 = vpack.c.bf16 (!%p209_p3), %v442_v13, %v441_v11 }
   0x9   : > { %v487_v8 = vpack.c.bf16 (!%p209_p3), %v424_v6, %v423_v5  ;;  %v455_v9 = vld [vmem:[%s2412_s1 + $0x100] sm:$0xff] (!%p209_p3)  ;;  %v456_v10 = vld [vmem:[%s2412_s1 + $0x108] sm:$0xff] (!%p209_p3)  ;;  %1602 = vmatprep.subr.bf16.mxu0 (!%p209_p3), %v495_v3  ;;  %v474_v15 = vld [vmem:[%s2412_s1 + $0x198] sm:$0xff] (!%p209_p3) }
   0xa   : > { %v503_v12 = vpack.c.bf16 (!%p209_p3), %v456_v10, %v455_v9  ;;  %1714 = vmatprep.subr.bf16.mxu1 (!%p209_p3), %v511_v7  ;;  %v512_v17 = vpack.c.bf16 (!%p209_p3), %v474_v15, %v473_v14  ;;  %v425_v18 = vld [vmem:[%s2412_s1 + $0x10] sm:$0xff] (!%p209_p3)  ;;  %v426_v19 = vld [vmem:[%s2412_s1 + $0x18] sm:$0xff] (!%p209_p3)  ;;  %v443_v23 = vld [vmem:[%s2412_s1 + $0xa0] sm:$0xff] (!%p209_p3) }
   0xb   : > { %1603 = vmatpush3.bf16.msra.mxu0 (!%p209_p3), %v487_v8  ;;  %v457_v20 = vld [vmem:[%s2412_s1 + $0x110] sm:$0xff] (!%p209_p3)  ;;  %v488_v21 = vpack.c.bf16 (!%p209_p3), %v426_v19, %v425_v18  ;;  %v458_v22 = vld [vmem:[%s2412_s1 + $0x118] sm:$0xff] (!%p209_p3)  ;;  %v444_v24 = vld [vmem:[%s2412_s1 + $0xa8] sm:$0xff] (!%p209_p3) }
   0xc   : > { %1715 = vmatpush3.bf16.msra.mxu1 (!%p209_p3), %v503_v12  ;;  %1604 = vmatprep.subr.bf16.mxu0 (!%p209_p3), %v496_v16  ;;  %v504_v25 = vpack.c.bf16 (!%p209_p3), %v458_v22, %v457_v20  ;;  %v497_v26 = vpack.c.bf16 (!%p209_p3), %v444_v24, %v443_v23  ;;  %v475_v27 = vld [vmem:[%s2412_s1 + $0x1a0] sm:$0xff] (!%p209_p3)  ;;  %v476_v28 = vld [vmem:[%s2412_s1 + $0x1a8] sm:$0xff] (!%p209_p3)  ;;  %v445_v35 = vld [vmem:[%s2412_s1 + $0xb0] sm:$0xff] (!%p209_p3) }
   0xd   : > { %1716 = vmatprep.subr.bf16.mxu1 (!%p209_p3), %v512_v17  ;;  %v427_v29 = vld [vmem:[%s2412_s1 + $0x20] sm:$0xff] (!%p209_p3)  ;;  %v513_v30 = vpack.c.bf16 (!%p209_p3), %v476_v28, %v475_v27  ;;  %v428_v31 = vld [vmem:[%s2412_s1 + $0x28] sm:$0xff] (!%p209_p3)  ;;  %v446_v36 = vld [vmem:[%s2412_s1 + $0xb8] sm:$0xff] (!%p209_p3) }
   0xe   : > { %v459_v32 = vld [vmem:[%s2412_s1 + $0x120] sm:$0xff]  ;;  %v460_v33 = vld [vmem:[%s2412_s1 + $0x128] sm:$0xff]  ;;  %v489_v34 = vpack.c.bf16 %v428_v31, %v427_v29  ;;  %v477_v37 = vld [vmem:[%s2412_s1 + $0x1b0] sm:$0xff]  ;;  %v498_v39 = vpack.c.bf16 %v446_v36, %v445_v35  ;;  %s2422_s7 = smov (!%p2099_p4, %s1526_s7), 63 }
   0xf   : > { %1605 = vmatpush3.bf16.msra.mxu0 %v488_v21  ;;  %v505_v38 = vpack.c.bf16 %v460_v33, %v459_v32  ;;  %v478_v40 = vld [vmem:[%s2412_s1 + $0x1b8] sm:$0xff]  ;;  %v429_v41 = vld [vmem:[%s2412_s1 + $0x30] sm:$0xff]  ;;  %v447_v46 = vld [vmem:[%s2412_s1 + $0xc0] sm:$0xff]  ;;  %s1601_s24 = sshll.u32 %s2422_s7, 4  ;;  %s1530_s22 = sshll.u32 %s2422_s7, 3 }
  0x10   : > { %1717 = vmatpush3.bf16.msra.mxu1 %v504_v25  ;;  %1606 = vmatprep.subr.bf16.mxu0 %v497_v26  ;;  %v430_v42 = vld [vmem:[%s2412_s1 + $0x38] sm:$0xff]  ;;  %v514_v43 = vpack.c.bf16 %v478_v40, %v477_v37  ;;  %v461_v44 = vld [vmem:[%s2412_s1 + $0x130] sm:$0xff]  ;;  %v448_v47 = vld [vmem:[%s2412_s1 + $0xc8] sm:$0xff]  ;;  %s2194_s23 = scalar_lea.vmem %s2411_s0, %s1601_s24  ;;  %s2294_s27 = scalar_lea.vmem %s2413_s2, %s1530_s22 }
  0x11   : > { %1718 = vmatprep.subr.bf16.mxu1 %v513_v30  ;;  %v462_v45 = vld [vmem:[%s2412_s1 + $0x138] sm:$0xff]  ;;  %v479_v48 = vld [vmem:[%s2412_s1 + $0x1c0] sm:$0xff]  ;;  %v480_v49 = vld [vmem:[%s2412_s1 + $0x1c8] sm:$0xff]  ;;  %v490_v50 = vpack.c.bf16 %v430_v42, %v429_v41  ;;  %v499_v52 = vpack.c.bf16 %v448_v47, %v447_v46  ;;  %s2299_s7 = scalar_lea.vmem %s2414_s3, %s1530_s22  ;;  %s2305_s24 = scalar_lea.vmem %s2415_s4, %s1530_s22 }
  0x12   : > { %v506_v51 = vpack.c.bf16 %v462_v45, %v461_v44  ;;  %v431_v53 = vld [vmem:[%s2412_s1 + $0x40] sm:$0xff]  ;;  %v432_v54 = vld [vmem:[%s2412_s1 + $0x48] sm:$0xff]  ;;  %v515_v56 = vpack.c.bf16 %v480_v49, %v479_v48  ;;  %v449_v58 = vld [vmem:[%s2412_s1 + $0xd0] sm:$0xff] }
  0x13   : > { %1607 = vmatpush3.bf16.msra.mxu0 %v489_v34  ;;  %v463_v55 = vld [vmem:[%s2412_s1 + $0x140] sm:$0xff]  ;;  %v464_v57 = vld [vmem:[%s2412_s1 + $0x148] sm:$0xff]  ;;  %v450_v59 = vld [vmem:[%s2412_s1 + $0xd8] sm:$0xff]  ;;  %v491_v62 = vpack.c.bf16 %v432_v54, %v431_v53 }
  0x14   : > { %1719 = vmatpush3.bf16.msra.mxu1 %v505_v38  ;;  %1608 = vmatprep.subr.bf16.mxu0 %v498_v39  ;;  %v481_v60 = vld [vmem:[%s2412_s1 + $0x1d0] sm:$0xff]  ;;  %v482_v61 = vld [vmem:[%s2412_s1 + $0x1d8] sm:$0xff]  ;;  %v507_v0 = vpack.c.bf16 %v464_v57, %v463_v55  ;;  %v500_v1 = vpack.c.bf16 %v450_v59, %v449_v58  ;;  %v451_v6 = vld [vmem:[%s2412_s1 + $0xe0] sm:$0xff] }
  0x15   : > { %1720 = vmatprep.subr.bf16.mxu1 %v514_v43  ;;  %v433_v63 = vld [vmem:[%s2412_s1 + $0x50] sm:$0xff]  ;;  %v434_v2 = vld [vmem:[%s2412_s1 + $0x58] sm:$0xff]  ;;  %v516_v5 = vpack.c.bf16 %v482_v61, %v481_v60  ;;  %v452_v7 = vld [vmem:[%s2412_s1 + $0xe8] sm:$0xff] }
  0x16   : > { %v465_v3 = vld [vmem:[%s2412_s1 + $0x150] sm:$0xff]  ;;  %v466_v4 = vld [vmem:[%s2412_s1 + $0x158] sm:$0xff]  ;;  %v483_v8 = vld [vmem:[%s2412_s1 + $0x1e0] sm:$0xff]  ;;  %v492_v12 = vpack.c.bf16 %v434_v2, %v433_v63  ;;  %v501_v17 = vpack.c.bf16 %v452_v7, %v451_v6 }
  0x17   : > { %1609 = vmatpush3.bf16.msra.mxu0 %v490_v50  ;;  %v484_v9 = vld [vmem:[%s2412_s1 + $0x1e8] sm:$0xff]  ;;  %v435_v10 = vld [vmem:[%s2412_s1 + $0x60] sm:$0xff]  ;;  %v453_v15 = vld [vmem:[%s2412_s1 + $0xf0] sm:$0xff]  ;;  %v508_v16 = vpack.c.bf16 %v466_v4, %v465_v3 }
  0x18   : > { %1721 = vmatpush3.bf16.msra.mxu1 %v506_v51  ;;  %1610 = vmatprep.subr.bf16.mxu0 %v499_v52  ;;  %v436_v11 = vld [vmem:[%s2412_s1 + $0x68] sm:$0xff]  ;;  %v467_v13 = vld [vmem:[%s2412_s1 + $0x160] sm:$0xff]  ;;  %v454_v18 = vld [vmem:[%s2412_s1 + $0xf8] sm:$0xff]  ;;  %v517_v19 = vpack.c.bf16 %v484_v9, %v483_v8 }
  0x19   : > { %1722 = vmatprep.subr.bf16.mxu1 %v515_v56  ;;  %v468_v14 = vld [vmem:[%s2412_s1 + $0x168] sm:$0xff]  ;;  %v485_v20 = vld [vmem:[%s2412_s1 + $0x1f0] sm:$0xff]  ;;  %v486_v22 = vld [vmem:[%s2412_s1 + $0x1f8] sm:$0xff]  ;;  %v493_v24 = vpack.c.bf16 %v436_v11, %v435_v10  ;;  %v502_v27 = vpack.c.bf16 %v454_v18, %v453_v15 }
  0x1a   : > { %v1852_v21 = vld [vmem:[%s2194_s23 + $0x4] ss:$16 sps:$4 sm:$0xff]   ;;  %v1855_v23 = vld [vmem:[%s2194_s23 + $0xc] ss:$16 sps:$4 sm:$0xff]   ;;  %v509_v26 = vpack.c.bf16 %v468_v14, %v467_v13  ;;  %v518_v29 = vpack.c.bf16 %v486_v22, %v485_v20  ;;  %v1850_v34 = vld [vmem:[%s2194_s23] ss:$16 sps:$4 sm:$0xff]  }
  0x1b   : > { %1611 = vmatpush3.bf16.msra.mxu0 %v491_v62  ;;  %v437_v25 = vld [vmem:[%s2412_s1 + $0x70] sm:$0xff]  ;;  %871 = vmatprep.mubr.bf16.mxu0 %v1852_v21  ;;  %v438_v28 = vld [vmem:[%s2412_s1 + $0x78] sm:$0xff] }
  0x1c   : > { %1723 = vmatpush3.bf16.msra.mxu1 %v507_v0  ;;  %1612 = vmatprep.subr.bf16.mxu0 %v500_v1  ;;  %v469_v30 = vld [vmem:[%s2412_s1 + $0x170] sm:$0xff]  ;;  %v470_v31 = vld [vmem:[%s2412_s1 + $0x178] sm:$0xff]  ;;  %v494_v32 = vpack.c.bf16 %v438_v28, %v437_v25 }
  0x1d   : > { %1724 = vmatprep.subr.bf16.mxu1 %v516_v5  ;;  %1032 = vmatprep.mubr.bf16.mxu1 %v1855_v23  ;;  %v510_v33 = vpack.c.bf16 %v470_v31, %v469_v30  ;;  %v1853_v35 = vld [vmem:[%s2194_s23 + $0x8] ss:$16 sps:$4 sm:$0xff]   ;;  %v1856_v36 = vld [vmem:[%s2194_s23 + $0x24] ss:$16 sps:$4 sm:$0xff]   ;;  %v1858_v37 = vld [vmem:[%s2194_s23 + $0x2c] ss:$16 sps:$4 sm:$0xff]  }
  0x1e   : > { %v1860_v38 = vld [vmem:[%s2194_s23 + $0x20] ss:$16 sps:$4 sm:$0xff]   ;;  %v1861_v39 = vld [vmem:[%s2194_s23 + $0x28] ss:$16 sps:$4 sm:$0xff]   ;;  %v1862_v40 = vld [vmem:[%s2194_s23 + $0x44] ss:$16 sps:$4 sm:$0xff]  }
  0x1f   : > { %1613 = vmatpush3.bf16.msra.mxu0 %v492_v12  ;;  %v1864_v41 = vld [vmem:[%s2194_s23 + $0x4c] ss:$16 sps:$4 sm:$0xff]   ;;  %v1866_v42 = vld [vmem:[%s2194_s23 + $0x40] ss:$16 sps:$4 sm:$0xff]   ;;  %v1867_v43 = vld [vmem:[%s2194_s23 + $0x48] ss:$16 sps:$4 sm:$0xff]  }
  0x20   : > { %1725 = vmatpush3.bf16.msra.mxu1 %v508_v16  ;;  %1614 = vmatprep.subr.bf16.mxu0 %v501_v17  ;;  %v1868_v44 = vld [vmem:[%s2194_s23 + $0x64] ss:$16 sps:$4 sm:$0xff]   ;;  %v1870_v45 = vld [vmem:[%s2194_s23 + $0x6c] ss:$16 sps:$4 sm:$0xff]   ;;  %v1872_v46 = vld [vmem:[%s2194_s23 + $0x60] ss:$16 sps:$4 sm:$0xff]  }
  0x21   : > { %1726 = vmatprep.subr.bf16.mxu1 %v517_v19  ;;  %v1873_v47 = vld [vmem:[%s2194_s23 + $0x68] ss:$16 sps:$4 sm:$0xff]   ;;  %v1874_v48 = vld [vmem:[%s2194_s23 + $0x84] ss:$16 sps:$4 sm:$0xff]   ;;  %v1876_v49 = vld [vmem:[%s2194_s23 + $0x8c] ss:$16 sps:$4 sm:$0xff]  }
  0x22   : > { %v1878_v50 = vld [vmem:[%s2194_s23 + $0x80] ss:$16 sps:$4 sm:$0xff]   ;;  %v1879_v51 = vld [vmem:[%s2194_s23 + $0x88] ss:$16 sps:$4 sm:$0xff]   ;;  %v1880_v52 = vld [vmem:[%s2194_s23 + $0xa4] ss:$16 sps:$4 sm:$0xff]  }
  0x23   : > { %1615 = vmatpush3.bf16.msra.mxu0 %v493_v24  ;;  %v1882_v53 = vld [vmem:[%s2194_s23 + $0xac] ss:$16 sps:$4 sm:$0xff]   ;;  %v1884_v54 = vld [vmem:[%s2194_s23 + $0xa0] ss:$16 sps:$4 sm:$0xff]   ;;  %v1885_v55 = vld [vmem:[%s2194_s23 + $0xa8] ss:$16 sps:$4 sm:$0xff]  }
  0x24   : > { %1727 = vmatpush3.bf16.msra.mxu1 %v509_v26  ;;  %1616 = vmatprep.subr.bf16.mxu0 %v502_v27  ;;  %v1886_v56 = vld [vmem:[%s2194_s23 + $0xc4] ss:$16 sps:$4 sm:$0xff]   ;;  %v1888_v57 = vld [vmem:[%s2194_s23 + $0xcc] ss:$16 sps:$4 sm:$0xff]   ;;  %v1890_v58 = vld [vmem:[%s2194_s23 + $0xc0] ss:$16 sps:$4 sm:$0xff]  }
  0x25   : > { %1728 = vmatprep.subr.bf16.mxu1 %v518_v29  ;;  %v1891_v59 = vld [vmem:[%s2194_s23 + $0xc8] ss:$16 sps:$4 sm:$0xff]   ;;  %v1892_v60 = vld [vmem:[%s2194_s23 + $0xe4] ss:$16 sps:$4 sm:$0xff]   ;;  %v1894_v61 = vld [vmem:[%s2194_s23 + $0xec] ss:$16 sps:$4 sm:$0xff]  }
  0x26   : > { %v1896_v62 = vld [vmem:[%s2194_s23 + $0xe0] ss:$16 sps:$4 sm:$0xff]   ;;  %v1897_v63 = vld [vmem:[%s2194_s23 + $0xe8] ss:$16 sps:$4 sm:$0xff]   ;;  %v1898_v0 = vld [vmem:[%s2194_s23 + $0x104] ss:$16 sps:$4 sm:$0xff]  }
  0x27   : > { %1617 = vmatpush3.bf16.msra.mxu0 %v494_v32  ;;  %v1900_v1 = vld [vmem:[%s2194_s23 + $0x10c] ss:$16 sps:$4 sm:$0xff]   ;;  %v1902_v2 = vld [vmem:[%s2194_s23 + $0x100] ss:$16 sps:$4 sm:$0xff]   ;;  %v1903_v3 = vld [vmem:[%s2194_s23 + $0x108] ss:$16 sps:$4 sm:$0xff]  }
  0x28   : > { %1729 = vmatpush3.bf16.msra.mxu1 %v510_v33  ;;  %v1904_v4 = vld [vmem:[%s2194_s23 + $0x124] ss:$16 sps:$4 sm:$0xff]   ;;  %v1906_v5 = vld [vmem:[%s2194_s23 + $0x12c] ss:$16 sps:$4 sm:$0xff]   ;;  %v1908_v6 = vld [vmem:[%s2194_s23 + $0x120] ss:$16 sps:$4 sm:$0xff]  }
  0x29   : > { %v1909_v7 = vld [vmem:[%s2194_s23 + $0x128] ss:$16 sps:$4 sm:$0xff]   ;;  %v1910_v8 = vld [vmem:[%s2194_s23 + $0x144] ss:$16 sps:$4 sm:$0xff]   ;;  %v1912_v9 = vld [vmem:[%s2194_s23 + $0x14c] ss:$16 sps:$4 sm:$0xff]  }
  0x2a   : > { %872 = vmatmul.mubr.bf16.vlgmr.msra.gmra.mrb[0].mxu0 %v1850_v34  ;;  %v1914_v10 = vld [vmem:[%s2194_s23 + $0x140] ss:$16 sps:$4 sm:$0xff]   ;;  %v1915_v11 = vld [vmem:[%s2194_s23 + $0x148] ss:$16 sps:$4 sm:$0xff]   ;;  %v1916_v12 = vld [vmem:[%s2194_s23 + $0x164] ss:$16 sps:$4 sm:$0xff]  }
  0x2b   : > { %1033 = vmatmul.mubr.bf16.vlgmr.msra.gmra.mrb[0].mxu1 %v1853_v35  ;;  %879 = vmatprep.mubr.bf16.mxu0 %v1856_v36  ;;  %v1918_v13 = vld [vmem:[%s2194_s23 + $0x16c] ss:$16 sps:$4 sm:$0xff]   ;;  %v1920_v14 = vld [vmem:[%s2194_s23 + $0x160] ss:$16 sps:$4 sm:$0xff]   ;;  %v1921_v15 = vld [vmem:[%s2194_s23 + $0x168] ss:$16 sps:$4 sm:$0xff]  }
  0x2c   : > { %1040 = vmatprep.mubr.bf16.mxu1 %v1858_v37  ;;  %v1922_v16 = vld [vmem:[%s2194_s23 + $0x184] ss:$16 sps:$4 sm:$0xff]   ;;  %v1924_v17 = vld [vmem:[%s2194_s23 + $0x18c] ss:$16 sps:$4 sm:$0xff]   ;;  %v1926_v18 = vld [vmem:[%s2194_s23 + $0x180] ss:$16 sps:$4 sm:$0xff]  }
  0x2d   : > { %v1927_v19 = vld [vmem:[%s2194_s23 + $0x188] ss:$16 sps:$4 sm:$0xff]   ;;  %v1928_v20 = vld [vmem:[%s2194_s23 + $0x1a4] ss:$16 sps:$4 sm:$0xff]   ;;  %v1930_v21 = vld [vmem:[%s2194_s23 + $0x1ac] ss:$16 sps:$4 sm:$0xff]  }
  0x2e   : > { %v1932_v22 = vld [vmem:[%s2194_s23 + $0x1a0] ss:$16 sps:$4 sm:$0xff]   ;;  %v1933_v23 = vld [vmem:[%s2194_s23 + $0x1a8] ss:$16 sps:$4 sm:$0xff]   ;;  %v1934_v24 = vld [vmem:[%s2194_s23 + $0x1c4] ss:$16 sps:$4 sm:$0xff]  }
  0x2f   : > { %v1936_v25 = vld [vmem:[%s2194_s23 + $0x1cc] ss:$16 sps:$4 sm:$0xff]   ;;  %v1938_v26 = vld [vmem:[%s2194_s23 + $0x1c0] ss:$16 sps:$4 sm:$0xff]   ;;  %v1939_v27 = vld [vmem:[%s2194_s23 + $0x1c8] ss:$16 sps:$4 sm:$0xff]  }
  0x30   : > { %v1940_v28 = vld [vmem:[%s2194_s23 + $0x1e4] ss:$16 sps:$4 sm:$0xff]   ;;  %v1942_v29 = vld [vmem:[%s2194_s23 + $0x1ec] ss:$16 sps:$4 sm:$0xff]   ;;  %v1944_v30 = vld [vmem:[%s2194_s23 + $0x1e0] ss:$16 sps:$4 sm:$0xff]  }
  0x31   : > { %v1945_v31 = vld [vmem:[%s2194_s23 + $0x1e8] ss:$16 sps:$4 sm:$0xff]  }
  0x32   : > { %880 = vmatmul.mubr.bf16.gmra.mrb[4].mxu0 %v1860_v38 }
  0x33   : > { %1041 = vmatmul.mubr.bf16.gmra.mrb[4].mxu1 %v1861_v39  ;;  %887 = vmatprep.mubr.bf16.mxu0 %v1862_v40 }
  0x34   : > { %1048 = vmatprep.mubr.bf16.mxu1 %v1864_v41  ;;  %v1292_v41 = vld [vmem:[%s2294_s27] sm:$0xff] }
  0x3a   : > { %888 = vmatmul.mubr.bf16.gmra.mrb[8].mxu0 %v1866_v42 }
  0x3b   : > { %1049 = vmatmul.mubr.bf16.gmra.mrb[8].mxu1 %v1867_v43  ;;  %895 = vmatprep.mubr.bf16.mxu0 %v1868_v44 }
  0x3c   : > { %1056 = vmatprep.mubr.bf16.mxu1 %v1870_v45 }
  0x42   : > { %896 = vmatmul.mubr.bf16.gmra.mrb[12].mxu0 %v1872_v46  ;;  %v1293_v46 = vld [vmem:[%s2294_s27 + $0x8] sm:$0xff] }
  0x43   : > { %1057 = vmatmul.mubr.bf16.gmra.mrb[12].mxu1 %v1873_v47  ;;  %903 = vmatprep.mubr.bf16.mxu0 %v1874_v48 }
  0x44   : > { %1064 = vmatprep.mubr.bf16.mxu1 %v1876_v49 }
  0x4a   : > { %904 = vmatmul.mubr.bf16.gmra.mrb[16].mxu0 %v1878_v50 }
  0x4b   : > { %1065 = vmatmul.mubr.bf16.gmra.mrb[16].mxu1 %v1879_v51  ;;  %911 = vmatprep.mubr.bf16.mxu0 %v1880_v52 }
  0x4c   : > { %1072 = vmatprep.mubr.bf16.mxu1 %v1882_v53 }
  0x52   : > { %912 = vmatmul.mubr.bf16.gmra.mrb[20].mxu0 %v1884_v54 }
  0x53   : > { %1073 = vmatmul.mubr.bf16.gmra.mrb[20].mxu1 %v1885_v55  ;;  %919 = vmatprep.mubr.bf16.mxu0 %v1886_v56 }
  0x54   : > { %1080 = vmatprep.mubr.bf16.mxu1 %v1888_v57 }
  0x5a   : > { %920 = vmatmul.mubr.bf16.gmra.mrb[24].mxu0 %v1890_v58 }
  0x5b   : > { %1081 = vmatmul.mubr.bf16.gmra.mrb[24].mxu1 %v1891_v59  ;;  %927 = vmatprep.mubr.bf16.mxu0 %v1892_v60  ;;  %v1294_v59 = vld [vmem:[%s2294_s27 + $0x10] sm:$0xff] }
  0x5c   : > { %1088 = vmatprep.mubr.bf16.mxu1 %v1894_v61 }
  0x62   : > { %928 = vmatmul.mubr.bf16.gmra.mrb[28].mxu0 %v1896_v62 }
  0x63   : > { %1089 = vmatmul.mubr.bf16.gmra.mrb[28].mxu1 %v1897_v63  ;;  %935 = vmatprep.mubr.bf16.mxu0 %v1898_v0  ;;  %v1295_v0 = vld [vmem:[%s2294_s27 + $0x18] sm:$0xff] }
  0x64   : > { %1096 = vmatprep.mubr.bf16.mxu1 %v1900_v1 }
  0x6a   : > { %936 = vmatmul.mubr.bf16.gmra.mrb[32].mxu0 %v1902_v2 }
  0x6b   : > { %1097 = vmatmul.mubr.bf16.gmra.mrb[32].mxu1 %v1903_v3  ;;  %943 = vmatprep.mubr.bf16.mxu0 %v1904_v4 }
  0x6c   : > { %1104 = vmatprep.mubr.bf16.mxu1 %v1906_v5 }
  0x72   : > { %944 = vmatmul.mubr.bf16.gmra.mrb[36].mxu0 %v1908_v6 }
  0x73   : > { %1105 = vmatmul.mubr.bf16.gmra.mrb[36].mxu1 %v1909_v7  ;;  %951 = vmatprep.mubr.bf16.mxu0 %v1910_v8 }
  0x74   : > { %1112 = vmatprep.mubr.bf16.mxu1 %v1912_v9 }
  0x7a   : > { %952 = vmatmul.mubr.bf16.gmra.mrb[40].mxu0 %v1914_v10 }
  0x7b   : > { %1113 = vmatmul.mubr.bf16.gmra.mrb[40].mxu1 %v1915_v11  ;;  %959 = vmatprep.mubr.bf16.mxu0 %v1916_v12 }
  0x7c   : > { %1120 = vmatprep.mubr.bf16.mxu1 %v1918_v13  ;;  %v1296_v13 = vld [vmem:[%s2294_s27 + $0x20] sm:$0xff] }
  0x82   : > { %960 = vmatmul.mubr.bf16.gmra.mrb[44].mxu0 %v1920_v14 }
  0x83   : > { %1121 = vmatmul.mubr.bf16.gmra.mrb[44].mxu1 %v1921_v15  ;;  %967 = vmatprep.mubr.bf16.mxu0 %v1922_v16 }
  0x84   : > { %1128 = vmatprep.mubr.bf16.mxu1 %v1924_v17 }
  0x8a   : > { %968 = vmatmul.mubr.bf16.gmra.mrb[48].mxu0 %v1926_v18  ;;  %v1297_v18 = vld [vmem:[%s2294_s27 + $0x28] sm:$0xff] }
  0x8b   : > { %1129 = vmatmul.mubr.bf16.gmra.mrb[48].mxu1 %v1927_v19  ;;  %975 = vmatprep.mubr.bf16.mxu0 %v1928_v20 }
  0x8c   : > { %1136 = vmatprep.mubr.bf16.mxu1 %v1930_v21 }
  0x92   : > { %976 = vmatmul.mubr.bf16.gmra.mrb[52].mxu0 %v1932_v22 }
  0x93   : > { %1137 = vmatmul.mubr.bf16.gmra.mrb[52].mxu1 %v1933_v23  ;;  %983 = vmatprep.mubr.bf16.mxu0 %v1934_v24 }
  0x94   : > { %1144 = vmatprep.mubr.bf16.mxu1 %v1936_v25 }
  0x9a   : > { %984 = vmatmul.mubr.bf16.gmra.mrb[56].mxu0 %v1938_v26 }
  0x9b   : > { %1145 = vmatmul.mubr.bf16.gmra.mrb[56].mxu1 %v1939_v27  ;;  %991 = vmatprep.mubr.bf16.mxu0 %v1940_v28 }
  0x9c   : > { %1152 = vmatprep.mubr.bf16.mxu1 %v1942_v29 }
  0xa2   : > { %992 = vmatmul.mubr.bf16.gmra.mrb[60].mxu0 %v1944_v30 }
  0xa3   : > { %1153 = vmatmul.mubr.bf16.gmra.mrb[60].mxu1 %v1945_v31  ;;  %v1298_v31 = vld [vmem:[%s2294_s27 + $0x30] sm:$0xff] }
  0xfd   : > { %v1618_v32 = vpop.f32.mrb[0].mxu0 }
  0xfe   : > { %v1730_v33 = vpop.f32.mrb[0].mxu1  ;;  %v1619_v34 = vpop.f32.mrb[1].mxu0 }
  0xff   : > { %v1620_v35 = vadd.f32 %v1619_v34, %v1618_v32  ;;  %v1731_v36 = vpop.f32.mrb[1].mxu1  ;;  %v1621_v37 = vpop.f32.mrb[2].mxu0 }
 0x100   : > { %v1732_v38 = vadd.f32 %v1731_v36, %v1730_v33  ;;  %v1733_v39 = vpop.f32.mrb[2].mxu1  ;;  %v1622_v40 = vpop.f32.mrb[3].mxu0  ;;  %v1299_v36 = vld [vmem:[%s2294_s27 + $0x38] sm:$0xff] }
 0x101   : > { %v1623_v42 = vadd.f32 %v1622_v40, %v1621_v37  ;;  %v1734_v43 = vpop.f32.mrb[3].mxu1 }
 0x102   : > { %v1035_v44 = vadd.f32 %v1732_v38, %v1620_v35  ;;  %v1735_v45 = vadd.f32 %v1734_v43, %v1733_v39 }
 0x104   : > { %1260 = vst [vmem:[%s2299_s7] sm:$0xff] %v1035_v44  ;;  %v1324_v47 = vadd.f32 %v1292_v41, %v1035_v44  ;;  %v1038_v48 = vadd.f32 %v1735_v45, %v1623_v42 }
 0x105   : > { %v1624_v49 = vpop.f32.mrb[4].mxu0 }
 0x106   : > { %1356 = vst [vmem:[%s2305_s24] sm:$0xff] %v1324_v47  ;;  %1261 = vst [vmem:[%s2299_s7 + $0x8] sm:$0xff] %v1038_v48  ;;  %v1325_v50 = vadd.f32 %v1293_v46, %v1038_v48  ;;  %v1736_v51 = vpop.f32.mrb[4].mxu1  ;;  %v1625_v52 = vpop.f32.mrb[5].mxu0 }
 0x107   : > { %v1626_v53 = vadd.f32 %v1625_v52, %v1624_v49  ;;  %v1737_v54 = vpop.f32.mrb[5].mxu1  ;;  %v1627_v55 = vpop.f32.mrb[6].mxu0  ;;  %v1300_v49 = vld [vmem:[%s2294_s27 + $0x40] sm:$0xff] }
 0x108   : > { %1357 = vst [vmem:[%s2305_s24 + $0x8] sm:$0xff] %v1325_v50  ;;  %v1738_v56 = vadd.f32 %v1737_v54, %v1736_v51  ;;  %v1739_v57 = vpop.f32.mrb[6].mxu1  ;;  %v1628_v58 = vpop.f32.mrb[7].mxu0  ;;  %v1301_v54 = vld [vmem:[%s2294_s27 + $0x48] sm:$0xff] }
 0x109   : > { %v1629_v60 = vadd.f32 %v1628_v58, %v1627_v55  ;;  %v1740_v61 = vpop.f32.mrb[7].mxu1 }
 0x10a   : > { %v1043_v62 = vadd.f32 %v1738_v56, %v1626_v53  ;;  %v1741_v63 = vadd.f32 %v1740_v61, %v1739_v57 }
 0x10c   : > { %1262 = vst [vmem:[%s2299_s7 + $0x10] sm:$0xff] %v1043_v62  ;;  %v1326_v1 = vadd.f32 %v1294_v59, %v1043_v62  ;;  %v1046_v2 = vadd.f32 %v1741_v63, %v1629_v60 }
 0x10d   : > { %v1630_v3 = vpop.f32.mrb[8].mxu0 }
 0x10e   : > { %1358 = vst [vmem:[%s2305_s24 + $0x10] sm:$0xff] %v1326_v1  ;;  %1263 = vst [vmem:[%s2299_s7 + $0x18] sm:$0xff] %v1046_v2  ;;  %v1327_v4 = vadd.f32 %v1295_v0, %v1046_v2  ;;  %v1742_v5 = vpop.f32.mrb[8].mxu1  ;;  %v1631_v6 = vpop.f32.mrb[9].mxu0 }
 0x10f   : > { %v1632_v7 = vadd.f32 %v1631_v6, %v1630_v3  ;;  %v1743_v8 = vpop.f32.mrb[9].mxu1  ;;  %v1633_v9 = vpop.f32.mrb[10].mxu0  ;;  %v1302_v3 = vld [vmem:[%s2294_s27 + $0x50] sm:$0xff] }
 0x110   : > { %1359 = vst [vmem:[%s2305_s24 + $0x18] sm:$0xff] %v1327_v4  ;;  %v1744_v10 = vadd.f32 %v1743_v8, %v1742_v5  ;;  %v1745_v11 = vpop.f32.mrb[10].mxu1  ;;  %v1634_v12 = vpop.f32.mrb[11].mxu0  ;;  %v1303_v8 = vld [vmem:[%s2294_s27 + $0x58] sm:$0xff] }
 0x111   : > { %v1635_v14 = vadd.f32 %v1634_v12, %v1633_v9  ;;  %v1746_v15 = vpop.f32.mrb[11].mxu1 }
 0x112   : > { %v1051_v16 = vadd.f32 %v1744_v10, %v1632_v7  ;;  %v1747_v17 = vadd.f32 %v1746_v15, %v1745_v11 }
 0x114   : > { %1264 = vst [vmem:[%s2299_s7 + $0x20] sm:$0xff] %v1051_v16  ;;  %v1328_v19 = vadd.f32 %v1296_v13, %v1051_v16  ;;  %v1054_v20 = vadd.f32 %v1747_v17, %v1635_v14 }
 0x115   : > { %v1636_v21 = vpop.f32.mrb[12].mxu0 }
 0x116   : > { %1360 = vst [vmem:[%s2305_s24 + $0x20] sm:$0xff] %v1328_v19  ;;  %1265 = vst [vmem:[%s2299_s7 + $0x28] sm:$0xff] %v1054_v20  ;;  %v1329_v22 = vadd.f32 %v1297_v18, %v1054_v20  ;;  %v1748_v23 = vpop.f32.mrb[12].mxu1  ;;  %v1637_v24 = vpop.f32.mrb[13].mxu0 }
 0x117   : > { %v1638_v25 = vadd.f32 %v1637_v24, %v1636_v21  ;;  %v1749_v26 = vpop.f32.mrb[13].mxu1  ;;  %v1639_v27 = vpop.f32.mrb[14].mxu0  ;;  %v1304_v21 = vld [vmem:[%s2294_s27 + $0x60] sm:$0xff] }
 0x118   : > { %1361 = vst [vmem:[%s2305_s24 + $0x28] sm:$0xff] %v1329_v22  ;;  %v1750_v28 = vadd.f32 %v1749_v26, %v1748_v23  ;;  %v1751_v29 = vpop.f32.mrb[14].mxu1  ;;  %v1640_v30 = vpop.f32.mrb[15].mxu0  ;;  %v1305_v26 = vld [vmem:[%s2294_s27 + $0x68] sm:$0xff] }
 0x119   : > { %v1641_v32 = vadd.f32 %v1640_v30, %v1639_v27  ;;  %v1752_v33 = vpop.f32.mrb[15].mxu1 }
 0x11a   : > { %v1059_v34 = vadd.f32 %v1750_v28, %v1638_v25  ;;  %v1753_v35 = vadd.f32 %v1752_v33, %v1751_v29 }
 0x11c   : > { %1266 = vst [vmem:[%s2299_s7 + $0x30] sm:$0xff] %v1059_v34  ;;  %v1330_v37 = vadd.f32 %v1298_v31, %v1059_v34  ;;  %v1062_v38 = vadd.f32 %v1753_v35, %v1641_v32 }
 0x11d   : > { %v1642_v39 = vpop.f32.mrb[16].mxu0 }
 0x11e   : > { %1362 = vst [vmem:[%s2305_s24 + $0x30] sm:$0xff] %v1330_v37  ;;  %1267 = vst [vmem:[%s2299_s7 + $0x38] sm:$0xff] %v1062_v38  ;;  %v1331_v40 = vadd.f32 %v1299_v36, %v1062_v38  ;;  %v1754_v41 = vpop.f32.mrb[16].mxu1  ;;  %v1643_v42 = vpop.f32.mrb[17].mxu0 }
 0x11f   : > { %v1644_v43 = vadd.f32 %v1643_v42, %v1642_v39  ;;  %v1755_v44 = vpop.f32.mrb[17].mxu1  ;;  %v1645_v45 = vpop.f32.mrb[18].mxu0  ;;  %v1306_v39 = vld [vmem:[%s2294_s27 + $0x70] sm:$0xff] }
 0x120   : > { %1363 = vst [vmem:[%s2305_s24 + $0x38] sm:$0xff] %v1331_v40  ;;  %v1756_v46 = vadd.f32 %v1755_v44, %v1754_v41  ;;  %v1757_v47 = vpop.f32.mrb[18].mxu1  ;;  %v1646_v48 = vpop.f32.mrb[19].mxu0  ;;  %v1307_v44 = vld [vmem:[%s2294_s27 + $0x78] sm:$0xff] }
 0x121   : > { %v1647_v50 = vadd.f32 %v1646_v48, %v1645_v45  ;;  %v1758_v51 = vpop.f32.mrb[19].mxu1 }
 0x122   : > { %v1067_v52 = vadd.f32 %v1756_v46, %v1644_v43  ;;  %v1759_v53 = vadd.f32 %v1758_v51, %v1757_v47 }
 0x124   : > { %1268 = vst [vmem:[%s2299_s7 + $0x40] sm:$0xff] %v1067_v52  ;;  %v1332_v55 = vadd.f32 %v1300_v49, %v1067_v52  ;;  %v1070_v56 = vadd.f32 %v1759_v53, %v1647_v50 }
 0x125   : > { %v1648_v57 = vpop.f32.mrb[20].mxu0 }
 0x126   : > { %1364 = vst [vmem:[%s2305_s24 + $0x40] sm:$0xff] %v1332_v55  ;;  %1269 = vst [vmem:[%s2299_s7 + $0x48] sm:$0xff] %v1070_v56  ;;  %v1333_v58 = vadd.f32 %v1301_v54, %v1070_v56  ;;  %v1760_v59 = vpop.f32.mrb[20].mxu1  ;;  %v1649_v60 = vpop.f32.mrb[21].mxu0 }
 0x127   : > { %v1650_v61 = vadd.f32 %v1649_v60, %v1648_v57  ;;  %v1761_v62 = vpop.f32.mrb[21].mxu1  ;;  %v1651_v63 = vpop.f32.mrb[22].mxu0  ;;  %v1308_v57 = vld [vmem:[%s2294_s27 + $0x80] sm:$0xff] }
 0x128   : > { %1365 = vst [vmem:[%s2305_s24 + $0x48] sm:$0xff] %v1333_v58  ;;  %v1762_v0 = vadd.f32 %v1761_v62, %v1760_v59  ;;  %v1763_v1 = vpop.f32.mrb[22].mxu1  ;;  %v1652_v2 = vpop.f32.mrb[23].mxu0  ;;  %v1309_v62 = vld [vmem:[%s2294_s27 + $0x88] sm:$0xff] }
 0x129   : > { %v1653_v4 = vadd.f32 %v1652_v2, %v1651_v63  ;;  %v1764_v5 = vpop.f32.mrb[23].mxu1 }
 0x12a   : > { %v1075_v6 = vadd.f32 %v1762_v0, %v1650_v61  ;;  %v1765_v7 = vadd.f32 %v1764_v5, %v1763_v1 }
 0x12c   : > { %1270 = vst [vmem:[%s2299_s7 + $0x50] sm:$0xff] %v1075_v6  ;;  %v1334_v9 = vadd.f32 %v1302_v3, %v1075_v6  ;;  %v1078_v10 = vadd.f32 %v1765_v7, %v1653_v4 }
 0x12d   : > { %v1654_v11 = vpop.f32.mrb[24].mxu0 }
 0x12e   : > { %1366 = vst [vmem:[%s2305_s24 + $0x50] sm:$0xff] %v1334_v9  ;;  %1271 = vst [vmem:[%s2299_s7 + $0x58] sm:$0xff] %v1078_v10  ;;  %v1335_v12 = vadd.f32 %v1303_v8, %v1078_v10  ;;  %v1766_v13 = vpop.f32.mrb[24].mxu1  ;;  %v1655_v14 = vpop.f32.mrb[25].mxu0 }
 0x12f   : > { %v1656_v15 = vadd.f32 %v1655_v14, %v1654_v11  ;;  %v1767_v16 = vpop.f32.mrb[25].mxu1  ;;  %v1657_v17 = vpop.f32.mrb[26].mxu0  ;;  %v1310_v11 = vld [vmem:[%s2294_s27 + $0x90] sm:$0xff] }
 0x130   : > { %1367 = vst [vmem:[%s2305_s24 + $0x58] sm:$0xff] %v1335_v12  ;;  %v1768_v18 = vadd.f32 %v1767_v16, %v1766_v13  ;;  %v1769_v19 = vpop.f32.mrb[26].mxu1  ;;  %v1658_v20 = vpop.f32.mrb[27].mxu0  ;;  %v1311_v16 = vld [vmem:[%s2294_s27 + $0x98] sm:$0xff] }
 0x131   : > { %v1659_v22 = vadd.f32 %v1658_v20, %v1657_v17  ;;  %v1770_v23 = vpop.f32.mrb[27].mxu1 }
 0x132   : > { %v1083_v24 = vadd.f32 %v1768_v18, %v1656_v15  ;;  %v1771_v25 = vadd.f32 %v1770_v23, %v1769_v19 }
 0x134   : > { %1272 = vst [vmem:[%s2299_s7 + $0x60] sm:$0xff] %v1083_v24  ;;  %v1336_v27 = vadd.f32 %v1304_v21, %v1083_v24  ;;  %v1086_v28 = vadd.f32 %v1771_v25, %v1659_v22 }
 0x135   : > { %v1660_v29 = vpop.f32.mrb[28].mxu0 }
 0x136   : > { %1368 = vst [vmem:[%s2305_s24 + $0x60] sm:$0xff] %v1336_v27  ;;  %1273 = vst [vmem:[%s2299_s7 + $0x68] sm:$0xff] %v1086_v28  ;;  %v1337_v30 = vadd.f32 %v1305_v26, %v1086_v28  ;;  %v1772_v31 = vpop.f32.mrb[28].mxu1  ;;  %v1661_v32 = vpop.f32.mrb[29].mxu0 }
 0x137   : > { %v1662_v33 = vadd.f32 %v1661_v32, %v1660_v29  ;;  %v1773_v34 = vpop.f32.mrb[29].mxu1  ;;  %v1663_v35 = vpop.f32.mrb[30].mxu0  ;;  %v1312_v29 = vld [vmem:[%s2294_s27 + $0xa0] sm:$0xff] }
 0x138   : > { %1369 = vst [vmem:[%s2305_s24 + $0x68] sm:$0xff] %v1337_v30  ;;  %v1774_v36 = vadd.f32 %v1773_v34, %v1772_v31  ;;  %v1775_v37 = vpop.f32.mrb[30].mxu1  ;;  %v1664_v38 = vpop.f32.mrb[31].mxu0  ;;  %v1313_v34 = vld [vmem:[%s2294_s27 + $0xa8] sm:$0xff] }
 0x139   : > { %v1665_v40 = vadd.f32 %v1664_v38, %v1663_v35  ;;  %v1776_v41 = vpop.f32.mrb[31].mxu1 }
 0x13a   : > { %v1091_v42 = vadd.f32 %v1774_v36, %v1662_v33  ;;  %v1777_v43 = vadd.f32 %v1776_v41, %v1775_v37 }
 0x13c   : > { %1274 = vst [vmem:[%s2299_s7 + $0x70] sm:$0xff] %v1091_v42  ;;  %v1338_v45 = vadd.f32 %v1306_v39, %v1091_v42  ;;  %v1094_v46 = vadd.f32 %v1777_v43, %v1665_v40 }
 0x13d   : > { %v1666_v47 = vpop.f32.mrb[32].mxu0 }
 0x13e   : > { %1370 = vst [vmem:[%s2305_s24 + $0x70] sm:$0xff] %v1338_v45  ;;  %1275 = vst [vmem:[%s2299_s7 + $0x78] sm:$0xff] %v1094_v46  ;;  %v1339_v48 = vadd.f32 %v1307_v44, %v1094_v46  ;;  %v1778_v49 = vpop.f32.mrb[32].mxu1  ;;  %v1667_v50 = vpop.f32.mrb[33].mxu0 }
 0x13f   : > { %v1668_v51 = vadd.f32 %v1667_v50, %v1666_v47  ;;  %v1779_v52 = vpop.f32.mrb[33].mxu1  ;;  %v1669_v53 = vpop.f32.mrb[34].mxu0  ;;  %v1314_v47 = vld [vmem:[%s2294_s27 + $0xb0] sm:$0xff] }
 0x140   : > { %1371 = vst [vmem:[%s2305_s24 + $0x78] sm:$0xff] %v1339_v48  ;;  %v1780_v54 = vadd.f32 %v1779_v52, %v1778_v49  ;;  %v1781_v55 = vpop.f32.mrb[34].mxu1  ;;  %v1670_v56 = vpop.f32.mrb[35].mxu0  ;;  %v1315_v52 = vld [vmem:[%s2294_s27 + $0xb8] sm:$0xff] }
 0x141   : > { %v1671_v58 = vadd.f32 %v1670_v56, %v1669_v53  ;;  %v1782_v59 = vpop.f32.mrb[35].mxu1 }
 0x142   : > { %v1099_v60 = vadd.f32 %v1780_v54, %v1668_v51  ;;  %v1783_v61 = vadd.f32 %v1782_v59, %v1781_v55 }
 0x144   : > { %1276 = vst [vmem:[%s2299_s7 + $0x80] sm:$0xff] %v1099_v60  ;;  %v1340_v63 = vadd.f32 %v1308_v57, %v1099_v60  ;;  %v1102_v0 = vadd.f32 %v1783_v61, %v1671_v58 }
 0x145   : > { %v1672_v1 = vpop.f32.mrb[36].mxu0 }
 0x146   : > { %1372 = vst [vmem:[%s2305_s24 + $0x80] sm:$0xff] %v1340_v63  ;;  %1277 = vst [vmem:[%s2299_s7 + $0x88] sm:$0xff] %v1102_v0  ;;  %v1341_v2 = vadd.f32 %v1309_v62, %v1102_v0  ;;  %v1784_v3 = vpop.f32.mrb[36].mxu1  ;;  %v1673_v4 = vpop.f32.mrb[37].mxu0 }
 0x147   : > { %v1674_v5 = vadd.f32 %v1673_v4, %v1672_v1  ;;  %v1785_v6 = vpop.f32.mrb[37].mxu1  ;;  %v1675_v7 = vpop.f32.mrb[38].mxu0  ;;  %v1316_v1 = vld [vmem:[%s2294_s27 + $0xc0] sm:$0xff] }
 0x148   : > { %1373 = vst [vmem:[%s2305_s24 + $0x88] sm:$0xff] %v1341_v2  ;;  %v1786_v8 = vadd.f32 %v1785_v6, %v1784_v3  ;;  %v1787_v9 = vpop.f32.mrb[38].mxu1  ;;  %v1676_v10 = vpop.f32.mrb[39].mxu0  ;;  %v1317_v6 = vld [vmem:[%s2294_s27 + $0xc8] sm:$0xff] }
 0x149   : > { %v1677_v12 = vadd.f32 %v1676_v10, %v1675_v7  ;;  %v1788_v13 = vpop.f32.mrb[39].mxu1 }
 0x14a   : > { %v1107_v14 = vadd.f32 %v1786_v8, %v1674_v5  ;;  %v1789_v15 = vadd.f32 %v1788_v13, %v1787_v9 }
 0x14c   : > { %1278 = vst [vmem:[%s2299_s7 + $0x90] sm:$0xff] %v1107_v14  ;;  %v1342_v17 = vadd.f32 %v1310_v11, %v1107_v14  ;;  %v1110_v18 = vadd.f32 %v1789_v15, %v1677_v12 }
 0x14d   : > { %v1678_v19 = vpop.f32.mrb[40].mxu0 }
 0x14e   : > { %1374 = vst [vmem:[%s2305_s24 + $0x90] sm:$0xff] %v1342_v17  ;;  %1279 = vst [vmem:[%s2299_s7 + $0x98] sm:$0xff] %v1110_v18  ;;  %v1343_v20 = vadd.f32 %v1311_v16, %v1110_v18  ;;  %v1790_v21 = vpop.f32.mrb[40].mxu1  ;;  %v1679_v22 = vpop.f32.mrb[41].mxu0 }
 0x14f   : > { %v1680_v23 = vadd.f32 %v1679_v22, %v1678_v19  ;;  %v1791_v24 = vpop.f32.mrb[41].mxu1  ;;  %v1681_v25 = vpop.f32.mrb[42].mxu0  ;;  %v1318_v19 = vld [vmem:[%s2294_s27 + $0xd0] sm:$0xff] }
 0x150   : > { %1375 = vst [vmem:[%s2305_s24 + $0x98] sm:$0xff] %v1343_v20  ;;  %v1792_v26 = vadd.f32 %v1791_v24, %v1790_v21  ;;  %v1793_v27 = vpop.f32.mrb[42].mxu1  ;;  %v1682_v28 = vpop.f32.mrb[43].mxu0  ;;  %v1319_v24 = vld [vmem:[%s2294_s27 + $0xd8] sm:$0xff] }
 0x151   : > { %v1683_v30 = vadd.f32 %v1682_v28, %v1681_v25  ;;  %v1794_v31 = vpop.f32.mrb[43].mxu1 }
 0x152   : > { %v1115_v32 = vadd.f32 %v1792_v26, %v1680_v23  ;;  %v1795_v33 = vadd.f32 %v1794_v31, %v1793_v27 }
 0x154   : > { %1280 = vst [vmem:[%s2299_s7 + $0xa0] sm:$0xff] %v1115_v32  ;;  %v1344_v35 = vadd.f32 %v1312_v29, %v1115_v32  ;;  %v1118_v36 = vadd.f32 %v1795_v33, %v1683_v30 }
 0x155   : > { %v1684_v37 = vpop.f32.mrb[44].mxu0 }
 0x156   : > { %1376 = vst [vmem:[%s2305_s24 + $0xa0] sm:$0xff] %v1344_v35  ;;  %1281 = vst [vmem:[%s2299_s7 + $0xa8] sm:$0xff] %v1118_v36  ;;  %v1345_v38 = vadd.f32 %v1313_v34, %v1118_v36  ;;  %v1796_v39 = vpop.f32.mrb[44].mxu1  ;;  %v1685_v40 = vpop.f32.mrb[45].mxu0 }
 0x157   : > { %v1686_v41 = vadd.f32 %v1685_v40, %v1684_v37  ;;  %v1797_v42 = vpop.f32.mrb[45].mxu1  ;;  %v1687_v43 = vpop.f32.mrb[46].mxu0  ;;  %v1320_v37 = vld [vmem:[%s2294_s27 + $0xe0] sm:$0xff] }
 0x158   : > { %1377 = vst [vmem:[%s2305_s24 + $0xa8] sm:$0xff] %v1345_v38  ;;  %v1798_v44 = vadd.f32 %v1797_v42, %v1796_v39  ;;  %v1799_v45 = vpop.f32.mrb[46].mxu1  ;;  %v1688_v46 = vpop.f32.mrb[47].mxu0  ;;  %v1321_v42 = vld [vmem:[%s2294_s27 + $0xe8] sm:$0xff] }
 0x159   : > { %v1689_v48 = vadd.f32 %v1688_v46, %v1687_v43  ;;  %v1800_v49 = vpop.f32.mrb[47].mxu1 }
 0x15a   : > { %v1123_v50 = vadd.f32 %v1798_v44, %v1686_v41  ;;  %v1801_v51 = vadd.f32 %v1800_v49, %v1799_v45 }
 0x15c   : > { %1282 = vst [vmem:[%s2299_s7 + $0xb0] sm:$0xff] %v1123_v50  ;;  %v1346_v53 = vadd.f32 %v1314_v47, %v1123_v50  ;;  %v1126_v54 = vadd.f32 %v1801_v51, %v1689_v48 }
 0x15d   : > { %v1690_v55 = vpop.f32.mrb[48].mxu0 }
 0x15e   : > { %1378 = vst [vmem:[%s2305_s24 + $0xb0] sm:$0xff] %v1346_v53  ;;  %1283 = vst [vmem:[%s2299_s7 + $0xb8] sm:$0xff] %v1126_v54  ;;  %v1347_v56 = vadd.f32 %v1315_v52, %v1126_v54  ;;  %v1802_v57 = vpop.f32.mrb[48].mxu1  ;;  %v1691_v58 = vpop.f32.mrb[49].mxu0 }
 0x15f   : > { %v1692_v59 = vadd.f32 %v1691_v58, %v1690_v55  ;;  %v1803_v60 = vpop.f32.mrb[49].mxu1  ;;  %v1693_v61 = vpop.f32.mrb[50].mxu0  ;;  %v1322_v55 = vld [vmem:[%s2294_s27 + $0xf0] sm:$0xff] }
 0x160   : > { %1379 = vst [vmem:[%s2305_s24 + $0xb8] sm:$0xff] %v1347_v56  ;;  %v1804_v62 = vadd.f32 %v1803_v60, %v1802_v57  ;;  %v1805_v63 = vpop.f32.mrb[50].mxu1  ;;  %v1694_v0 = vpop.f32.mrb[51].mxu0  ;;  %v1323_v60 = vld [vmem:[%s2294_s27 + $0xf8] sm:$0xff] }
 0x161   : > { %v1695_v2 = vadd.f32 %v1694_v0, %v1693_v61  ;;  %v1806_v3 = vpop.f32.mrb[51].mxu1 }
 0x162   : > { %v1131_v4 = vadd.f32 %v1804_v62, %v1692_v59  ;;  %v1807_v5 = vadd.f32 %v1806_v3, %v1805_v63 }
 0x164   : > { %1284 = vst [vmem:[%s2299_s7 + $0xc0] sm:$0xff] %v1131_v4  ;;  %v1348_v7 = vadd.f32 %v1316_v1, %v1131_v4  ;;  %v1134_v8 = vadd.f32 %v1807_v5, %v1695_v2 }
 0x165   : > { %v1696_v9 = vpop.f32.mrb[52].mxu0 }
 0x166   : > { %1380 = vst [vmem:[%s2305_s24 + $0xc0] sm:$0xff] %v1348_v7  ;;  %1285 = vst [vmem:[%s2299_s7 + $0xc8] sm:$0xff] %v1134_v8  ;;  %v1349_v10 = vadd.f32 %v1317_v6, %v1134_v8  ;;  %v1808_v11 = vpop.f32.mrb[52].mxu1  ;;  %v1697_v12 = vpop.f32.mrb[53].mxu0 }
 0x167   : > { %v1698_v13 = vadd.f32 %v1697_v12, %v1696_v9  ;;  %v1809_v14 = vpop.f32.mrb[53].mxu1  ;;  %v1699_v15 = vpop.f32.mrb[54].mxu0 }
 0x168   : > { %1381 = vst [vmem:[%s2305_s24 + $0xc8] sm:$0xff] %v1349_v10  ;;  %v1810_v16 = vadd.f32 %v1809_v14, %v1808_v11  ;;  %v1811_v17 = vpop.f32.mrb[54].mxu1  ;;  %v1700_v18 = vpop.f32.mrb[55].mxu0 }
 0x169   : > { %v1701_v20 = vadd.f32 %v1700_v18, %v1699_v15  ;;  %v1812_v21 = vpop.f32.mrb[55].mxu1 }
 0x16a   : > { %v1139_v22 = vadd.f32 %v1810_v16, %v1698_v13  ;;  %v1813_v23 = vadd.f32 %v1812_v21, %v1811_v17 }
 0x16c   : > { %1286 = vst [vmem:[%s2299_s7 + $0xd0] sm:$0xff] %v1139_v22  ;;  %v1350_v25 = vadd.f32 %v1318_v19, %v1139_v22  ;;  %v1142_v26 = vadd.f32 %v1813_v23, %v1701_v20 }
 0x16d   : > { %v1702_v27 = vpop.f32.mrb[56].mxu0 }
 0x16e   : > { %1382 = vst [vmem:[%s2305_s24 + $0xd0] sm:$0xff] %v1350_v25  ;;  %1287 = vst [vmem:[%s2299_s7 + $0xd8] sm:$0xff] %v1142_v26  ;;  %v1351_v28 = vadd.f32 %v1319_v24, %v1142_v26  ;;  %v1814_v29 = vpop.f32.mrb[56].mxu1  ;;  %v1703_v30 = vpop.f32.mrb[57].mxu0 }
 0x16f   : > { %v1704_v31 = vadd.f32 %v1703_v30, %v1702_v27  ;;  %v1815_v32 = vpop.f32.mrb[57].mxu1  ;;  %v1705_v33 = vpop.f32.mrb[58].mxu0 }
 0x170   : > { %1383 = vst [vmem:[%s2305_s24 + $0xd8] sm:$0xff] %v1351_v28  ;;  %v1816_v34 = vadd.f32 %v1815_v32, %v1814_v29  ;;  %v1817_v35 = vpop.f32.mrb[58].mxu1  ;;  %v1706_v36 = vpop.f32.mrb[59].mxu0 }
 0x171   : > { %v1707_v38 = vadd.f32 %v1706_v36, %v1705_v33  ;;  %v1818_v39 = vpop.f32.mrb[59].mxu1 }
 0x172   : > { %v1147_v40 = vadd.f32 %v1816_v34, %v1704_v31  ;;  %v1819_v41 = vadd.f32 %v1818_v39, %v1817_v35 }
 0x174   : > { %1288 = vst [vmem:[%s2299_s7 + $0xe0] sm:$0xff] %v1147_v40  ;;  %v1352_v43 = vadd.f32 %v1320_v37, %v1147_v40  ;;  %v1150_v44 = vadd.f32 %v1819_v41, %v1707_v38 }
 0x175   : > { %v1708_v45 = vpop.f32.mrb[60].mxu0 }
 0x176   : > { %1384 = vst [vmem:[%s2305_s24 + $0xe0] sm:$0xff] %v1352_v43  ;;  %1289 = vst [vmem:[%s2299_s7 + $0xe8] sm:$0xff] %v1150_v44  ;;  %v1353_v46 = vadd.f32 %v1321_v42, %v1150_v44  ;;  %v1820_v47 = vpop.f32.mrb[60].mxu1  ;;  %v1709_v48 = vpop.f32.mrb[61].mxu0 }
 0x177   : > { %v1710_v49 = vadd.f32 %v1709_v48, %v1708_v45  ;;  %v1821_v50 = vpop.f32.mrb[61].mxu1  ;;  %v1711_v51 = vpop.f32.mrb[62].mxu0 }
 0x178   : > { %1385 = vst [vmem:[%s2305_s24 + $0xe8] sm:$0xff] %v1353_v46  ;;  %v1822_v52 = vadd.f32 %v1821_v50, %v1820_v47  ;;  %v1823_v53 = vpop.f32.mrb[62].mxu1  ;;  %v1712_v54 = vpop.f32.mrb[63].mxu0 }
 0x179   : > { %v1713_v56 = vadd.f32 %v1712_v54, %v1711_v51  ;;  %v1824_v57 = vpop.f32.mrb[63].mxu1 }
 0x17a   : > { %v1155_v58 = vadd.f32 %v1822_v52, %v1710_v49  ;;  %v1825_v59 = vadd.f32 %v1824_v57, %v1823_v53 }
 0x17c   : > { %1290 = vst [vmem:[%s2299_s7 + $0xf0] sm:$0xff] %v1155_v58  ;;  %v1354_v61 = vadd.f32 %v1322_v55, %v1155_v58  ;;  %v1158_v62 = vadd.f32 %v1825_v59, %v1713_v56 }
 0x17e   : > { %1386 = vst [vmem:[%s2305_s24 + $0xf0] sm:$0xff] %v1354_v61  ;;  %1291 = vst [vmem:[%s2299_s7 + $0xf8] sm:$0xff] %v1158_v62  ;;  %v1355_v63 = vadd.f32 %v1323_v60, %v1158_v62 }
 0x180   : > { %1387 = vst [vmem:[%s2305_s24 + $0xf8] sm:$0xff] %v1355_v63 }
 0x181 PF: > { %s15_s17 = sadd.s32 1, %s1968_s17   ;;  %s2417_s15 = smov %s1964_s16 }
 0x182   : > { %p12_p5 = scmp.ge.s32.totalorder %s15_s17, 4   ;;  %s2418_s16 = smov %s2420_s18 }
 0x184   :  { %14 = sbr.rel (!%p12_p5) target bundleno = 2 (0x2), region = 88 }

// kernel: mlpnorm_forward.10
= control target key start
LH: loop header
LB: loop body
LE: loop exit
PB: predicated region body
PF: predicated region fallthrough
CT: control target
= control target key end

     0   :  { %s2722_s21 = smov 0   ;;  %s2724_s22 = smov 0   ;;  %s3464_s0 = inlined_call_operand.vmem [shape: bf16[512,512], index: 0, kind: input, shape index: {}]   ;;  %s3465_s1 = inlined_call_operand.vmem [shape: f32[512,128], index: 1, kind: input, shape index: {}]   ;;  %s3466_s2 = inlined_call_operand.vmem [shape: f32[512,128], index: 2, kind: input, shape index: {}]   ;;  %s3467_s3 = inlined_call_operand.vmem [shape: f32[512,128], index: 3, kind: input, shape index: {}, may-alias: {3,4}]   ;;  %s3468_s4 = inlined_call_operand.vmem [shape: f32[512,128], index: 4, kind: input, shape index: {}, may-alias: {3,4}]   ;;  %s3469_s5 = inlined_call_operand.vmem [shape: f32[128,128], index: 5, kind: input, shape index: {}]   ;;  %s3470_s6 = inlined_call_operand.vmem [shape: f32[512,128], index: 6, kind: output, shape index: {}]  }
   0x1   :  { %s2726_s23 = smov 0  }
   0x2 LB: > { %s28_s24 = sadd.s32 1, %s2681_s22  ;;  %p2064_p0 = scmp.ge.s32.totalorder %s2685_s23, 1  ;;  %s2685_s23 = sphi %s2726_s23, %s16_s23   ;;  %s2681_s22 = sphi %s2724_s22, %s3520_s22   ;;  %s2677_s21 = sphi %s2722_s21, %s3519_s21  }
   0x3   : > { %p30_p1 = scmp.ge.s32.totalorder %s28_s24, 2  ;;  %p277_p2 = scmp.lt.s32.totalorder %s2685_s23, 3 }
   0x5   : > { %s3522_s24 = smov (%p30_p1, %s28_s24), 0  ;;  %p278_p3 = pnand %p2064_p0, %p277_p2 }
   0x7   : > { %281 = sbr.rel (%p278_p3) target bundleno = 429 (0x1ad), region = 44 }
   0xe   : > { %v523_v0 = vld [vmem:[%s3465_s1 + $0x80] sm:$0xff]  ;;  %v524_v1 = vld [vmem:[%s3465_s1 + $0x88] sm:$0xff]  ;;  %s2065_s7 = sshll.u32 %s2677_s21, 5  ;;  %v525_v5 = vld [vmem:[%s3465_s1 + $0x90] sm:$0xff] }
   0xf   : > { %v507_v2 = vld [vmem:[%s3465_s1] sm:$0xff]  ;;  %v579_v3 = vpack.c.bf16 %v524_v1, %v523_v0  ;;  %v508_v4 = vld [vmem:[%s3465_s1 + $0x8] sm:$0xff]  ;;  %v526_v6 = vld [vmem:[%s3465_s1 + $0x98] sm:$0xff]  ;;  %p334_p4 = scmp.lt.s32.totalorder %s2065_s7, 63 }
  0x10   : > { %v571_v7 = vpack.c.bf16 %v508_v4, %v507_v2  ;;  %v580_v8 = vpack.c.bf16 %v526_v6, %v525_v5  ;;  %v509_v9 = vld [vmem:[%s3465_s1 + $0x10] sm:$0xff]  ;;  %v510_v10 = vld [vmem:[%s3465_s1 + $0x18] sm:$0xff]  ;;  %v527_v11 = vld [vmem:[%s3465_s1 + $0xa0] sm:$0xff] }
  0x11   : > { %2143 = vmatprep.subr.bf16.mxu0 %v579_v3  ;;  %2527 = vmatprep.subr.bf16.mxu1 %v579_v3  ;;  %v528_v12 = vld [vmem:[%s3465_s1 + $0xa8] sm:$0xff]  ;;  %s3524_s7 = smov (!%p334_p4, %s2065_s7), 63  ;;  %v572_v13 = vpack.c.bf16 %v510_v10, %v509_v9  ;;  %v511_v15 = vld [vmem:[%s3465_s1 + $0x20] sm:$0xff]  ;;  %v529_v17 = vld [vmem:[%s3465_s1 + $0xb0] sm:$0xff] }
  0x12   : > { %2144 = vmatpush3.bf16.msra.mxu0 %v571_v7  ;;  %2535 = vmatpush3.bf16.msra.mxu1 %v571_v7  ;;  %v581_v14 = vpack.c.bf16 %v528_v12, %v527_v11  ;;  %v512_v16 = vld [vmem:[%s3465_s1 + $0x28] sm:$0xff]  ;;  %s2142_s29 = sshll.u32 %s3524_s7, 4  ;;  %v530_v18 = vld [vmem:[%s3465_s1 + $0xb8] sm:$0xff]  ;;  %v513_v21 = vld [vmem:[%s3465_s1 + $0x30] sm:$0xff]  ;;  %s3031_s12 = sshll.u32 %s3524_s7, 3 }
  0x13   : > { %2145 = vmatprep.subr.bf16.mxu0 %v580_v8  ;;  %2528 = vmatprep.subr.bf16.mxu1 %v580_v8  ;;  %v573_v19 = vpack.c.bf16 %v512_v16, %v511_v15  ;;  %s2788_s13 = scalar_lea.vmem %s3464_s0, %s2142_s29  ;;  %v582_v20 = vpack.c.bf16 %v530_v18, %v529_v17  ;;  %v514_v22 = vld [vmem:[%s3465_s1 + $0x38] sm:$0xff]  ;;  %v531_v23 = vld [vmem:[%s3465_s1 + $0xc0] sm:$0xff]  ;;  %v532_v24 = vld [vmem:[%s3465_s1 + $0xc8] sm:$0xff]  ;;  %s3037_s16 = scalar_lea.vmem %s3467_s3, %s3031_s12 }
  0x14   : > { %v2569_v25 = vld [vmem:[%s2788_s13 + $0x4] ss:$16 sps:$4 sm:$0xff]   ;;  %v574_v26 = vpack.c.bf16 %v514_v22, %v513_v21  ;;  %v583_v27 = vpack.c.bf16 %v532_v24, %v531_v23  ;;  %v516_v29 = vld [vmem:[%s3465_s1 + $0x48] sm:$0xff]  ;;  %v534_v32 = vld [vmem:[%s3465_s1 + $0xd8] sm:$0xff]  ;;  %s3043_s19 = scalar_lea.vmem %s3468_s4, %s3031_s12  ;;  %s3291_s20 = scalar_lea.vmem %s3466_s2, %s3031_s12 }
  0x15   : > { %v515_v28 = vld [vmem:[%s3465_s1 + $0x40] sm:$0xff]  ;;  %v533_v31 = vld [vmem:[%s3465_s1 + $0xd0] sm:$0xff]  ;;  %955 = vmatprep.mubr.bf16.mxu0 %v2569_v25  ;;  %v518_v36 = vld [vmem:[%s3465_s1 + $0x58] sm:$0xff]  ;;  %s3319_s26 = scalar_lea.vmem %s3470_s6, %s3031_s12 }
  0x16   : > { %2146 = vmatpush3.bf16.msra.mxu0 %v572_v13  ;;  %2536 = vmatpush3.bf16.msra.mxu1 %v572_v13  ;;  %v2572_v30 = vld [vmem:[%s2788_s13 + $0x184] ss:$16 sps:$4 sm:$0xff]   ;;  %v575_v33 = vpack.c.bf16 %v516_v29, %v515_v28  ;;  %v584_v35 = vpack.c.bf16 %v534_v32, %v533_v31  ;;  %v536_v38 = vld [vmem:[%s3465_s1 + $0xe8] sm:$0xff]  ;;  %v538_v44 = vld [vmem:[%s3465_s1 + $0xf8] sm:$0xff] }
  0x17   : > { %2147 = vmatprep.subr.bf16.mxu0 %v581_v14  ;;  %2529 = vmatprep.subr.bf16.mxu1 %v581_v14  ;;  %v517_v34 = vld [vmem:[%s3465_s1 + $0x50] sm:$0xff]  ;;  %v535_v37 = vld [vmem:[%s3465_s1 + $0xe0] sm:$0xff]  ;;  %v520_v42 = vld [vmem:[%s3465_s1 + $0x68] sm:$0xff] }
  0x18   : > { %1051 = vmatprep.mubr.bf16.mxu1 %v2572_v30  ;;  %v576_v39 = vpack.c.bf16 %v518_v36, %v517_v34  ;;  %v585_v40 = vpack.c.bf16 %v536_v38, %v535_v37  ;;  %v519_v41 = vld [vmem:[%s3465_s1 + $0x60] sm:$0xff]  ;;  %v537_v43 = vld [vmem:[%s3465_s1 + $0xf0] sm:$0xff]  ;;  %v522_v48 = vld [vmem:[%s3465_s1 + $0x78] sm:$0xff] }
  0x19   : > { %v577_v45 = vpack.c.bf16 %v520_v42, %v519_v41  ;;  %v586_v46 = vpack.c.bf16 %v538_v44, %v537_v43  ;;  %v521_v47 = vld [vmem:[%s3465_s1 + $0x70] sm:$0xff]  ;;  %v555_v49 = vld [vmem:[%s3465_s1 + $0x180] sm:$0xff]  ;;  %v556_v50 = vld [vmem:[%s3465_s1 + $0x188] sm:$0xff] }
  0x1a   : > { %2148 = vmatpush3.bf16.msra.mxu0 %v573_v19  ;;  %2537 = vmatpush3.bf16.msra.mxu1 %v573_v19  ;;  %v1568_v51 = vld [vmem:[%s3469_s5] sm:$0xff]  ;;  %v1569_v52 = vld [vmem:[%s3469_s5 + $0x8] sm:$0xff]  ;;  %v578_v53 = vpack.c.bf16 %v522_v48, %v521_v47  ;;  %v595_v55 = vpack.c.bf16 %v556_v50, %v555_v49  ;;  %v557_v58 = vld [vmem:[%s3465_s1 + $0x190] sm:$0xff] }
  0x1b   : > { %2149 = vmatprep.subr.bf16.mxu0 %v582_v20  ;;  %2530 = vmatprep.subr.bf16.mxu1 %v582_v20  ;;  %v539_v54 = vld [vmem:[%s3465_s1 + $0x100] sm:$0xff]  ;;  %v540_v56 = vld [vmem:[%s3465_s1 + $0x108] sm:$0xff]  ;;  %v2495_v57 = vpack.c.bf16 %v1569_v52, %v1568_v51  ;;  %v558_v59 = vld [vmem:[%s3465_s1 + $0x198] sm:$0xff] }
  0x1c   : > { %v2567_v60 = vld [vmem:[%s2788_s13] ss:$16 sps:$4 sm:$0xff]   ;;  %v587_v63 = vpack.c.bf16 %v540_v56, %v539_v54  ;;  %v2573_v0 = vld [vmem:[%s2788_s13 + $0x24] ss:$16 sps:$4 sm:$0xff]   ;;  %v1571_v2 = vld [vmem:[%s3469_s5 + $0x18] sm:$0xff]  ;;  %v596_v3 = vpack.c.bf16 %v558_v59, %v557_v58 }
  0x1d   : > { %v2570_v61 = vld [vmem:[%s2788_s13 + $0x180] ss:$16 sps:$4 sm:$0xff]   ;;  %v542_v4 = vld [vmem:[%s3465_s1 + $0x118] sm:$0xff]  ;;  %v2575_v5 = vld [vmem:[%s2788_s13 + $0x1a4] ss:$16 sps:$4 sm:$0xff]  }
  0x1e   : > { %2150 = vmatpush3.bf16.msra.mxu0 %v574_v26  ;;  %2538 = vmatpush3.bf16.msra.mxu1 %v574_v26  ;;  %v541_v62 = vld [vmem:[%s3465_s1 + $0x110] sm:$0xff]  ;;  %v559_v6 = vld [vmem:[%s3465_s1 + $0x1a0] sm:$0xff]  ;;  %v560_v7 = vld [vmem:[%s3465_s1 + $0x1a8] sm:$0xff] }
  0x1f   : > { %2151 = vmatprep.subr.bf16.mxu0 %v583_v27  ;;  %2531 = vmatprep.subr.bf16.mxu1 %v583_v27  ;;  %v1570_v1 = vld [vmem:[%s3469_s5 + $0x10] sm:$0xff]  ;;  %v588_v9 = vpack.c.bf16 %v542_v4, %v541_v62  ;;  %v543_v10 = vld [vmem:[%s3465_s1 + $0x120] sm:$0xff]  ;;  %v544_v11 = vld [vmem:[%s3465_s1 + $0x128] sm:$0xff]  ;;  %v597_v14 = vpack.c.bf16 %v560_v7, %v559_v6 }
  0x20   : > { %v2499_v8 = vpack.c.bf16 %v1571_v2, %v1570_v1  ;;  %v2577_v12 = vld [vmem:[%s2788_s13 + $0x20] ss:$16 sps:$4 sm:$0xff]   ;;  %v562_v16 = vld [vmem:[%s3465_s1 + $0x1b8] sm:$0xff]  ;;  %v2579_v17 = vld [vmem:[%s2788_s13 + $0x44] ss:$16 sps:$4 sm:$0xff]   ;;  %v589_v23 = vpack.c.bf16 %v544_v11, %v543_v10 }
  0x21   : > { %v2578_v13 = vld [vmem:[%s2788_s13 + $0x1a0] ss:$16 sps:$4 sm:$0xff]   ;;  %v546_v19 = vld [vmem:[%s3465_s1 + $0x138] sm:$0xff]  ;;  %v2581_v20 = vld [vmem:[%s2788_s13 + $0x1c4] ss:$16 sps:$4 sm:$0xff]  }
  0x22   : > { %2152 = vmatpush3.bf16.msra.mxu0 %v575_v33  ;;  %2539 = vmatpush3.bf16.msra.mxu1 %v575_v33  ;;  %v561_v15 = vld [vmem:[%s3465_s1 + $0x1b0] sm:$0xff]  ;;  %v1572_v21 = vld [vmem:[%s3469_s5 + $0x20] sm:$0xff]  ;;  %v1573_v22 = vld [vmem:[%s3469_s5 + $0x28] sm:$0xff] }
  0x23   : > { %2153 = vmatprep.subr.bf16.mxu0 %v584_v35  ;;  %2532 = vmatprep.subr.bf16.mxu1 %v584_v35  ;;  %v545_v18 = vld [vmem:[%s3465_s1 + $0x130] sm:$0xff]  ;;  %v598_v25 = vpack.c.bf16 %v562_v16, %v561_v15  ;;  %v1575_v26 = vld [vmem:[%s3469_s5 + $0x38] sm:$0xff]  ;;  %v563_v27 = vld [vmem:[%s3465_s1 + $0x1c0] sm:$0xff]  ;;  %v2503_v29 = vpack.c.bf16 %v1573_v22, %v1572_v21 }
  0x24   : > { %v1574_v24 = vld [vmem:[%s3469_s5 + $0x30] sm:$0xff]  ;;  %v564_v28 = vld [vmem:[%s3465_s1 + $0x1c8] sm:$0xff]  ;;  %v590_v30 = vpack.c.bf16 %v546_v19, %v545_v18  ;;  %v547_v35 = vld [vmem:[%s3465_s1 + $0x140] sm:$0xff] }
  0x25   : > { %v2507_v31 = vpack.c.bf16 %v1575_v26, %v1574_v24  ;;  %v2583_v32 = vld [vmem:[%s2788_s13 + $0x40] ss:$16 sps:$4 sm:$0xff]   ;;  %v599_v34 = vpack.c.bf16 %v564_v28, %v563_v27  ;;  %v548_v36 = vld [vmem:[%s3465_s1 + $0x148] sm:$0xff]  ;;  %v566_v38 = vld [vmem:[%s3465_s1 + $0x1d8] sm:$0xff] }
  0x26   : > { %2154 = vmatpush3.bf16.msra.mxu0 %v576_v39  ;;  %2540 = vmatpush3.bf16.msra.mxu1 %v576_v39  ;;  %v2584_v33 = vld [vmem:[%s2788_s13 + $0x1c0] ss:$16 sps:$4 sm:$0xff]   ;;  %v2585_v41 = vld [vmem:[%s2788_s13 + $0x64] ss:$16 sps:$4 sm:$0xff]   ;;  %v591_v42 = vpack.c.bf16 %v548_v36, %v547_v35  ;;  %v568_v48 = vld [vmem:[%s3465_s1 + $0x1e8] sm:$0xff] }
  0x27   : > { %2155 = vmatprep.subr.bf16.mxu0 %v585_v40  ;;  %2533 = vmatprep.subr.bf16.mxu1 %v585_v40  ;;  %v565_v37 = vld [vmem:[%s3465_s1 + $0x1d0] sm:$0xff]  ;;  %v550_v40 = vld [vmem:[%s3465_s1 + $0x158] sm:$0xff]  ;;  %v1576_v44 = vld [vmem:[%s3469_s5 + $0x40] sm:$0xff] }
  0x28   : > { %v549_v39 = vld [vmem:[%s3465_s1 + $0x150] sm:$0xff]  ;;  %v567_v47 = vld [vmem:[%s3465_s1 + $0x1e0] sm:$0xff]  ;;  %v552_v52 = vld [vmem:[%s3465_s1 + $0x168] sm:$0xff] }
  0x29   : > { %v2587_v43 = vld [vmem:[%s2788_s13 + $0x1e4] ss:$16 sps:$4 sm:$0xff]   ;;  %v592_v50 = vpack.c.bf16 %v550_v40, %v549_v39  ;;  %v2590_v54 = vld [vmem:[%s2788_s13 + $0x1e0] ss:$16 sps:$4 sm:$0xff]   ;;  %v2595_v1 = vld [vmem:[%s2788_s13 + $0xc] ss:$16 sps:$4 sm:$0xff]  }
  0x2a   : > { %2156 = vmatpush3.bf16.msra.mxu0 %v577_v45  ;;  %2541 = vmatpush3.bf16.msra.mxu1 %v577_v45  ;;  %v1577_v45 = vld [vmem:[%s3469_s5 + $0x48] sm:$0xff]  ;;  %v551_v51 = vld [vmem:[%s3465_s1 + $0x160] sm:$0xff]  ;;  %v569_v56 = vld [vmem:[%s3465_s1 + $0x1f0] sm:$0xff] }
  0x2b   : > { %2157 = vmatprep.subr.bf16.mxu0 %v586_v46  ;;  %2534 = vmatprep.subr.bf16.mxu1 %v586_v46  ;;  %v600_v46 = vpack.c.bf16 %v566_v38, %v565_v37  ;;  %v2511_v49 = vpack.c.bf16 %v1577_v45, %v1576_v44  ;;  %v1578_v58 = vld [vmem:[%s3469_s5 + $0x50] sm:$0xff]  ;;  %v593_v62 = vpack.c.bf16 %v552_v52, %v551_v51  ;;  %v1580_v2 = vld [vmem:[%s3469_s5 + $0x60] sm:$0xff]  ;;  %v2593_v7 = vld [vmem:[%s2788_s13 + $0x8] ss:$16 sps:$4 sm:$0xff]  }
  0x2c   : > { %v553_v59 = vld [vmem:[%s3465_s1 + $0x170] sm:$0xff]  ;;  %v1583_v10 = vld [vmem:[%s3469_s5 + $0x78] sm:$0xff]  ;;  %v1408_v38 = vld [vmem:[%s3037_s16] sm:$0xff] }
  0x2d   : > { %v2597_v11 = vld [vmem:[%s2788_s13 + $0xa4] ss:$16 sps:$4 sm:$0xff]   ;;  %v2602_v15 = vld [vmem:[%s2788_s13 + $0x28] ss:$16 sps:$4 sm:$0xff]   ;;  %v2607_v18 = vld [vmem:[%s2788_s13 + $0xc0] ss:$16 sps:$4 sm:$0xff]  }
  0x2e   : > { %2158 = vmatpush3.bf16.msra.mxu0 %v578_v53  ;;  %2542 = vmatpush3.bf16.msra.mxu1 %v578_v53  ;;  %v2589_v53 = vld [vmem:[%s2788_s13 + $0x60] ss:$16 sps:$4 sm:$0xff]   ;;  %v2603_v16 = vld [vmem:[%s2788_s13 + $0xc4] ss:$16 sps:$4 sm:$0xff]   ;;  %v2608_v19 = vld [vmem:[%s2788_s13 + $0x48] ss:$16 sps:$4 sm:$0xff]  }
  0x2f   : > { %2255 = vmatprep.subr.bf16.mxu1 %v595_v55  ;;  %2496 = vmatprep.subr.bf16.mxu0 %v2495_v57  ;;  %v601_v55 = vpack.c.bf16 %v568_v48, %v567_v47  ;;  %v2611_v21 = vld [vmem:[%s2788_s13 + $0x6c] ss:$16 sps:$4 sm:$0xff]   ;;  %v2613_v22 = vld [vmem:[%s2788_s13 + $0xe0] ss:$16 sps:$4 sm:$0xff]   ;;  %v2615_v24 = vld [vmem:[%s2788_s13 + $0x104] ss:$16 sps:$4 sm:$0xff]  }
  0x30   : > { %v2619_v26 = vld [vmem:[%s2788_s13 + $0x100] ss:$16 sps:$4 sm:$0xff]   ;;  %v2620_v27 = vld [vmem:[%s2788_s13 + $0x88] ss:$16 sps:$4 sm:$0xff]   ;;  %v2621_v28 = vld [vmem:[%s2788_s13 + $0x124] ss:$16 sps:$4 sm:$0xff]  }
  0x31   : > { %956 = vmatmul.mubr.bf16.vlgmr.msra.gmra.mrb[0].mxu0 %v2567_v60  ;;  %1052 = vmatmul.mubr.bf16.vlgmr.msra.gmra.mrb[0].mxu1 %v2570_v61  ;;  %v554_v60 = vld [vmem:[%s3465_s1 + $0x178] sm:$0xff]  ;;  %v2633_v36 = vld [vmem:[%s2788_s13 + $0x164] ss:$16 sps:$4 sm:$0xff]   ;;  %v1440_v40 = vmul.f32 0.4, %v1408_v38  ;;  %v3059_v47 = vld [vmem:[%s3043_s19 + $0x8] sm:$0xff] }
  0x32   : > { %2256 = vmatpush3.bf16.msra.mxu1 %v587_v63  ;;  %963 = vmatprep.mubr.bf16.mxu0 %v2573_v0  ;;  %v1579_v61 = vld [vmem:[%s3469_s5 + $0x58] sm:$0xff]  ;;  %v2591_v63 = vld [vmem:[%s2788_s13 + $0x84] ss:$16 sps:$4 sm:$0xff]   ;;  %v1505_v51 = vmul.f32 0.24, %v3059_v47 }
  0x33   : > { %2257 = vmatprep.subr.bf16.mxu1 %v596_v3  ;;  %1059 = vmatprep.mubr.bf16.mxu1 %v2575_v5  ;;  %v1581_v3 = vld [vmem:[%s3469_s5 + $0x68] sm:$0xff]  ;;  %v2515_v4 = vpack.c.bf16 %v1579_v61, %v1578_v58  ;;  %v594_v5 = vpack.c.bf16 %v554_v60, %v553_v59  ;;  %v3051_v39 = vld [vmem:[%s3043_s19] sm:$0xff]  ;;  %v1410_v48 = vld [vmem:[%s3037_s16 + $0x10] sm:$0xff] }
  0x34   : > { %2498 = vmatpush3.bf16.msra.mxu0 %v2495_v57  ;;  %v570_v57 = vld [vmem:[%s3465_s1 + $0x1f8] sm:$0xff]  ;;  %v2519_v6 = vpack.c.bf16 %v1581_v3, %v1580_v2  ;;  %v1442_v52 = vmul.f32 0.4, %v1410_v48  ;;  %v1413_v2 = vld [vmem:[%s3037_s16 + $0x28] sm:$0xff] }
  0x35   : > { %2500 = vmatprep.subr.bf16.mxu0 %v2499_v8  ;;  %v602_v0 = vpack.c.bf16 %v570_v57, %v569_v56  ;;  %v2632_v35 = vld [vmem:[%s2788_s13 + $0xc8] ss:$16 sps:$4 sm:$0xff]   ;;  %v2635_v37 = vld [vmem:[%s2788_s13 + $0xec] ss:$16 sps:$4 sm:$0xff]   ;;  %v1412_v56 = vld [vmem:[%s3037_s16 + $0x20] sm:$0xff] }
  0x36   : > { %2258 = vmatpush3.bf16.msra.mxu1 %v588_v9  ;;  %v1582_v9 = vld [vmem:[%s3469_s5 + $0x70] sm:$0xff]  ;;  %v2639_v44 = vld [vmem:[%s2788_s13 + $0x10c] ss:$16 sps:$4 sm:$0xff]   ;;  %v3073_v57 = vld [vmem:[%s3043_s19 + $0x20] sm:$0xff] }
  0x37   : > { %2259 = vmatprep.subr.bf16.mxu1 %v597_v14  ;;  %v2601_v14 = vld [vmem:[%s2788_s13 + $0xa0] ss:$16 sps:$4 sm:$0xff]   ;;  %v2641_v58 = vld [vmem:[%s2788_s13 + $0x108] ss:$16 sps:$4 sm:$0xff]  }
  0x38   : > { %2502 = vmatpush3.bf16.msra.mxu0 %v2499_v8  ;;  %v2596_v8 = vld [vmem:[%s2788_s13 + $0x80] ss:$16 sps:$4 sm:$0xff]   ;;  %v3081_v3 = vld [vmem:[%s3043_s19 + $0x28] sm:$0xff] }
  0x39   : > { %964 = vmatmul.mubr.bf16.gmra.mrb[4].mxu0 %v2577_v12  ;;  %1060 = vmatmul.mubr.bf16.gmra.mrb[4].mxu1 %v2578_v13  ;;  %v2599_v12 = vld [vmem:[%s2788_s13 + $0x2c] ss:$16 sps:$4 sm:$0xff]   ;;  %v2523_v13 = vpack.c.bf16 %v1583_v10, %v1582_v9  ;;  %v2647_v38 = vld [vmem:[%s2788_s13 + $0x148] ss:$16 sps:$4 sm:$0xff]  }
  0x3a   : > { %2260 = vmatpush3.bf16.msra.mxu1 %v589_v23  ;;  %971 = vmatprep.mubr.bf16.mxu0 %v2579_v17  ;;  %v2605_v17 = vld [vmem:[%s2788_s13 + $0x4c] ss:$16 sps:$4 sm:$0xff]   ;;  %v2614_v23 = vld [vmem:[%s2788_s13 + $0x68] ss:$16 sps:$4 sm:$0xff]  }
  0x3b   : > { %2261 = vmatprep.subr.bf16.mxu1 %v598_v25  ;;  %1067 = vmatprep.mubr.bf16.mxu1 %v2581_v20  ;;  %v2609_v20 = vld [vmem:[%s2788_s13 + $0xe4] ss:$16 sps:$4 sm:$0xff]   ;;  %v2617_v25 = vld [vmem:[%s2788_s13 + $0x8c] ss:$16 sps:$4 sm:$0xff]  }
  0x3c   : > { %2504 = vmatprep.subr.bf16.mxu0 %v2503_v29  ;;  %v1421_v48 = vld [vmem:[%s3037_s16 + $0x68] sm:$0xff] }
  0x3d   : > { %2506 = vmatpush3.bf16.msra.mxu0 %v2503_v29  ;;  %v2623_v29 = vld [vmem:[%s2788_s13 + $0xac] ss:$16 sps:$4 sm:$0xff]  }
  0x3e   : > { %2262 = vmatpush3.bf16.msra.mxu1 %v590_v30  ;;  %2508 = vmatprep.subr.bf16.mxu0 %v2507_v31  ;;  %v2625_v30 = vld [vmem:[%s2788_s13 + $0x120] ss:$16 sps:$4 sm:$0xff]  }
  0x3f   : > { %2263 = vmatprep.subr.bf16.mxu1 %v599_v34  ;;  %v2631_v34 = vld [vmem:[%s2788_s13 + $0x140] ss:$16 sps:$4 sm:$0xff]  }
  0x41   : > { %972 = vmatmul.mubr.bf16.gmra.mrb[8].mxu0 %v2583_v32  ;;  %1068 = vmatmul.mubr.bf16.gmra.mrb[8].mxu1 %v2584_v33  ;;  %v2627_v32 = vld [vmem:[%s2788_s13 + $0x144] ss:$16 sps:$4 sm:$0xff]   ;;  %v2629_v33 = vld [vmem:[%s2788_s13 + $0xcc] ss:$16 sps:$4 sm:$0xff]  }
  0x42   : > { %2264 = vmatpush3.bf16.msra.mxu1 %v591_v42  ;;  %979 = vmatprep.mubr.bf16.mxu0 %v2585_v41  ;;  %v1504_v41 = vmul.f32 0.24, %v3051_v39  ;;  %v2637_v42 = vld [vmem:[%s2788_s13 + $0x160] ss:$16 sps:$4 sm:$0xff]  }
  0x43   : > { %2265 = vmatprep.subr.bf16.mxu1 %v600_v46  ;;  %1075 = vmatprep.mubr.bf16.mxu1 %v2587_v43  ;;  %v2638_v43 = vld [vmem:[%s2788_s13 + $0xe8] ss:$16 sps:$4 sm:$0xff]  }
  0x44   : > { %2510 = vmatpush3.bf16.msra.mxu0 %v2507_v31  ;;  %v2626_v31 = vld [vmem:[%s2788_s13 + $0xa8] ss:$16 sps:$4 sm:$0xff]   ;;  %v1536_v45 = vsub.f32 %v1440_v40, %v1504_v41 }
  0x45   : > { %2512 = vmatprep.subr.bf16.mxu0 %v2511_v49  ;;  %v1409_v46 = vld [vmem:[%s3037_s16 + $0x8] sm:$0xff] }
  0x46   : > { %2266 = vmatpush3.bf16.msra.mxu1 %v592_v50  ;;  %v1441_v50 = vmul.f32 0.4, %v1409_v46 }
  0x47   : > { %2267 = vmatprep.subr.bf16.mxu1 %v601_v55  ;;  %v3069_v55 = vld [vmem:[%s3043_s19 + $0x18] sm:$0xff] }
  0x48   : > { %2514 = vmatpush3.bf16.msra.mxu0 %v2511_v49  ;;  %v3063_v49 = vld [vmem:[%s3043_s19 + $0x10] sm:$0xff]  ;;  %v1537_v59 = vsub.f32 %v1441_v50, %v1505_v51  ;;  %v1507_v61 = vmul.f32 0.24, %v3069_v55  ;;  %v3125_v50 = vld [vmem:[%s3043_s19 + $0x68] sm:$0xff] }
  0x49   : > { %980 = vmatmul.mubr.bf16.gmra.mrb[12].mxu0 %v2589_v53  ;;  %1076 = vmatmul.mubr.bf16.gmra.mrb[12].mxu1 %v2590_v54  ;;  %v1506_v53 = vmul.f32 0.24, %v3063_v49  ;;  %v1411_v54 = vld [vmem:[%s3037_s16 + $0x18] sm:$0xff]  ;;  %v1422_v51 = vld [vmem:[%s3037_s16 + $0x70] sm:$0xff] }
  0x4a   : > { %2268 = vmatpush3.bf16.msra.mxu1 %v593_v62  ;;  %987 = vmatprep.mubr.bf16.mxu0 %v2591_v63  ;;  %v1443_v60 = vmul.f32 0.4, %v1411_v54  ;;  %v2642_v62 = vld [vmem:[%s2788_s13 + $0x12c] ss:$16 sps:$4 sm:$0xff]   ;;  %v1453_v54 = vmul.f32 0.4, %v1421_v48 }
  0x4b   : > { %2269 = vmatprep.subr.bf16.mxu1 %v602_v0  ;;  %1116 = vmatprep.mubr.bf16.mxu1 %v2595_v1  ;;  %v1538_v63 = vsub.f32 %v1442_v52, %v1506_v53  ;;  %v1444_v0 = vmul.f32 0.4, %v1412_v56  ;;  %v1508_v1 = vmul.f32 0.24, %v3073_v57  ;;  %v3129_v52 = vld [vmem:[%s3043_s19 + $0x70] sm:$0xff] }
  0x4c   : > { %2516 = vmatprep.subr.bf16.mxu0 %v2515_v4  ;;  %v1517_v56 = vmul.f32 0.24, %v3125_v50 }
  0x4d   : > { %2518 = vmatpush3.bf16.msra.mxu0 %v2515_v4  ;;  %v1414_v4 = vld [vmem:[%s3037_s16 + $0x30] sm:$0xff]  ;;  %v1540_v9 = vsub.f32 %v1444_v0, %v1508_v1  ;;  %v3139_v0 = vld [vmem:[%s3043_s19 + $0x80] sm:$0xff]  ;;  %v2650_v1 = vld [vmem:[%s2788_s13 + $0x168] ss:$16 sps:$4 sm:$0xff]  }
  0x4e   : > { %2270 = vmatpush3.bf16.msra.mxu1 %v594_v5  ;;  %2520 = vmatprep.subr.bf16.mxu0 %v2519_v6  ;;  %v3085_v5 = vld [vmem:[%s3043_s19 + $0x30] sm:$0xff]  ;;  %v1446_v10 = vmul.f32 0.4, %v1414_v4 }
  0x51   : > { %988 = vmatmul.mubr.bf16.gmra.mrb[16].mxu0 %v2596_v8  ;;  %1117 = vmatmul.mubr.bf16.vlgmr.msra.gmra.mrb[16].mxu1 %v2593_v7  ;;  %v1445_v7 = vmul.f32 0.4, %v1413_v2  ;;  %v1509_v8 = vmul.f32 0.24, %v3081_v3  ;;  %v1549_v2 = vsub.f32 %v1453_v54, %v1517_v56  ;;  %v1431_v54 = vld [vmem:[%s3037_s16 + $0xb8] sm:$0xff] }
  0x52   : > { %995 = vmatprep.mubr.bf16.mxu0 %v2597_v11  ;;  %1124 = vmatprep.mubr.bf16.mxu1 %v2599_v12  ;;  %v1510_v11 = vmul.f32 0.24, %v3085_v5  ;;  %v1415_v12 = vld [vmem:[%s3037_s16 + $0x38] sm:$0xff] }
  0x53   : > { %2522 = vmatpush3.bf16.msra.mxu0 %v2519_v6  ;;  %v1539_v6 = vsub.f32 %v1443_v60, %v1507_v61  ;;  %v1518_v60 = vmul.f32 0.24, %v3129_v52  ;;  %v1423_v61 = vld [vmem:[%s3037_s16 + $0x78] sm:$0xff] }
  0x54   : > { %2524 = vmatprep.subr.bf16.mxu0 %v2523_v13  ;;  %v1455_v4 = vmul.f32 0.4, %v1423_v61  ;;  %v3179_v56 = vld [vmem:[%s3043_s19 + $0xb8] sm:$0xff] }
  0x55   : > { %3486 = vst [vmem:[#allocation6_spill] sm:$0xff] %v3179_v56 }
  0x57   : > { %2526 = vmatpush3.bf16.msra.mxu0 %v2523_v13  ;;  %v3091_v13 = vld [vmem:[%s3043_s19 + $0x38] sm:$0xff] }
  0x59   : > { %996 = vmatmul.mubr.bf16.gmra.mrb[20].mxu0 %v2601_v14  ;;  %1125 = vmatmul.mubr.bf16.gmra.mrb[20].mxu1 %v2602_v15  ;;  %v1416_v14 = vld [vmem:[%s3037_s16 + $0x40] sm:$0xff] }
  0x5a   : > { %1003 = vmatprep.mubr.bf16.mxu0 %v2603_v16  ;;  %1132 = vmatprep.mubr.bf16.mxu1 %v2605_v17  ;;  %v3095_v15 = vld [vmem:[%s3043_s19 + $0x40] sm:$0xff]  ;;  %v2644_v16 = vld [vmem:[%s2788_s13 + $0x128] ss:$16 sps:$4 sm:$0xff]   ;;  %v1541_v17 = vsub.f32 %v1445_v7, %v1509_v8  ;;  %v2651_v7 = vld [vmem:[%s2788_s13 + $0x18c] ss:$16 sps:$4 sm:$0xff]  }
  0x61   : > { %1004 = vmatmul.mubr.bf16.gmra.mrb[24].mxu0 %v2607_v18  ;;  %1133 = vmatmul.mubr.bf16.gmra.mrb[24].mxu1 %v2608_v19  ;;  %v1447_v18 = vmul.f32 0.4, %v1415_v12  ;;  %v1511_v19 = vmul.f32 0.24, %v3091_v13  ;;  %v3147_v12 = vld [vmem:[%s3043_s19 + $0x88] sm:$0xff] }
  0x62   : > { %1011 = vmatprep.mubr.bf16.mxu0 %v2609_v20  ;;  %1140 = vmatprep.mubr.bf16.mxu1 %v2611_v21  ;;  %v2645_v20 = vld [vmem:[%s2788_s13 + $0x14c] ss:$16 sps:$4 sm:$0xff]   ;;  %v1542_v21 = vsub.f32 %v1446_v10, %v1510_v11  ;;  %v1520_v10 = vmul.f32 0.24, %v3139_v0 }
  0x63   : > { %v1425_v11 = vld [vmem:[%s3037_s16 + $0x88] sm:$0xff] }
  0x69   : > { %1012 = vmatmul.mubr.bf16.gmra.mrb[28].mxu0 %v2613_v22  ;;  %1141 = vmatmul.mubr.bf16.gmra.mrb[28].mxu1 %v2614_v23  ;;  %v1448_v22 = vmul.f32 0.4, %v1416_v14  ;;  %v1512_v23 = vmul.f32 0.24, %v3095_v15  ;;  %v1426_v14 = vld [vmem:[%s3037_s16 + $0x90] sm:$0xff] }
  0x6a   : > { %1019 = vmatprep.mubr.bf16.mxu0 %v2615_v24  ;;  %1148 = vmatprep.mubr.bf16.mxu1 %v2617_v25  ;;  %v1417_v24 = vld [vmem:[%s3037_s16 + $0x48] sm:$0xff] }
  0x6b   : > { %v3103_v25 = vld [vmem:[%s3043_s19 + $0x48] sm:$0xff] }
  0x71   : > { %1020 = vmatmul.mubr.bf16.gmra.mrb[32].mxu0 %v2619_v26  ;;  %1149 = vmatmul.mubr.bf16.gmra.mrb[32].mxu1 %v2620_v27  ;;  %v1418_v26 = vld [vmem:[%s3037_s16 + $0x50] sm:$0xff] }
  0x72   : > { %1027 = vmatprep.mubr.bf16.mxu0 %v2621_v28  ;;  %1156 = vmatprep.mubr.bf16.mxu1 %v2623_v29  ;;  %v3107_v27 = vld [vmem:[%s3043_s19 + $0x50] sm:$0xff]  ;;  %v1543_v28 = vsub.f32 %v1447_v18, %v1511_v19  ;;  %v1449_v29 = vmul.f32 0.4, %v1417_v24  ;;  %v1457_v18 = vmul.f32 0.4, %v1425_v11  ;;  %v3157_v24 = vld [vmem:[%s3043_s19 + $0x98] sm:$0xff] }
  0x73   : > { %v1521_v19 = vmul.f32 0.24, %v3147_v12  ;;  %v3195_v11 = vld [vmem:[%s3043_s19 + $0xd0] sm:$0xff] }
  0x74   : > { %3489 = vst [vmem:[#allocation9_spill] sm:$0xff] %v3195_v11 }
  0x79   : > { %1028 = vmatmul.mubr.bf16.gmra.mrb[36].mxu0 %v2625_v30  ;;  %1157 = vmatmul.mubr.bf16.gmra.mrb[36].mxu1 %v2626_v31  ;;  %v1513_v30 = vmul.f32 0.24, %v3103_v25  ;;  %v1544_v31 = vsub.f32 %v1448_v22, %v1512_v23  ;;  %v1427_v23 = vld [vmem:[%s3037_s16 + $0x98] sm:$0xff] }
  0x7a   : > { %1035 = vmatprep.mubr.bf16.mxu0 %v2627_v32  ;;  %1164 = vmatprep.mubr.bf16.mxu1 %v2629_v33  ;;  %v1450_v32 = vmul.f32 0.4, %v1418_v26  ;;  %v1514_v33 = vmul.f32 0.24, %v3107_v27  ;;  %v1428_v26 = vld [vmem:[%s3037_s16 + $0xa0] sm:$0xff] }
  0x7b   : > { %v1545_v40 = vsub.f32 %v1449_v29, %v1513_v30  ;;  %v2653_v29 = vld [vmem:[%s2788_s13 + $0x188] ss:$16 sps:$4 sm:$0xff]   ;;  %v1553_v30 = vsub.f32 %v1457_v18, %v1521_v19 }
  0x81   : > { %1036 = vmatmul.mubr.bf16.gmra.mrb[40].mxu0 %v2631_v34  ;;  %1165 = vmatmul.mubr.bf16.gmra.mrb[40].mxu1 %v2632_v35  ;;  %v1419_v34 = vld [vmem:[%s3037_s16 + $0x58] sm:$0xff] }
  0x82   : > { %1043 = vmatprep.mubr.bf16.mxu0 %v2633_v36  ;;  %1172 = vmatprep.mubr.bf16.mxu1 %v2635_v37  ;;  %v3113_v35 = vld [vmem:[%s3043_s19 + $0x58] sm:$0xff]  ;;  %v1420_v36 = vld [vmem:[%s3037_s16 + $0x60] sm:$0xff]  ;;  %v1451_v41 = vmul.f32 0.4, %v1419_v34 }
  0x83   : > { %v3117_v37 = vld [vmem:[%s3043_s19 + $0x60] sm:$0xff] }
  0x84   : > { %v1516_v46 = vmul.f32 0.24, %v3117_v37 }
  0x89   : > { %1044 = vmatmul.mubr.bf16.gmra.mrb[44].mxu0 %v2637_v42  ;;  %1173 = vmatmul.mubr.bf16.gmra.mrb[44].mxu1 %v2638_v43  ;;  %v1515_v42 = vmul.f32 0.24, %v3113_v35  ;;  %v2648_v43 = vld [vmem:[%s2788_s13 + $0x16c] ss:$16 sps:$4 sm:$0xff]  }
  0x8a   : > { %1180 = vmatprep.mubr.bf16.mxu1 %v2639_v44  ;;  %2447 = vmatprep.mubr.f32.mxu0 %v1536_v45  ;;  %v1546_v44 = vsub.f32 %v1450_v32, %v1514_v33  ;;  %v1452_v45 = vmul.f32 0.4, %v1420_v36  ;;  %v1523_v32 = vmul.f32 0.24, %v3157_v24  ;;  %v2654_v33 = vld [vmem:[%s2788_s13 + $0x1ac] ss:$16 sps:$4 sm:$0xff]  }
  0x8b   : > { %v1547_v53 = vsub.f32 %v1451_v41, %v1515_v42  ;;  %v1460_v36 = vmul.f32 0.4, %v1428_v26  ;;  %v3169_v41 = vld [vmem:[%s3043_s19 + $0xa8] sm:$0xff]  ;;  %v1430_v42 = vld [vmem:[%s3037_s16 + $0xb0] sm:$0xff]  ;;  %v1436_v26 = vld [vmem:[%s3037_s16 + $0xe0] sm:$0xff] }
  0x8c   : > { %3484 = vst [vmem:[#allocation4_spill] sm:$0xff] %v3169_v41 }
  0x91   : > { %1181 = vmatmul.mubr.bf16.gmra.mrb[48].mxu1 %v2641_v58  ;;  %2448 = vmatmul.mubr.f32.vlgmr.msra.gmra.mrb[48].mxu0 %v1537_v59  ;;  %v1548_v58 = vsub.f32 %v1452_v45, %v1516_v46  ;;  %v1454_v59 = vmul.f32 0.4, %v1422_v51  ;;  %v1525_v46 = vmul.f32 0.24, %v3169_v41  ;;  %v1462_v51 = vmul.f32 0.4, %v1430_v42 }
  0x92   : > { %2450 = vmatprep.mubr.f32.mxu0 %v1538_v63  ;;  %1188 = vmatprep.mubr.bf16.mxu1 %v2642_v62  ;;  %v3135_v62 = vld [vmem:[%s3043_s19 + $0x78] sm:$0xff]  ;;  %v1424_v63 = vld [vmem:[%s3037_s16 + $0x80] sm:$0xff]  ;;  %v1437_v42 = vld [vmem:[%s3037_s16 + $0xe8] sm:$0xff] }
  0x93   : > { %v1550_v8 = vsub.f32 %v1454_v59, %v1518_v60  ;;  %v3183_v59 = vld [vmem:[%s3043_s19 + $0xc0] sm:$0xff]  ;;  %v2656_v60 = vld [vmem:[%s2788_s13 + $0x1a8] ss:$16 sps:$4 sm:$0xff]   ;;  %v1318_v41 = vld [vmem:[%s3291_s20 + $0x30] sm:$0xff] }
  0x94   : > { %3487 = vst [vmem:[#allocation7_spill] sm:$0xff] %v3183_v59 }
  0x95   : > { %2451 = vmatmul.mubr.f32.gmra.mrb[50].mxu0 %v1539_v6  ;;  %v1519_v6 = vmul.f32 0.24, %v3135_v62 }
  0x96   : > { %2453 = vmatprep.mubr.f32.mxu0 %v1540_v9  ;;  %v1456_v9 = vmul.f32 0.4, %v1424_v63  ;;  %v1463_v63 = vmul.f32 0.4, %v1431_v54 }
  0x99   : > { %1189 = vmatmul.mubr.bf16.gmra.mrb[52].mxu1 %v2644_v16  ;;  %2454 = vmatmul.mubr.f32.gmra.mrb[52].mxu0 %v1541_v17  ;;  %v3151_v16 = vld [vmem:[%s3043_s19 + $0x90] sm:$0xff]  ;;  %v1551_v17 = vsub.f32 %v1455_v4, %v1519_v6 }
  0x9a   : > { %2456 = vmatprep.mubr.f32.mxu0 %v1542_v21  ;;  %1196 = vmatprep.mubr.bf16.mxu1 %v2645_v20  ;;  %v1552_v20 = vsub.f32 %v1456_v9, %v1520_v10  ;;  %v1458_v21 = vmul.f32 0.4, %v1426_v14  ;;  %v1522_v22 = vmul.f32 0.24, %v3151_v16  ;;  %v3191_v9 = vld [vmem:[%s3043_s19 + $0xc8] sm:$0xff]  ;;  %v1434_v10 = vld [vmem:[%s3037_s16 + $0xd0] sm:$0xff] }
  0x9b   : > { %3488 = vst [vmem:[#allocation8_spill] sm:$0xff] %v3191_v9  ;;  %v1529_v18 = vmul.f32 0.24, %v3191_v9 }
  0x9c   : > { %v1554_v34 = vsub.f32 %v1458_v21, %v1522_v22  ;;  %v1530_v21 = vmul.f32 0.24, %v3195_v11  ;;  %v1435_v22 = vld [vmem:[%s3037_s16 + $0xd8] sm:$0xff] }
  0x9d   : > { %2457 = vmatmul.mubr.f32.gmra.mrb[54].mxu0 %v1543_v28  ;;  %v3161_v28 = vld [vmem:[%s3043_s19 + $0xa0] sm:$0xff] }
  0x9e   : > { %2459 = vmatprep.mubr.f32.mxu0 %v1544_v31  ;;  %3483 = vst [vmem:[#allocation3_spill] sm:$0xff] %v3161_v28  ;;  %v1459_v31 = vmul.f32 0.4, %v1427_v23  ;;  %v3201_v23 = vld [vmem:[%s3043_s19 + $0xd8] sm:$0xff] }
  0x9f   : > { %3490 = vst [vmem:[#allocation10_spill] sm:$0xff] %v3201_v23 }
  0xa1   : > { %1197 = vmatmul.mubr.bf16.gmra.mrb[56].mxu1 %v2647_v38  ;;  %2460 = vmatmul.mubr.f32.gmra.mrb[56].mxu0 %v1545_v40  ;;  %v1524_v38 = vmul.f32 0.24, %v3161_v28  ;;  %v1429_v40 = vld [vmem:[%s3037_s16 + $0xa8] sm:$0xff]  ;;  %v1316_v28 = vld [vmem:[%s3291_s20 + $0x20] sm:$0xff] }
  0xa2   : > { %2462 = vmatprep.mubr.f32.mxu0 %v1546_v44  ;;  %1204 = vmatprep.mubr.bf16.mxu1 %v2648_v43  ;;  %v3173_v43 = vld [vmem:[%s3043_s19 + $0xb0] sm:$0xff]  ;;  %v1555_v44 = vsub.f32 %v1459_v31, %v1523_v32  ;;  %v1461_v45 = vmul.f32 0.4, %v1429_v40  ;;  %v1467_v32 = vmul.f32 0.4, %v1435_v22 }
  0xa3   : > { %3485 = vst [vmem:[#allocation5_spill] sm:$0xff] %v3173_v43  ;;  %v1556_v48 = vsub.f32 %v1460_v36, %v1524_v38  ;;  %v1468_v38 = vmul.f32 0.4, %v1436_v26 }
  0xa4   : > { %v1557_v61 = vsub.f32 %v1461_v45, %v1525_v46  ;;  %v1438_v45 = vld [vmem:[%s3037_s16 + $0xf0] sm:$0xff] }
  0xa5   : > { %2463 = vmatmul.mubr.f32.gmra.mrb[58].mxu0 %v1547_v53  ;;  %v1526_v53 = vmul.f32 0.24, %v3173_v43  ;;  %v3217_v46 = vld [vmem:[%s3043_s19 + $0xf0] sm:$0xff] }
  0xa6   : > { %2465 = vmatprep.mubr.f32.mxu0 %v1548_v58  ;;  %v1432_v58 = vld [vmem:[%s3037_s16 + $0xc0] sm:$0xff]  ;;  %3493 = vst [vmem:[#allocation13_spill] sm:$0xff] %v3217_v46 }
  0xa7   : > { %v1558_v4 = vsub.f32 %v1462_v51, %v1526_v53  ;;  %v1464_v6 = vmul.f32 0.4, %v1432_v58  ;;  %v1469_v51 = vmul.f32 0.4, %v1437_v42  ;;  %v1470_v58 = vmul.f32 0.4, %v1438_v45 }
  0xa9   : > { %1205 = vmatmul.mubr.bf16.gmra.mrb[60].mxu1 %v2650_v1  ;;  %2466 = vmatmul.mubr.f32.gmra.mrb[60].mxu0 %v1549_v2  ;;  %v1527_v1 = vmul.f32 0.24, %v3179_v56  ;;  %v2657_v2 = vld [vmem:[%s2788_s13 + $0x1cc] ss:$16 sps:$4 sm:$0xff]  }
  0xaa   : > { %2468 = vmatprep.mubr.f32.mxu0 %v1550_v8  ;;  %1212 = vmatprep.mubr.bf16.mxu1 %v2651_v7  ;;  %v1528_v7 = vmul.f32 0.24, %v3183_v59  ;;  %v1433_v8 = vld [vmem:[%s3037_s16 + $0xc8] sm:$0xff]  ;;  %v1315_v56 = vld [vmem:[%s3291_s20 + $0x18] sm:$0xff] }
  0xab   : > { %v1559_v14 = vsub.f32 %v1463_v63, %v1527_v1  ;;  %v3223_v63 = vld [vmem:[%s3043_s19 + $0xf8] sm:$0xff] }
  0xac   : > { %v1560_v19 = vsub.f32 %v1464_v6, %v1528_v7  ;;  %3494 = vst [vmem:[#allocation14_spill] sm:$0xff] %v3223_v63  ;;  %v2662_v1 = vld [vmem:[%s2788_s13 + $0x1e8] ss:$16 sps:$4 sm:$0xff]   ;;  %v1535_v6 = vmul.f32 0.24, %v3223_v63 }
  0xad   : > { %2469 = vmatmul.mubr.f32.gmra.mrb[62].mxu0 %v1551_v17  ;;  %v1465_v17 = vmul.f32 0.4, %v1433_v8 }
  0xae   : > { %2471 = vmatprep.mubr.f32.mxu0 %v1552_v20  ;;  %v1466_v20 = vmul.f32 0.4, %v1434_v10 }
  0xaf   : > { %v1561_v31 = vsub.f32 %v1465_v17, %v1529_v18 }
  0xb0   : > { %v1562_v36 = vsub.f32 %v1466_v20, %v1530_v21 }
  0xb1   : > { %1213 = vmatmul.mubr.bf16.gmra.mrb[64].mxu1 %v2653_v29  ;;  %2472 = vmatmul.mubr.f32.gmra.mrb[64].mxu0 %v1553_v30  ;;  %v3205_v29 = vld [vmem:[%s3043_s19 + $0xe0] sm:$0xff]  ;;  %v2659_v30 = vld [vmem:[%s2788_s13 + $0x1c8] ss:$16 sps:$4 sm:$0xff]  }
  0xb2   : > { %2474 = vmatprep.mubr.f32.mxu0 %v1554_v34  ;;  %1220 = vmatprep.mubr.bf16.mxu1 %v2654_v33  ;;  %3491 = vst [vmem:[#allocation11_spill] sm:$0xff] %v3205_v29  ;;  %v1531_v33 = vmul.f32 0.24, %v3201_v23  ;;  %v2660_v34 = vld [vmem:[%s2788_s13 + $0x1ec] ss:$16 sps:$4 sm:$0xff]  }
  0xb3   : > { %v1532_v40 = vmul.f32 0.24, %v3205_v29 }
  0xb5   : > { %2475 = vmatmul.mubr.f32.gmra.mrb[66].mxu0 %v1555_v44  ;;  %v3213_v44 = vld [vmem:[%s3043_s19 + $0xe8] sm:$0xff]  ;;  %v1564_v54 = vsub.f32 %v1468_v38, %v1532_v40 }
  0xb6   : > { %2477 = vmatprep.mubr.f32.mxu0 %v1556_v48  ;;  %3492 = vst [vmem:[#allocation12_spill] sm:$0xff] %v3213_v44  ;;  %v1563_v48 = vsub.f32 %v1467_v32, %v1531_v33  ;;  %v1533_v53 = vmul.f32 0.24, %v3213_v44 }
  0xb9   : > { %1221 = vmatmul.mubr.bf16.gmra.mrb[68].mxu1 %v2656_v60  ;;  %2478 = vmatmul.mubr.f32.gmra.mrb[68].mxu0 %v1557_v61  ;;  %v1534_v60 = vmul.f32 0.24, %v3217_v46  ;;  %v1439_v61 = vld [vmem:[%s3037_s16 + $0xf8] sm:$0xff] }
  0xba   : > { %2480 = vmatprep.mubr.f32.mxu0 %v1558_v4  ;;  %1228 = vmatprep.mubr.bf16.mxu1 %v2657_v2  ;;  %v1565_v2 = vsub.f32 %v1469_v51, %v1533_v53  ;;  %v1471_v4 = vmul.f32 0.4, %v1439_v61 }
  0xbb   : > { %v1566_v7 = vsub.f32 %v1470_v58, %v1534_v60 }
  0xbc   : > { %v1567_v8 = vsub.f32 %v1471_v4, %v1535_v6 }
  0xbd   : > { %2481 = vmatmul.mubr.f32.gmra.mrb[70].mxu0 %v1559_v14 }
  0xbe   : > { %2483 = vmatprep.mubr.f32.mxu0 %v1560_v19 }
  0xc1   : > { %1229 = vmatmul.mubr.bf16.gmra.mrb[72].mxu1 %v2659_v30  ;;  %2484 = vmatmul.mubr.f32.gmra.mrb[72].mxu0 %v1561_v31 }
  0xc2   : > { %2486 = vmatprep.mubr.f32.mxu0 %v1562_v36  ;;  %1236 = vmatprep.mubr.bf16.mxu1 %v2660_v34 }
  0xc5   : > { %2487 = vmatmul.mubr.f32.gmra.mrb[74].mxu0 %v1563_v48 }
  0xc6   : > { %2489 = vmatprep.mubr.f32.mxu0 %v1564_v54 }
  0xc9   : > { %1237 = vmatmul.mubr.bf16.gmra.mrb[76].mxu1 %v2662_v1  ;;  %2490 = vmatmul.mubr.f32.gmra.mrb[76].mxu0 %v1565_v2 }
  0xca   : > { %2492 = vmatprep.mubr.f32.mxu0 %v1566_v7 }
  0xcd   : > { %2493 = vmatmul.mubr.f32.gmra.mrb[78].mxu0 %v1567_v8 }
 0x104   : > { %v2231_v10 = vpop.f32.mrb[0].mxu1  ;;  %v2159_v14 = vpop.f32.mrb[0].mxu0 }
 0x105   : > { %v2232_v17 = vpop.f32.mrb[1].mxu1  ;;  %v2160_v18 = vpop.f32.mrb[1].mxu0 }
 0x106   : > { %v3227_v19 = vadd.f32 %v2232_v17, %v2231_v10  ;;  %v2234_v20 = vpop.f32.mrb[2].mxu1  ;;  %v2161_v21 = vadd.f32 %v2160_v18, %v2159_v14  ;;  %v2162_v22 = vpop.f32.mrb[2].mxu0 }
 0x107   : > { %v2235_v26 = vpop.f32.mrb[3].mxu1  ;;  %v2163_v30 = vpop.f32.mrb[3].mxu0 }
 0x108   : > { %v3229_v31 = vadd.f32 %v2235_v26, %v2234_v20  ;;  %v2164_v32 = vadd.f32 %v2163_v30, %v2162_v22 }
 0x10c   : > { %v2237_v33 = vpop.f32.mrb[4].mxu1  ;;  %v2165_v34 = vpop.f32.mrb[4].mxu0 }
 0x10d   : > { %v2238_v36 = vpop.f32.mrb[5].mxu1  ;;  %v2166_v38 = vpop.f32.mrb[5].mxu0 }
 0x10e   : > { %v3231_v40 = vadd.f32 %v2238_v36, %v2237_v33  ;;  %v2240_v42 = vpop.f32.mrb[6].mxu1  ;;  %v2167_v45 = vadd.f32 %v2166_v38, %v2165_v34  ;;  %v2168_v48 = vpop.f32.mrb[6].mxu0 }
 0x10f   : > { %v2241_v51 = vpop.f32.mrb[7].mxu1  ;;  %v2169_v53 = vpop.f32.mrb[7].mxu0 }
 0x110   : > { %3495 = vst [vmem:[#allocation15_spill] sm:$0xff] %v3231_v40  ;;  %v3233_v54 = vadd.f32 %v2241_v51, %v2240_v42  ;;  %v2170_v58 = vadd.f32 %v2169_v53, %v2168_v48 }
 0x112   : > { %3496 = vst [vmem:[#allocation16_spill] sm:$0xff] %v3233_v54 }
 0x114   : > { %v2243_v60 = vpop.f32.mrb[8].mxu1  ;;  %v2171_v61 = vpop.f32.mrb[8].mxu0 }
 0x115   : > { %v2244_v1 = vpop.f32.mrb[9].mxu1  ;;  %v2172_v2 = vpop.f32.mrb[9].mxu0 }
 0x116   : > { %v3235_v4 = vadd.f32 %v2244_v1, %v2243_v60  ;;  %v2246_v6 = vpop.f32.mrb[10].mxu1  ;;  %v2173_v7 = vadd.f32 %v2172_v2, %v2171_v61  ;;  %v2174_v8 = vpop.f32.mrb[10].mxu0 }
 0x117   : > { %v2247_v10 = vpop.f32.mrb[11].mxu1  ;;  %v2175_v14 = vpop.f32.mrb[11].mxu0 }
 0x118   : > { %3497 = vst [vmem:[#allocation17_spill] sm:$0xff] %v3235_v4  ;;  %v3237_v17 = vadd.f32 %v2247_v10, %v2246_v6  ;;  %v2176_v18 = vadd.f32 %v2175_v14, %v2174_v8 }
 0x11a   : > { %3498 = vst [vmem:[#allocation18_spill] sm:$0xff] %v3237_v17 }
 0x11c   : > { %v2249_v20 = vpop.f32.mrb[12].mxu1  ;;  %v2177_v22 = vpop.f32.mrb[12].mxu0 }
 0x11d   : > { %v2250_v26 = vpop.f32.mrb[13].mxu1  ;;  %v2178_v30 = vpop.f32.mrb[13].mxu0 }
 0x11e   : > { %v3239_v33 = vadd.f32 %v2250_v26, %v2249_v20  ;;  %v2252_v34 = vpop.f32.mrb[14].mxu1  ;;  %v2179_v36 = vadd.f32 %v2178_v30, %v2177_v22  ;;  %v2180_v38 = vpop.f32.mrb[14].mxu0 }
 0x11f   : > { %v2253_v42 = vpop.f32.mrb[15].mxu1  ;;  %v2181_v48 = vpop.f32.mrb[15].mxu0 }
 0x120   : > { %3499 = vst [vmem:[#allocation19_spill] sm:$0xff] %v3239_v33  ;;  %v3241_v51 = vadd.f32 %v2253_v42, %v2252_v34  ;;  %v2182_v53 = vadd.f32 %v2181_v48, %v2180_v38 }
 0x122   : > { %3500 = vst [vmem:[#allocation20_spill] sm:$0xff] %v3241_v51 }
 0x124   : > { %v2271_v60 = vpop.f32.mrb[16].mxu1  ;;  %v2183_v61 = vpop.f32.mrb[16].mxu0 }
 0x125   : > { %v2272_v1 = vpop.f32.mrb[17].mxu1  ;;  %v2184_v2 = vpop.f32.mrb[17].mxu0 }
 0x126   : > { %v2273_v6 = vadd.f32 %v2272_v1, %v2271_v60  ;;  %v2274_v8 = vpop.f32.mrb[18].mxu1  ;;  %v2185_v10 = vadd.f32 %v2184_v2, %v2183_v61  ;;  %v2186_v14 = vpop.f32.mrb[18].mxu0 }
 0x127   : > { %v2275_v63 = vpop.f32.mrb[19].mxu1  ;;  %v2187_v46 = vpop.f32.mrb[19].mxu0 }
 0x128   : > { %v3243_v20 = vadd.f32 %v2273_v6, %v2161_v21  ;;  %v2276_v26 = vadd.f32 %v2275_v63, %v2274_v8  ;;  %v2188_v22 = vadd.f32 %v2187_v46, %v2186_v14 }
 0x12a   : > { %v3245_v30 = vadd.f32 %v2276_v26, %v2164_v32 }
 0x12c   : > { %v2277_v33 = vpop.f32.mrb[20].mxu1  ;;  %v2189_v34 = vpop.f32.mrb[20].mxu0 }
 0x12d   : > { %v2278_v42 = vpop.f32.mrb[21].mxu1  ;;  %v2190_v38 = vpop.f32.mrb[21].mxu0 }
 0x12e   : > { %v2279_v48 = vadd.f32 %v2278_v42, %v2277_v33  ;;  %v2280_v51 = vpop.f32.mrb[22].mxu1  ;;  %v2191_v44 = vadd.f32 %v2190_v38, %v2189_v34  ;;  %v2192_v29 = vpop.f32.mrb[22].mxu0 }
 0x12f   : > { %v2281_v60 = vpop.f32.mrb[23].mxu1  ;;  %v2193_v1 = vpop.f32.mrb[23].mxu0 }
 0x130   : > { %v3247_v61 = vadd.f32 %v2279_v48, %v2167_v45  ;;  %v2282_v2 = vadd.f32 %v2281_v60, %v2280_v51  ;;  %v2194_v17 = vadd.f32 %v2193_v1, %v2192_v29 }
 0x132   : > { %v3249_v21 = vadd.f32 %v2282_v2, %v2170_v58 }
 0x134   : > { %v2283_v63 = vpop.f32.mrb[24].mxu1  ;;  %v2195_v46 = vpop.f32.mrb[24].mxu0 }
 0x135   : > { %v2284_v32 = vpop.f32.mrb[25].mxu1  ;;  %v2196_v6 = vpop.f32.mrb[25].mxu0 }
 0x136   : > { %v2285_v8 = vadd.f32 %v2284_v32, %v2283_v63  ;;  %v2286_v14 = vpop.f32.mrb[26].mxu1  ;;  %v2197_v26 = vadd.f32 %v2196_v6, %v2195_v46  ;;  %v2198_v4 = vpop.f32.mrb[26].mxu0 }
 0x137   : > { %v2287_v33 = vpop.f32.mrb[27].mxu1  ;;  %v2199_v42 = vpop.f32.mrb[27].mxu0 }
 0x138   : > { %v3251_v34 = vadd.f32 %v2285_v8, %v2173_v7  ;;  %v2288_v38 = vadd.f32 %v2287_v33, %v2286_v14  ;;  %v2200_v11 = vadd.f32 %v2199_v42, %v2198_v4 }
 0x13a   : > { %v3253_v45 = vadd.f32 %v2288_v38, %v2176_v18 }
 0x13c   : > { %v2289_v51 = vpop.f32.mrb[28].mxu1  ;;  %v2201_v29 = vpop.f32.mrb[28].mxu0 }
 0x13d   : > { %v2290_v58 = vpop.f32.mrb[29].mxu1  ;;  %v2202_v48 = vpop.f32.mrb[29].mxu0 }
 0x13e   : > { %v2291_v60 = vadd.f32 %v2290_v58, %v2289_v51  ;;  %v2292_v1 = vpop.f32.mrb[30].mxu1  ;;  %v3255_v2 = vadd.f32 %v2202_v48, %v2201_v29  ;;  %v2204_v63 = vpop.f32.mrb[30].mxu0 }
 0x13f   : > { %v2293_v32 = vpop.f32.mrb[31].mxu1  ;;  %v2205_v46 = vpop.f32.mrb[31].mxu0 }
 0x140   : > { %v3257_v6 = vadd.f32 %v2291_v60, %v2179_v36  ;;  %v2294_v23 = vadd.f32 %v2293_v32, %v2292_v1  ;;  %v3259_v7 = vadd.f32 %v2205_v46, %v2204_v63 }
 0x142   : > { %v3261_v8 = vadd.f32 %v2294_v23, %v2182_v53 }
 0x144   : > { %v2295_v4 = vpop.f32.mrb[32].mxu1  ;;  %v2207_v18 = vpop.f32.mrb[32].mxu0 }
 0x145   : > { %v2296_v14 = vpop.f32.mrb[33].mxu1  ;;  %v2208_v33 = vpop.f32.mrb[33].mxu0 }
 0x146   : > { %v2297_v42 = vadd.f32 %v2296_v14, %v2295_v4  ;;  %v2298_v38 = vpop.f32.mrb[34].mxu1  ;;  %v3263_v51 = vadd.f32 %v2208_v33, %v2207_v18  ;;  %v2210_v29 = vpop.f32.mrb[34].mxu0 }
 0x147   : > { %v2299_v58 = vpop.f32.mrb[35].mxu1  ;;  %v2211_v48 = vpop.f32.mrb[35].mxu0 }
 0x148   : > { %v3265_v59 = vadd.f32 %v2297_v42, %v2185_v10  ;;  %v2300_v36 = vadd.f32 %v2299_v58, %v2298_v38  ;;  %v3267_v60 = vadd.f32 %v2211_v48, %v2210_v29 }
 0x14a   : > { %v3269_v1 = vadd.f32 %v2300_v36, %v2188_v22 }
 0x14c   : > { %v2301_v23 = vpop.f32.mrb[36].mxu1  ;;  %v2213_v53 = vpop.f32.mrb[36].mxu0 }
 0x14d   : > { %v2302_v63 = vpop.f32.mrb[37].mxu1  ;;  %v2214_v32 = vpop.f32.mrb[37].mxu0 }
 0x14e   : > { %v2303_v46 = vadd.f32 %v2302_v63, %v2301_v23  ;;  %v2304_v9 = vpop.f32.mrb[38].mxu1  ;;  %v3271_v4 = vadd.f32 %v2214_v32, %v2213_v53  ;;  %v2216_v18 = vpop.f32.mrb[38].mxu0 }
 0x14f   : > { %v2305_v14 = vpop.f32.mrb[39].mxu1  ;;  %v2217_v33 = vpop.f32.mrb[39].mxu0 }
 0x150   : > { %v3273_v54 = vadd.f32 %v2303_v46, %v2191_v44  ;;  %v2306_v10 = vadd.f32 %v2305_v14, %v2304_v9  ;;  %v3275_v42 = vadd.f32 %v2217_v33, %v2216_v18  ;;  %v1313_v14 = vld [vmem:[%s3291_s20 + $0x8] sm:$0xff] }
 0x152   : > { %v3277_v38 = vadd.f32 %v2306_v10, %v2194_v17  ;;  %v1312_v10 = vld [vmem:[%s3291_s20] sm:$0xff] }
 0x154   : > { %v2307_v22 = vpop.f32.mrb[40].mxu1  ;;  %v2219_v29 = vpop.f32.mrb[40].mxu0 }
 0x155   : > { %v2308_v58 = vpop.f32.mrb[41].mxu1  ;;  %v2220_v48 = vpop.f32.mrb[41].mxu0 }
 0x156   : > { %v2309_v36 = vadd.f32 %v2308_v58, %v2307_v22  ;;  %v2310_v23 = vpop.f32.mrb[42].mxu1  ;;  %v3279_v63 = vadd.f32 %v2220_v48, %v2219_v29  ;;  %v2222_v53 = vpop.f32.mrb[42].mxu0 }
 0x157   : > { %v2311_v32 = vpop.f32.mrb[43].mxu1  ;;  %v2223_v40 = vpop.f32.mrb[43].mxu0 }
 0x158   : > { %v3281_v43 = vadd.f32 %v2309_v36, %v2197_v26  ;;  %v2312_v44 = vadd.f32 %v2311_v32, %v2310_v23  ;;  %v3283_v9 = vadd.f32 %v2223_v40, %v2222_v53  ;;  %v1377_v36 = vadd.f32 %v1313_v14, %v3245_v30 }
 0x159   : > { %v1379_v30 = vadd.f32 %v1315_v56, %v3249_v21  ;;  %v1844_v21 = vmul.f32 0.6, %v3069_v55 }
 0x15a   : > { %v3285_v46 = vadd.f32 %v2312_v44, %v2200_v11  ;;  %v1376_v44 = vadd.f32 %v1312_v10, %v3243_v20  ;;  %v1317_v20 = vld [vmem:[%s3291_s20 + $0x28] sm:$0xff] }
 0x15c   : > { %v2313_v17 = vpop.f32.mrb[44].mxu1  ;;  %v2225_v18 = vpop.f32.mrb[44].mxu0 }
 0x15d   : > { %v2314_v33 = vpop.f32.mrb[45].mxu1  ;;  %v2226_v26 = vpop.f32.mrb[45].mxu0 }
 0x15e   : > { %v2315_v22 = vadd.f32 %v2314_v33, %v2313_v17  ;;  %v2316_v40 = vpop.f32.mrb[46].mxu1  ;;  %v3295_v29 = vadd.f32 %v2226_v26, %v2225_v18  ;;  %v2228_v11 = vpop.f32.mrb[46].mxu0  ;;  %v1314_v17 = vld [vmem:[%s3291_s20 + $0x10] sm:$0xff]  ;;  %v1585_v33 = vmul.f32 0.5, %v1377_v36  ;;  %v1842_v26 = vmul.f32 0.6, %v3059_v47 }
 0x15f   : > { %v2317_v58 = vpop.f32.mrb[47].mxu1  ;;  %v2229_v48 = vpop.f32.mrb[47].mxu0 }
 0x160   : > { %v3299_v23 = vadd.f32 %v2315_v22, %v3255_v2  ;;  %v2318_v53 = vadd.f32 %v2317_v58, %v2316_v40  ;;  %v3301_v32 = vadd.f32 %v2229_v48, %v2228_v11  ;;  %v1378_v2 = vadd.f32 %v1314_v17, %v3247_v61 }
 0x161   : > { %v1584_v40 = vmul.f32 0.5, %v1376_v44  ;;  %v1841_v11 = vmul.f32 0.6, %v3051_v39  ;;  %v1843_v39 = vmul.f32 0.6, %v3063_v49  ;;  %v1381_v17 = vadd.f32 %v1317_v20, %v3253_v45 }
 0x162   : > { %v3307_v18 = vadd.f32 %v2318_v53, %v3259_v7  ;;  %v1587_v53 = vmul.f32 0.5, %v1379_v30  ;;  %v1586_v44 = vmul.f32 0.5, %v1378_v2 }
 0x163   : > { %v1589_v2 = vmul.f32 0.5, %v1381_v17 }
 0x164   : > { %v2319_v14 = vpop.f32.mrb[48].mxu1  ;;  %v2449_v22 = vpop.f32.mrb[48].mxu0 }
 0x165   : > { %v1688_v10 = vadd.f32 %v2449_v22, %v1585_v33  ;;  %v2320_v58 = vpop.f32.mrb[49].mxu1  ;;  %v1682_v48 = vpop.f32.mrb[49].mxu0 }
 0x166   : > { %v2321_v47 = vadd.f32 %v2320_v58, %v2319_v14  ;;  %v1683_v56 = vadd.f32 %v1682_v48, %v1584_v40  ;;  %v2322_v61 = vpop.f32.mrb[50].mxu1  ;;  %v1380_v40 = vadd.f32 %v1316_v28, %v3251_v34  ;;  %v1319_v48 = vld [vmem:[%s3291_s20 + $0x38] sm:$0xff]  ;;  %v1382_v34 = vadd.f32 %v1318_v41, %v3257_v6 }
 0x167   : > { %v1874_v7 = vadd.f32 %v1842_v26, %v1688_v10  ;;  %v2323_v36 = vpop.f32.mrb[51].mxu1  ;;  %v1383_v28 = vadd.f32 %v1319_v48, %v3261_v8  ;;  %v1848_v41 = vmul.f32 0.6, %v3091_v13  ;;  %v1847_v6 = vmul.f32 0.6, %v3085_v5 }
 0x168   : > { %v3325_v33 = vadd.f32 %v2321_v47, %v3263_v51  ;;  %v1873_v22 = vadd.f32 %v1841_v11, %v1683_v56  ;;  %v2324_v14 = vadd.f32 %v2323_v36, %v2322_v61  ;;  %v2452_v58 = vpop.f32.mrb[50].mxu0  ;;  %v1846_v51 = vmul.f32 0.6, %v3081_v3  ;;  %v1321_v61 = vld [vmem:[%s3291_s20 + $0x48] sm:$0xff] }
 0x169   : > { %1906 = vst [vmem:[%s3319_s26 + $0x8] sm:$0xff] %v1874_v7  ;;  %v1698_v49 = vadd.f32 %v2452_v58, %v1587_v53  ;;  %v1692_v55 = vpop.f32.mrb[51].mxu0  ;;  %v1588_v47 = vmul.f32 0.5, %v1380_v40  ;;  %v1845_v56 = vmul.f32 0.6, %v3073_v57  ;;  %v1320_v53 = vld [vmem:[%s3291_s20 + $0x40] sm:$0xff] }
 0x16a   : > { %1905 = vst [vmem:[%s3319_s26] sm:$0xff] %v1873_v22  ;;  %v3333_v26 = vadd.f32 %v2324_v14, %v3267_v60  ;;  %v1693_v45 = vadd.f32 %v1692_v55, %v1586_v44  ;;  %v1591_v44 = vmul.f32 0.5, %v1383_v28  ;;  %v1590_v17 = vmul.f32 0.5, %v1382_v34  ;;  %v1323_v55 = vld [vmem:[%s3291_s20 + $0x58] sm:$0xff] }
 0x16b   : > { %v1876_v30 = vadd.f32 %v1844_v21, %v1698_v49  ;;  %v1385_v22 = vadd.f32 %v1321_v61, %v3269_v1  ;;  %v1384_v49 = vadd.f32 %v1320_v53, %v3265_v59  ;;  %v1387_v59 = vadd.f32 %v1323_v55, %v3277_v38 }
 0x16c   : > { %v1875_v11 = vadd.f32 %v1843_v39, %v1693_v45  ;;  %v2325_v20 = vpop.f32.mrb[52].mxu1  ;;  %v2455_v10 = vpop.f32.mrb[52].mxu0  ;;  %v1322_v45 = vld [vmem:[%s3291_s20 + $0x50] sm:$0xff]  ;;  %v1851_v53 = vmul.f32 0.6, %v3107_v27 }
 0x16d   : > { %1908 = vst [vmem:[%s3319_s26 + $0x18] sm:$0xff] %v1876_v30  ;;  %v1708_v60 = vadd.f32 %v2455_v10, %v1589_v2  ;;  %v2326_v7 = vpop.f32.mrb[53].mxu1  ;;  %v1702_v36 = vpop.f32.mrb[53].mxu0  ;;  %v1593_v2 = vmul.f32 0.5, %v1385_v22  ;;  %v1386_v28 = vadd.f32 %v1322_v45, %v3273_v54  ;;  %v1592_v10 = vmul.f32 0.5, %v1384_v49  ;;  %v1327_v22 = vld [vmem:[%s3291_s20 + $0x78] sm:$0xff] }
 0x16e   : > { %1907 = vst [vmem:[%s3319_s26 + $0x10] sm:$0xff] %v1875_v11  ;;  %v2327_v3 = vadd.f32 %v2326_v7, %v2325_v20  ;;  %v1703_v21 = vadd.f32 %v1702_v36, %v1588_v47  ;;  %v2328_v8 = vpop.f32.mrb[54].mxu1  ;;  %v1849_v47 = vmul.f32 0.6, %v3095_v15  ;;  %v1324_v7 = vld [vmem:[%s3291_s20 + $0x60] sm:$0xff] }
 0x16f   : > { %v1878_v39 = vadd.f32 %v1846_v51, %v1708_v60  ;;  %v2329_v57 = vpop.f32.mrb[55].mxu1  ;;  %v1852_v54 = vmul.f32 0.6, %v3113_v35 }
 0x170   : > { %v3347_v14 = vadd.f32 %v2327_v3, %v3271_v4  ;;  %v1877_v58 = vadd.f32 %v1845_v56, %v1703_v21  ;;  %v2330_v40 = vadd.f32 %v2329_v57, %v2328_v8  ;;  %v2458_v48 = vpop.f32.mrb[54].mxu0  ;;  %v1850_v4 = vmul.f32 0.6, %v3103_v25  ;;  %v1325_v56 = vld [vmem:[%s3291_s20 + $0x68] sm:$0xff] }
 0x171   : > { %1910 = vst [vmem:[%s3319_s26 + $0x28] sm:$0xff] %v1878_v39  ;;  %v1718_v5 = vadd.f32 %v2458_v48, %v1591_v44  ;;  %v1712_v13 = vpop.f32.mrb[55].mxu0  ;;  %v1595_v21 = vmul.f32 0.5, %v1387_v59  ;;  %v1594_v8 = vmul.f32 0.5, %v1386_v28  ;;  %v1328_v28 = vld [vmem:[%s3291_s20 + $0x80] sm:$0xff] }
 0x172   : > { %1909 = vst [vmem:[%s3319_s26 + $0x20] sm:$0xff] %v1877_v58  ;;  %v3355_v51 = vadd.f32 %v2330_v40, %v3275_v42  ;;  %v1713_v1 = vadd.f32 %v1712_v13, %v1590_v17  ;;  %v1388_v17 = vadd.f32 %v1324_v7, %v3281_v43  ;;  %v1326_v58 = vld [vmem:[%s3291_s20 + $0x70] sm:$0xff]  ;;  %v1391_v43 = vadd.f32 %v1327_v22, %v3307_v18 }
 0x173   : > { %v1880_v30 = vadd.f32 %v1848_v41, %v1718_v5  ;;  %v1389_v41 = vadd.f32 %v1325_v56, %v3285_v46  ;;  %v1390_v55 = vadd.f32 %v1326_v58, %v3299_v23  ;;  %v1856_v23 = vmul.f32 0.6, %v3135_v62  ;;  %v1332_v58 = vld [vmem:[%s3291_s20 + $0xa0] sm:$0xff] }
 0x174   : > { %v1879_v34 = vadd.f32 %v1847_v6, %v1713_v1  ;;  %v2331_v11 = vpop.f32.mrb[56].mxu1  ;;  %v2461_v20 = vpop.f32.mrb[56].mxu0  ;;  %v1596_v1 = vmul.f32 0.5, %v1388_v17 }
 0x175   : > { %1912 = vst [vmem:[%s3319_s26 + $0x38] sm:$0xff] %v1880_v30  ;;  %v1728_v42 = vadd.f32 %v2461_v20, %v1593_v2  ;;  %v2332_v61 = vpop.f32.mrb[57].mxu1  ;;  %v1722_v60 = vpop.f32.mrb[57].mxu0  ;;  %v1597_v49 = vmul.f32 0.5, %v1389_v41  ;;  %v1329_v30 = vld [vmem:[%s3291_s20 + $0x88] sm:$0xff] }
 0x176   : > { %1911 = vst [vmem:[%s3319_s26 + $0x30] sm:$0xff] %v1879_v34  ;;  %v2333_v25 = vadd.f32 %v2332_v61, %v2331_v11  ;;  %v1723_v36 = vadd.f32 %v1722_v60, %v1592_v10  ;;  %v2334_v38 = vpop.f32.mrb[58].mxu1  ;;  %v1855_v11 = vmul.f32 0.6, %v3129_v52  ;;  %v1599_v10 = vmul.f32 0.5, %v1391_v43 }
 0x177   : > { %v1882_v3 = vadd.f32 %v1850_v4, %v1728_v42  ;;  %v2335_v15 = vpop.f32.mrb[59].mxu1  ;;  %v1853_v4 = vmul.f32 0.6, %v3117_v37  ;;  %v1393_v56 = vadd.f32 %v1329_v30, %v3333_v26  ;;  %v1858_v26 = vmul.f32 0.6, %v3147_v12 }
 0x178   : > { %v3369_v6 = vadd.f32 %v2333_v25, %v3279_v63  ;;  %v1881_v39 = vadd.f32 %v1849_v47, %v1723_v36  ;;  %v2336_v57 = vadd.f32 %v2335_v15, %v2334_v38  ;;  %v2464_v44 = vpop.f32.mrb[58].mxu0  ;;  %v1854_v63 = vmul.f32 0.6, %v3125_v50  ;;  %v1331_v36 = vld [vmem:[%s3291_s20 + $0x98] sm:$0xff]  ;;  %v1330_v38 = vld [vmem:[%s3291_s20 + $0x90] sm:$0xff] }
 0x179   : > { %1914 = vst [vmem:[%s3319_s26 + $0x48] sm:$0xff] %v1882_v3  ;;  %v1738_v27 = vadd.f32 %v2464_v44, %v1595_v21  ;;  %v1732_v35 = vpop.f32.mrb[59].mxu0  ;;  %v1598_v47 = vmul.f32 0.5, %v1390_v55  ;;  %v1392_v25 = vadd.f32 %v1328_v28, %v3325_v33  ;;  %v1601_v3 = vmul.f32 0.5, %v1393_v56  ;;  %v1333_v44 = vld [vmem:[%s3291_s20 + $0xa8] sm:$0xff]  ;;  %v1336_v56 = vld [vmem:[%s3291_s20 + $0xc0] sm:$0xff] }
 0x17a   : > { %1913 = vst [vmem:[%s3319_s26 + $0x40] sm:$0xff] %v1881_v39  ;;  %v3377_v40 = vadd.f32 %v2336_v57, %v3283_v9  ;;  %v1733_v46 = vadd.f32 %v1732_v35, %v1594_v8  ;;  %v1395_v15 = vadd.f32 %v1331_v36, %v3355_v51  ;;  %v1394_v33 = vadd.f32 %v1330_v38, %v3347_v14  ;;  %v3504_v36 = vld [vmem:[#allocation5_spill] sm:$0xff] }
 0x17b   : > { %v1884_v48 = vadd.f32 %v1852_v54, %v1738_v27  ;;  %v1600_v39 = vmul.f32 0.5, %v1392_v25  ;;  %v1857_v57 = vmul.f32 0.6, %v3139_v0  ;;  %v1860_v14 = vmul.f32 0.6, %v3157_v24  ;;  %v3503_v25 = vld [vmem:[#allocation6_spill] sm:$0xff] }
 0x17c   : > { %v1883_v45 = vadd.f32 %v1851_v53, %v1733_v46  ;;  %v2337_v5 = vpop.f32.mrb[60].mxu1  ;;  %v2467_v13 = vpop.f32.mrb[60].mxu0  ;;  %v1859_v35 = vmul.f32 0.6, %v3151_v16  ;;  %v1863_v38 = vmul.f32 0.6, %v3504_v36 }
 0x17d   : > { %1916 = vst [vmem:[%s3319_s26 + $0x58] sm:$0xff] %v1884_v48  ;;  %v1748_v9 = vadd.f32 %v2467_v13, %v1597_v49  ;;  %v2338_v2 = vpop.f32.mrb[61].mxu1  ;;  %v1742_v59 = vpop.f32.mrb[61].mxu0  ;;  %v1602_v48 = vmul.f32 0.5, %v1394_v33  ;;  %v1397_v49 = vadd.f32 %v1333_v44, %v3377_v40  ;;  %v1396_v13 = vadd.f32 %v1332_v58, %v3369_v6  ;;  %v1338_v44 = vld [vmem:[%s3291_s20 + $0xd0] sm:$0xff] }
 0x17e   : > { %1915 = vst [vmem:[%s3319_s26 + $0x50] sm:$0xff] %v1883_v45  ;;  %v2339_v50 = vadd.f32 %v2338_v2, %v2337_v5  ;;  %v1743_v34 = vadd.f32 %v1742_v59, %v1596_v1  ;;  %v2340_v18 = vpop.f32.mrb[62].mxu1  ;;  %v1335_v1 = vld [vmem:[%s3291_s20 + $0xb8] sm:$0xff]  ;;  %v3501_v2 = vld [vmem:[#allocation4_spill] sm:$0xff] }
 0x17f   : > { %v1886_v20 = vadd.f32 %v1854_v63, %v1748_v9  ;;  %v2341_v37 = vpop.f32.mrb[63].mxu1  ;;  %v1603_v63 = vmul.f32 0.5, %v1395_v15  ;;  %v1862_v40 = vmul.f32 0.6, %v3501_v2  ;;  %v1605_v59 = vmul.f32 0.5, %v1397_v49 }
 0x180   : > { %v1207_v42 = vadd.f32 %v2339_v50, %v3295_v29  ;;  %v1885_v61 = vadd.f32 %v1853_v4, %v1743_v34  ;;  %v2342_v60 = vadd.f32 %v2341_v37, %v2340_v18  ;;  %v2470_v7 = vpop.f32.mrb[62].mxu0  ;;  %v1334_v4 = vld [vmem:[%s3291_s20 + $0xb0] sm:$0xff]  ;;  %v1337_v37 = vld [vmem:[%s3291_s20 + $0xc8] sm:$0xff] }
 0x181   : > { %1918 = vst [vmem:[%s3319_s26 + $0x68] sm:$0xff] %v1886_v20  ;;  %v1758_v62 = vadd.f32 %v2470_v7, %v1599_v10  ;;  %v1752_v52 = vpop.f32.mrb[63].mxu0 }
 0x182   : > { %1917 = vst [vmem:[%s3319_s26 + $0x60] sm:$0xff] %v1885_v61  ;;  %v1210_v54 = vadd.f32 %v2342_v60, %v3301_v32  ;;  %v1753_v53 = vadd.f32 %v1752_v52, %v1598_v47  ;;  %v1398_v50 = vadd.f32 %v1334_v4, %v1207_v42  ;;  %v1864_v42 = vmul.f32 0.6, %v3503_v25 }
 0x183   : > { %v1888_v29 = vadd.f32 %v1856_v23, %v1758_v62  ;;  %v1604_v23 = vmul.f32 0.5, %v1396_v13 }
 0x184   : > { %v1887_v21 = vadd.f32 %v1855_v11, %v1753_v53  ;;  %v2343_v8 = vpop.f32.mrb[64].mxu1  ;;  %v2473_v41 = vpop.f32.mrb[64].mxu0  ;;  %v1399_v28 = vadd.f32 %v1335_v1, %v1210_v54  ;;  %v3502_v11 = vld [vmem:[#allocation3_spill] sm:$0xff]  ;;  %v1606_v53 = vmul.f32 0.5, %v1398_v50 }
 0x185   : > { %1920 = vst [vmem:[%s3319_s26 + $0x78] sm:$0xff] %v1888_v29  ;;  %v1768_v32 = vadd.f32 %v2473_v41, %v1601_v3  ;;  %v2344_v17 = vpop.f32.mrb[65].mxu1  ;;  %v1762_v22 = vpop.f32.mrb[65].mxu0  ;;  %v1861_v20 = vmul.f32 0.6, %v3502_v11  ;;  %v3505_v29 = vld [vmem:[#allocation15_spill] sm:$0xff] }
 0x186   : > { %1919 = vst [vmem:[%s3319_s26 + $0x70] sm:$0xff] %v1887_v21  ;;  %v2345_v12 = vadd.f32 %v2344_v17, %v2343_v8  ;;  %v1763_v27 = vadd.f32 %v1762_v22, %v1600_v39  ;;  %v2346_v51 = vpop.f32.mrb[66].mxu1  ;;  %v1607_v54 = vmul.f32 0.5, %v1399_v28  ;;  %v3511_v28 = vld [vmem:[#allocation17_spill] sm:$0xff] }
 0x187   : > { %v1890_v46 = vadd.f32 %v1858_v26, %v1768_v32  ;;  %v2347_v0 = vpop.f32.mrb[67].mxu1  ;;  %v3506_v32 = vld [vmem:[#allocation16_spill] sm:$0xff] }
 0x188   : > { %v1215_v43 = vadd.f32 %v2345_v12, %v3227_v19  ;;  %v1889_v55 = vadd.f32 %v1857_v57, %v1763_v27  ;;  %v2348_v45 = vadd.f32 %v2347_v0, %v2346_v51  ;;  %v2476_v5 = vpop.f32.mrb[66].mxu0  ;;  %v1339_v57 = vld [vmem:[%s3291_s20 + $0xd8] sm:$0xff]  ;;  %v3507_v27 = vld [vmem:[#allocation8_spill] sm:$0xff] }
 0x189   : > { %1922 = vst [vmem:[%s3319_s26 + $0x88] sm:$0xff] %v1890_v46  ;;  %v1778_v24 = vadd.f32 %v2476_v5, %v1603_v63  ;;  %v1772_v16 = vpop.f32.mrb[67].mxu0  ;;  %v1866_v51 = vmul.f32 0.6, %v3507_v27  ;;  %v3516_v27 = vld [vmem:[#allocation20_spill] sm:$0xff] }
 0x18a   : > { %1921 = vst [vmem:[%s3319_s26 + $0x80] sm:$0xff] %v1889_v55  ;;  %v1218_v30 = vadd.f32 %v2348_v45, %v3229_v31  ;;  %v1773_v9 = vadd.f32 %v1772_v16, %v1602_v48  ;;  %v1400_v8 = vadd.f32 %v1336_v56, %v1215_v43 }
 0x18b   : > { %v1892_v19 = vadd.f32 %v1860_v14, %v1778_v24  ;;  %v3508_v14 = vld [vmem:[#allocation7_spill] sm:$0xff] }
 0x18c   : > { %v1891_v6 = vadd.f32 %v1859_v35, %v1773_v9  ;;  %v2349_v34 = vpop.f32.mrb[68].mxu1  ;;  %v2479_v18 = vpop.f32.mrb[68].mxu0  ;;  %v1401_v26 = vadd.f32 %v1337_v37, %v1218_v30  ;;  %v1865_v35 = vmul.f32 0.6, %v3508_v14  ;;  %v1608_v48 = vmul.f32 0.5, %v1400_v8  ;;  %v3509_v9 = vld [vmem:[#allocation10_spill] sm:$0xff] }
 0x18d   : > { %1924 = vst [vmem:[%s3319_s26 + $0x98] sm:$0xff] %v1892_v19  ;;  %v1788_v10 = vadd.f32 %v2479_v18, %v1605_v59  ;;  %v2350_v47 = vpop.f32.mrb[69].mxu1  ;;  %v1782_v31 = vpop.f32.mrb[69].mxu0  ;;  %v1868_v2 = vmul.f32 0.6, %v3509_v9  ;;  %v1340_v59 = vld [vmem:[%s3291_s20 + $0xe0] sm:$0xff] }
 0x18e   : > { %1923 = vst [vmem:[%s3319_s26 + $0x90] sm:$0xff] %v1891_v6  ;;  %v2351_v61 = vadd.f32 %v2350_v47, %v2349_v34  ;;  %v1783_v60 = vadd.f32 %v1782_v31, %v1604_v23  ;;  %v2352_v7 = vpop.f32.mrb[70].mxu1  ;;  %v1609_v12 = vmul.f32 0.5, %v1401_v26  ;;  %v1341_v37 = vld [vmem:[%s3291_s20 + $0xe8] sm:$0xff]  ;;  %v1342_v8 = vld [vmem:[%s3291_s20 + $0xf0] sm:$0xff] }
 0x18f   : > { %v1894_v62 = vadd.f32 %v1862_v40, %v1788_v10  ;;  %v2353_v52 = vpop.f32.mrb[71].mxu1  ;;  %v3510_v40 = vld [vmem:[#allocation9_spill] sm:$0xff]  ;;  %v3512_v10 = vld [vmem:[#allocation18_spill] sm:$0xff]  ;;  %v3514_v26 = vld [vmem:[#allocation12_spill] sm:$0xff] }
 0x190   : > { %v1223_v3 = vadd.f32 %v2351_v61, %v3505_v29  ;;  %v1893_v15 = vadd.f32 %v1861_v20, %v1783_v60  ;;  %v2354_v33 = vadd.f32 %v2353_v52, %v2352_v7  ;;  %v2482_v21 = vpop.f32.mrb[70].mxu0  ;;  %v1867_v19 = vmul.f32 0.6, %v3510_v40 }
 0x191   : > { %1926 = vst [vmem:[%s3319_s26 + $0xa8] sm:$0xff] %v1894_v62  ;;  %v1798_v41 = vadd.f32 %v2482_v21, %v1607_v54  ;;  %v1792_v39 = vpop.f32.mrb[71].mxu0  ;;  %v1870_v29 = vmul.f32 0.6, %v3514_v26 }
 0x192   : > { %1925 = vst [vmem:[%s3319_s26 + $0xa0] sm:$0xff] %v1893_v15  ;;  %v1226_v17 = vadd.f32 %v2354_v33, %v3506_v32  ;;  %v1793_v22 = vadd.f32 %v1792_v39, %v1606_v53  ;;  %v1402_v43 = vadd.f32 %v1338_v44, %v1223_v3  ;;  %v3515_v39 = vld [vmem:[#allocation19_spill] sm:$0xff] }
 0x193   : > { %v1896_v58 = vadd.f32 %v1864_v42, %v1798_v41 }
 0x194   : > { %v1895_v46 = vadd.f32 %v1863_v38, %v1793_v22  ;;  %v2355_v0 = vpop.f32.mrb[72].mxu1  ;;  %v2485_v63 = vpop.f32.mrb[72].mxu0  ;;  %v1403_v49 = vadd.f32 %v1339_v57, %v1226_v17  ;;  %v1610_v23 = vmul.f32 0.5, %v1402_v43  ;;  %v3513_v38 = vld [vmem:[#allocation11_spill] sm:$0xff]  ;;  %v1343_v22 = vld [vmem:[%s3291_s20 + $0xf8] sm:$0xff] }
 0x195   : > { %1928 = vst [vmem:[%s3319_s26 + $0xb8] sm:$0xff] %v1896_v58  ;;  %v1808_v55 = vadd.f32 %v2485_v63, %v1609_v12  ;;  %v2356_v45 = vpop.f32.mrb[73].mxu1  ;;  %v1802_v5 = vpop.f32.mrb[73].mxu0  ;;  %v1869_v62 = vmul.f32 0.6, %v3513_v38 }
 0x196   : > { %1927 = vst [vmem:[%s3319_s26 + $0xb0] sm:$0xff] %v1895_v46  ;;  %v2357_v13 = vadd.f32 %v2356_v45, %v2355_v0  ;;  %v1803_v1 = vadd.f32 %v1802_v5, %v1608_v48  ;;  %v2358_v4 = vpop.f32.mrb[74].mxu1  ;;  %v1611_v24 = vmul.f32 0.5, %v1403_v49  ;;  %v3517_v0 = vld [vmem:[#allocation13_spill] sm:$0xff]  ;;  %v3518_v49 = vld [vmem:[#allocation14_spill] sm:$0xff] }
 0x197   : > { %v1898_v16 = vadd.f32 %v1866_v51, %v1808_v55  ;;  %v2359_v30 = vpop.f32.mrb[75].mxu1  ;;  %v1871_v63 = vmul.f32 0.6, %v3517_v0  ;;  %v1872_v43 = vmul.f32 0.6, %v3518_v49 }
 0x198   : > { %v1231_v50 = vadd.f32 %v2357_v13, %v3511_v28  ;;  %v1897_v6 = vadd.f32 %v1865_v35, %v1803_v1  ;;  %v2360_v34 = vadd.f32 %v2359_v30, %v2358_v4  ;;  %v2488_v18 = vpop.f32.mrb[74].mxu0 }
 0x199   : > { %1930 = vst [vmem:[%s3319_s26 + $0xc8] sm:$0xff] %v1898_v16  ;;  %v1818_v11 = vadd.f32 %v2488_v18, %v1611_v24  ;;  %v1812_v20 = vpop.f32.mrb[75].mxu0 }
 0x19a   : > { %1929 = vst [vmem:[%s3319_s26 + $0xc0] sm:$0xff] %v1897_v6  ;;  %v1234_v47 = vadd.f32 %v2360_v34, %v3512_v10  ;;  %v1813_v31 = vadd.f32 %v1812_v20, %v1610_v23  ;;  %v1404_v56 = vadd.f32 %v1340_v59, %v1231_v50 }
 0x19b   : > { %v1900_v61 = vadd.f32 %v1868_v2, %v1818_v11 }
 0x19c   : > { %v1899_v60 = vadd.f32 %v1867_v19, %v1813_v31  ;;  %v2361_v7 = vpop.f32.mrb[76].mxu1  ;;  %v1405_v25 = vadd.f32 %v1341_v37, %v1234_v47  ;;  %v2491_v42 = vpop.f32.mrb[76].mxu0  ;;  %v1612_v36 = vmul.f32 0.5, %v1404_v56 }
 0x19d   : > { %1932 = vst [vmem:[%s3319_s26 + $0xd8] sm:$0xff] %v1900_v61  ;;  %v2362_v52 = vpop.f32.mrb[77].mxu1  ;;  %v1822_v54 = vpop.f32.mrb[77].mxu0 }
 0x19e   : > { %1931 = vst [vmem:[%s3319_s26 + $0xd0] sm:$0xff] %v1899_v60  ;;  %v1613_v53 = vmul.f32 0.5, %v1405_v25  ;;  %v2363_v3 = vadd.f32 %v2362_v52, %v2361_v7  ;;  %v1823_v15 = vadd.f32 %v1822_v54, %v1612_v36  ;;  %v2364_v33 = vpop.f32.mrb[78].mxu1 }
 0x19f   : > { %v2365_v21 = vpop.f32.mrb[79].mxu1 }
 0x1a0   : > { %v1828_v41 = vadd.f32 %v2491_v42, %v1613_v53  ;;  %v1239_v57 = vadd.f32 %v2363_v3, %v3515_v39  ;;  %v1901_v44 = vadd.f32 %v1869_v62, %v1823_v15  ;;  %v2366_v32 = vadd.f32 %v2365_v21, %v2364_v33  ;;  %v2494_v17 = vpop.f32.mrb[78].mxu0 }
 0x1a1   : > { %v1832_v58 = vpop.f32.mrb[79].mxu0 }
 0x1a2   : > { %v1902_v12 = vadd.f32 %v1870_v29, %v1828_v41  ;;  %1933 = vst [vmem:[%s3319_s26 + $0xe0] sm:$0xff] %v1901_v44  ;;  %v1242_v51 = vadd.f32 %v2366_v32, %v3516_v27  ;;  %v1406_v14 = vadd.f32 %v1342_v8, %v1239_v57 }
 0x1a4   : > { %1934 = vst [vmem:[%s3319_s26 + $0xe8] sm:$0xff] %v1902_v12  ;;  %v1407_v35 = vadd.f32 %v1343_v22, %v1242_v51  ;;  %v1614_v46 = vmul.f32 0.5, %v1406_v14 }
 0x1a6   : > { %v1615_v48 = vmul.f32 0.5, %v1407_v35  ;;  %v1833_v55 = vadd.f32 %v1832_v58, %v1614_v46 }
 0x1a8   : > { %v1838_v45 = vadd.f32 %v2494_v17, %v1615_v48  ;;  %v1903_v5 = vadd.f32 %v1871_v63, %v1833_v55 }
 0x1aa   : > { %v1904_v13 = vadd.f32 %v1872_v43, %v1838_v45  ;;  %1935 = vst [vmem:[%s3319_s26 + $0xf0] sm:$0xff] %v1903_v5 }
 0x1ac   : > { %1936 = vst [vmem:[%s3319_s26 + $0xf8] sm:$0xff] %v1904_v13 }
 0x1ad PF: > { %s16_s23 = sadd.s32 1, %s2685_s23   ;;  %s3519_s21 = smov %s2681_s22 }
 0x1ae   : > { %p13_p5 = scmp.ge.s32.totalorder %s16_s23, 4   ;;  %s3520_s22 = smov %s3522_s24 }
 0x1b0   :  { %15 = sbr.rel (!%p13_p5) target bundleno = 2 (0x2), region = 94 }

</bundles_post_ra>
